<compile_context>
chip_gen: v7x
topology: tpu7x:2x2x1
jax: 0.10.0
libtpu: 0.0.40
codegen_flags: <defaults>
</compile_context>

<pallas_src>
import functools
import math

import jax
import jax.numpy as jnp
from jax.experimental import pallas as pl
from jax.experimental.pallas import tpu as pltpu

NEG_SLOPE = 0.01      # PyTorch nn.LeakyReLU default
C_IN_PAD = 8          # pad RGB channels 3 -> 8 (zero weights, exact)
K_TILE = 2048         # K tile for the (possibly huge) first linear layer
VMEM_LIMIT = 48 * 1024 * 1024   # headroom below v7x's 64 MiB physical VMEM


def _round_up(x, m):
    return ((x + m - 1) // m) * m


# ---------------------------------------------------------------------------
# Pallas kernel: 4x4/stride-2 conv as 4 shifted matmuls on space-to-depth input
# ---------------------------------------------------------------------------
def _conv_s2d_kernel(xf_ref, wt_ref, b_ref, o_ref, acc_ref, *, wsp, mext):
    # xf_ref : (1, Msrc, 4*Cin)   f32   flattened space-to-depth input rows
    # wt_ref : (4, 4*Cin, Coutp)  bf16  one (4*Cin, Coutp) matrix per 2x2 tap
    # b_ref  : (1, Coutp)         f32
    # o_ref  : (1, Mext, Coutp)   bf16
    # acc_ref: (Mext, Coutp)      f32 scratch accumulator
    for t in range(4):
        off = (t // 2) * wsp + (t % 2)
        patch = xf_ref[0, pl.ds(off, mext), :].astype(jnp.bfloat16)
        contrib = jnp.dot(patch, wt_ref[t], preferred_element_type=jnp.float32)
        if t == 0:
            acc_ref[...] = contrib
        else:
            acc_ref[...] += contrib
    y = acc_ref[...] + b_ref[...]
    o_ref[0] = jnp.where(y >= 0.0, y, NEG_SLOPE * y).astype(o_ref.dtype)


def conv4x4_s2_leaky(x, wt, bias):
    """x: (B, H, W, C) NHWC; wt: (4, 4*C, Coutp) bf16; bias: (1, Coutp) f32."""
    B, H, W, C = x.shape
    assert H % 2 == 0 and W % 2 == 0, (H, W)
    Ho, Wo = H // 2, W // 2
    Hs, Ws = Ho + 1, Wo + 1          # dims after pad-1 + 2x2 space-to-depth
    Wsp = Wo + 2                     # extended width (garbage cols, sliced off)
    assert wt.shape[1] == 4 * C, (wt.shape, C)
    coutp = wt.shape[2]

    # pad-1 + space-to-depth(2): conv4x4/s2 becomes conv2x2/s1 over 4*C channels
    xp = jnp.pad(x, ((0, 0), (1, 1), (1, 1), (0, 0)))
    xs = xp.reshape(B, Hs, 2, Ws, 2, C).transpose(0, 1, 3, 2, 4, 5)
    xs = xs.reshape(B, Hs, Ws, 4 * C)
    xe = jnp.pad(xs, ((0, 0), (0, 1), (0, 1), (0, 0)))     # (B, Ho+2, Wsp, 4C)
    msrc = (Ho + 2) * Wsp
    mext = Ho * Wsp
    xf = xe.reshape(B, msrc, 4 * C).astype(jnp.float32)

    kernel = functools.partial(_conv_s2d_kernel, wsp=Wsp, mext=mext)
    y_ext = pl.pallas_call(
        kernel,
        out_shape=jax.ShapeDtypeStruct((B, mext, coutp), jnp.bfloat16),
        grid=(B,),
        in_specs=[
            pl.BlockSpec((1, msrc, 4 * C), lambda b: (b, 0, 0)),
            pl.BlockSpec((4, 4 * C, coutp), lambda b: (0, 0, 0)),
            pl.BlockSpec((1, coutp), lambda b: (0, 0)),
        ],
        out_specs=pl.BlockSpec((1, mext, coutp), lambda b: (b, 0, 0)),
        scratch_shapes=[pltpu.VMEM((mext, coutp), jnp.float32)],
        compiler_params=pltpu.CompilerParams(
            dimension_semantics=("parallel",),
            vmem_limit_bytes=VMEM_LIMIT,
        ),
    )(xf, wt, bias)
    return y_ext.reshape(B, Ho, Wsp, coutp)[:, :, :Wo, :]


# ---------------------------------------------------------------------------
# Pallas kernel: fused l1 -> LeakyReLU -> l2 -> LeakyReLU -> l3
# (K of l1 tiled over the grid; l2/l3 run in the last-step epilogue)
# ---------------------------------------------------------------------------
def _fused_mlp_kernel(feat_ref, w1_ref, b1_ref, w2_ref, b2_ref, w3_ref, b3_ref,
                      o_ref, acc_ref):
    k = pl.program_id(0)

    @pl.when(k == 0)
    def _():
        acc_ref[...] = jnp.zeros_like(acc_ref)

    acc_ref[...] += jnp.dot(feat_ref[...], w1_ref[...],
                            preferred_element_type=jnp.float32)

    @pl.when(k == pl.num_programs(0) - 1)
    def _():
        z = acc_ref[...] + b1_ref[...]
        z = jnp.where(z >= 0.0, z, NEG_SLOPE * z)
        z = jnp.dot(z.astype(jnp.bfloat16), w2_ref[...],
                    preferred_element_type=jnp.float32) + b2_ref[...]
        z = jnp.where(z >= 0.0, z, NEG_SLOPE * z)
        z = jnp.dot(z.astype(jnp.bfloat16), w3_ref[...],
                    preferred_element_type=jnp.float32) + b3_ref[...]
        o_ref[...] = z.astype(o_ref.dtype)


def fused_mlp(feat, w1, b1, w2, b2, w3, b3):
    B, kp = feat.shape
    kp2, h1 = w1.shape
    assert kp == kp2, (kp, kp2)
    np_ = w3.shape[1]
    tk = kp if kp <= K_TILE else K_TILE
    assert kp % tk == 0, (kp, tk)
    return pl.pallas_call(
        _fused_mlp_kernel,
        out_shape=jax.ShapeDtypeStruct((B, np_), jnp.float32),
        grid=(kp // tk,),
        in_specs=[
            pl.BlockSpec((B, tk), lambda k: (0, k)),
            pl.BlockSpec((tk, h1), lambda k: (k, 0)),
            pl.BlockSpec((1, h1), lambda k: (0, 0)),
            pl.BlockSpec((h1, h1), lambda k: (0, 0)),
            pl.BlockSpec((1, h1), lambda k: (0, 0)),
            pl.BlockSpec((h1, np_), lambda k: (0, 0)),
            pl.BlockSpec((1, np_), lambda k: (0, 0)),
        ],
        out_specs=pl.BlockSpec((B, np_), lambda k: (0, 0)),
        scratch_shapes=[pltpu.VMEM((B, h1), jnp.float32)],
        compiler_params=pltpu.CompilerParams(
            dimension_semantics=("arbitrary",),
            vmem_limit_bytes=VMEM_LIMIT,
        ),
    )(feat, w1, b1, w2, b2, w3, b3)


# ---------------------------------------------------------------------------
# Full BC_Visual_Policy forward (uses prepared / pre-laid-out weights)
# ---------------------------------------------------------------------------
def bc_visual_policy_forward(p, x, robot_state, *, num_classes):
    # x: (B, 3, H, W) NCHW float32 (PyTorch layout at the module boundary).
    x = jnp.transpose(x, (0, 2, 3, 1))                        # one-time NCHW -> NHWC
    x = jnp.pad(x, ((0, 0), (0, 0), (0, 0), (0, C_IN_PAD - x.shape[-1])))
    h = conv4x4_s2_leaky(x, p["c1_wt"], p["c1_b"])            # (B, H/2, W/2, 128)
    h = conv4x4_s2_leaky(h, p["c2_wt"], p["c2_b"])            # (B, H/4, W/4, 128)
    h = conv4x4_s2_leaky(h, p["c3_wt"], p["c3_b"])            # (B, H/8, W/8, 256)
    B = x.shape[0]
    flat = h.reshape(B, -1)                 # NHWC flatten (w1 permuted to match)
    feat = jnp.concatenate([flat, robot_state.astype(flat.dtype)], axis=1)
    kp = p["w1"].shape[0]
    feat = jnp.pad(feat, ((0, 0), (0, kp - feat.shape[1])))   # zero-pad K
    out = fused_mlp(feat, p["w1"], p["b1"], p["w2"], p["b2"], p["w3"], p["b3"])
    return out[:, :num_classes]


# ---------------------------------------------------------------------------
# Parameter init (mirrors the PyTorch __init__ scheme) + one-time prep
# ---------------------------------------------------------------------------
def init_params(key, robot_state_dim, num_classes, img_size):
    first_linear = int(256 * math.floor(img_size / 8) * math.floor(img_size / 8))
    ks = jax.random.split(key, 6)

    def conv_w(k, cout, cin):
        std = math.sqrt(2.0 / (cout * 4 * 4))   # kaiming_normal_(fan_out)
        return std * jax.random.normal(k, (cout, cin, 4, 4), jnp.float32)

    def lin_w(k, cout, cin):
        return 0.01 * jax.random.normal(k, (cout, cin), jnp.float32)

    return {
        "c1_w": conv_w(ks[0], 64, 3),    "c1_b": jnp.zeros((64,), jnp.float32),
        "c2_w": conv_w(ks[1], 128, 64),  "c2_b": jnp.zeros((128,), jnp.float32),
        "c3_w": conv_w(ks[2], 256, 128), "c3_b": jnp.zeros((256,), jnp.float32),
        "l1_w": lin_w(ks[3], 256, first_linear + robot_state_dim),
        "l1_b": jnp.zeros((256,), jnp.float32),
        "l2_w": lin_w(ks[4], 256, 256),
        "l2_b": jnp.zeros((256,), jnp.float32),
        "l3_w": lin_w(ks[5], num_classes, 256),
        "l3_b": jnp.zeros((num_classes,), jnp.float32),
    }


def _prep_conv(w, b, cin_pad, cout_pad):
    """OIHW 4x4 weight -> 4 space-to-depth tap matrices (4, 4*Cinp, Coutp) bf16."""
    cout, cin, _, _ = w.shape
    if cin_pad > cin:
        w = jnp.pad(w, ((0, 0), (0, cin_pad - cin), (0, 0), (0, 0)))
        cin = cin_pad
    if cout_pad > cout:
        w = jnp.pad(w, ((0, cout_pad - cout), (0, 0), (0, 0), (0, 0)))
        b = jnp.pad(b, (0, cout_pad - cout))
        cout = cout_pad
    taps = []
    for dh in (0, 1):
        for dw in (0, 1):
            sub = w[:, :, 2 * dh: 2 * dh + 2, 2 * dw: 2 * dw + 2]   # (o, c, p, q)
            taps.append(jnp.transpose(sub, (2, 3, 1, 0)).reshape(4 * cin, cout))
    wt = jnp.stack(taps, axis=0).astype(jnp.bfloat16)               # (4, 4*cin, cout)
    return wt, b.reshape(1, -1).astype(jnp.float32)


def prepare_params(params, robot_state_dim, num_classes, img_size):
    p = {}
    p["c1_wt"], p["c1_b"] = _prep_conv(params["c1_w"], params["c1_b"], C_IN_PAD, 128)
    p["c2_wt"], p["c2_b"] = _prep_conv(params["c2_w"], params["c2_b"], 128, 128)
    p["c3_wt"], p["c3_b"] = _prep_conv(params["c3_w"], params["c3_b"], 128, 256)

    h3 = img_size // 8
    first_linear = 256 * h3 * h3
    l1 = params["l1_w"]                                       # (256, first_linear + robot)
    wc = l1[:, :first_linear].reshape(256, 256, h3, h3)       # (out, c, h, w): NCHW flatten
    wc = wc.transpose(0, 2, 3, 1).reshape(256, first_linear)  # -> NHWC flatten order
    w1 = jnp.concatenate([wc, l1[:, first_linear:]], axis=1).T        # (K, 256)
    k = w1.shape[0]
    kp = _round_up(k, 128) if k <= K_TILE else _round_up(k, K_TILE)
    p["w1"] = jnp.pad(w1, ((0, kp - k), (0, 0))).astype(jnp.bfloat16)
    p["b1"] = params["l1_b"].reshape(1, -1).astype(jnp.float32)
    p["w2"] = params["l2_w"].T.astype(jnp.bfloat16)
    p["b2"] = params["l2_b"].reshape(1, -1).astype(jnp.float32)
    np_ = _round_up(num_classes, 128)
    p["w3"] = jnp.pad(params["l3_w"].T,
                      ((0, 0), (0, np_ - num_classes))).astype(jnp.bfloat16)
    p["b3"] = jnp.pad(params["l3_b"],
                      (0, np_ - num_classes)).reshape(1, -1).astype(jnp.float32)
    return p


# ---------------------------------------------------------------------------
# Pure-JAX reference (lax conv, f32) for correctness checking
# ---------------------------------------------------------------------------
def _leaky(x):
    return jnp.where(x >= 0.0, x, NEG_SLOPE * x)


def reference_forward(params, x, robot_state):
    def conv(h, w, b):
        y = jax.lax.conv_general_dilated(
            h, w, window_strides=(2, 2), padding=[(1, 1), (1, 1)],
            dimension_numbers=("NCHW", "OIHW", "NCHW"))
        return _leaky(y + b[None, :, None, None])

    h = conv(x, params["c1_w"], params["c1_b"])
    h = conv(h, params["c2_w"], params["c2_b"])
    h = conv(h, params["c3_w"], params["c3_b"])
    feat = jnp.concatenate([h.reshape(x.shape[0], -1), robot_state], axis=1)
    z = _leaky(feat @ params["l1_w"].T + params["l1_b"])
    z = _leaky(z @ params["l2_w"].T + params["l2_b"])
    z = z @ params["l3_w"].T + params["l3_b"]
    return z


if __name__ == "__main__":
    # Small shapes consistent with the module: img_size=16 -> flatten dim 256*2*2
    B, IMG, ROBOT_STATE, NUM_CLASSES = 2, 16, 4, 32

    key = jax.random.PRNGKey(0)
    k_params, k_x, k_rs = jax.random.split(key, 3)

    params = init_params(k_params, ROBOT_STATE, NUM_CLASSES, IMG)
    prepared = prepare_params(params, ROBOT_STATE, NUM_CLASSES, IMG)
    x = jax.random.normal(k_x, (B, 3, IMG, IMG), jnp.float32)
    robot_state = jax.random.normal(k_rs, (B, ROBOT_STATE), jnp.float32)

    fwd = jax.jit(functools.partial(bc_visual_policy_forward,
                                    num_classes=NUM_CLASSES))
    out = jax.block_until_ready(fwd(prepared, x, robot_state))
    ref = jax.block_until_ready(reference_forward(params, x, robot_state))

    assert out.shape == (B, NUM_CLASSES), out.shape
    err = float(jnp.max(jnp.abs(out - ref)))
    scale = float(jnp.max(jnp.abs(ref)))
    # bf16 MXU inputs with f32 accumulation -> compare relative to output scale.
    assert err <= 0.1 * scale + 1e-5, (err, scale)

    print("KERNEL_OK")
</pallas_src>

<mosaic_0001>
module attributes {stable_mosaic.version = 11 : i64} {
  func.func @_conv_s2d_kernel(%arg0: i32, %arg1: memref<1x100x32xf32, #tpu.memory_space<vmem>>, %arg2: memref<4x32x128xbf16, #tpu.memory_space<vmem>>, %arg3: memref<1x128xf32, #tpu.memory_space<vmem>>, %arg4: memref<1x80x128xbf16, #tpu.memory_space<vmem>>, %arg5: memref<80x128xf32, #tpu.memory_space<vmem>>) attributes {dimension_semantics = [#tpu.dimension_semantics<parallel>], iteration_bounds = array<i64: 2>, scalar_prefetch = 0 : i64, scratch_operands = 1 : i64, tpu.core_type = #tpu.core_type<tc>, window_params = [{transform_indices = @transform_0, window_bounds = array<i64: 1, 100, 32>}, {pipeline_mode = #tpu.pipeline_mode<synchronous>, transform_indices = @transform_1, window_bounds = array<i64: 4, 32, 128>}, {pipeline_mode = #tpu.pipeline_mode<synchronous>, transform_indices = @transform_2, window_bounds = array<i64: 1, 128>}, {transform_indices = @transform_3, window_bounds = array<i64: 1, 80, 128>}]} {
    %c0 = arith.constant 0 : index
    %c0_0 = arith.constant 0 : index
    %c0_1 = arith.constant 0 : index
    %0 = vector.load %arg1[%c0, %c0_0, %c0_1] : memref<1x100x32xf32, #tpu.memory_space<vmem>>, vector<1x80x32xf32>
    %1 = vector.shape_cast %0 : vector<1x80x32xf32> to vector<80x32xf32>
    %2 = arith.truncf %1 : vector<80x32xf32> to vector<80x32xbf16>
    %c0_2 = arith.constant 0 : index
    %c0_3 = arith.constant 0 : index
    %c0_4 = arith.constant 0 : index
    %3 = vector.load %arg2[%c0_2, %c0_3, %c0_4] : memref<4x32x128xbf16, #tpu.memory_space<vmem>>, vector<1x32x128xbf16>
    %4 = vector.shape_cast %3 : vector<1x32x128xbf16> to vector<32x128xbf16>
    %cst = arith.constant dense<0.000000e+00> : vector<80x128xf32>
    %5 = tpu.matmul %2, %4, %cst {dimension_numbers = #tpu.dot_dimension_numbers<[1], [0], [0], [1], [0, 0, 1, 1], [], []>} : vector<80x32xbf16>, vector<32x128xbf16>, vector<80x128xf32> -> vector<80x128xf32>
    %c0_5 = arith.constant 0 : index
    %c0_6 = arith.constant 0 : index
    %6 = vector.load %arg5[%c0_5, %c0_6] : memref<80x128xf32, #tpu.memory_space<vmem>>, vector<80x128xf32>
    tpu.vector_store %arg5[%c0_5, %c0_6], %5 {strides = array<i32>} : memref<80x128xf32, #tpu.memory_space<vmem>>, vector<80x128xf32>,
    %c0_7 = arith.constant 0 : index
    %c1 = arith.constant 1 : index
    %c0_8 = arith.constant 0 : index
    %7 = vector.load %arg1[%c0_7, %c1, %c0_8] : memref<1x100x32xf32, #tpu.memory_space<vmem>>, vector<1x80x32xf32>
    %8 = vector.shape_cast %7 : vector<1x80x32xf32> to vector<80x32xf32>
    %9 = arith.truncf %8 : vector<80x32xf32> to vector<80x32xbf16>
    %c1_9 = arith.constant 1 : index
    %c0_10 = arith.constant 0 : index
    %c0_11 = arith.constant 0 : index
    %10 = vector.load %arg2[%c1_9, %c0_10, %c0_11] : memref<4x32x128xbf16, #tpu.memory_space<vmem>>, vector<1x32x128xbf16>
    %11 = vector.shape_cast %10 : vector<1x32x128xbf16> to vector<32x128xbf16>
    %cst_12 = arith.constant dense<0.000000e+00> : vector<80x128xf32>
    %12 = tpu.matmul %9, %11, %cst_12 {dimension_numbers = #tpu.dot_dimension_numbers<[1], [0], [0], [1], [0, 0, 1, 1], [], []>} : vector<80x32xbf16>, vector<32x128xbf16>, vector<80x128xf32> -> vector<80x128xf32>
    %c0_13 = arith.constant 0 : index
    %c0_14 = arith.constant 0 : index
    %13 = vector.load %arg5[%c0_13, %c0_14] : memref<80x128xf32, #tpu.memory_space<vmem>>, vector<80x128xf32>
    %14 = arith.addf %13, %12 : vector<80x128xf32>
    %c0_15 = arith.constant 0 : index
    %c0_16 = arith.constant 0 : index
    %15 = vector.load %arg5[%c0_15, %c0_16] : memref<80x128xf32, #tpu.memory_space<vmem>>, vector<80x128xf32>
    tpu.vector_store %arg5[%c0_15, %c0_16], %14 {strides = array<i32>} : memref<80x128xf32, #tpu.memory_space<vmem>>, vector<80x128xf32>,
    %c0_17 = arith.constant 0 : index
    %c10 = arith.constant 10 : index
    %c0_18 = arith.constant 0 : index
    %16 = vector.load %arg1[%c0_17, %c10, %c0_18] : memref<1x100x32xf32, #tpu.memory_space<vmem>>, vector<1x80x32xf32>
    %17 = vector.shape_cast %16 : vector<1x80x32xf32> to vector<80x32xf32>
    %18 = arith.truncf %17 : vector<80x32xf32> to vector<80x32xbf16>
    %c2 = arith.constant 2 : index
    %c0_19 = arith.constant 0 : index
    %c0_20 = arith.constant 0 : index
    %19 = vector.load %arg2[%c2, %c0_19, %c0_20] : memref<4x32x128xbf16, #tpu.memory_space<vmem>>, vector<1x32x128xbf16>
    %20 = vector.shape_cast %19 : vector<1x32x128xbf16> to vector<32x128xbf16>
    %cst_21 = arith.constant dense<0.000000e+00> : vector<80x128xf32>
    %21 = tpu.matmul %18, %20, %cst_21 {dimension_numbers = #tpu.dot_dimension_numbers<[1], [0], [0], [1], [0, 0, 1, 1], [], []>} : vector<80x32xbf16>, vector<32x128xbf16>, vector<80x128xf32> -> vector<80x128xf32>
    %c0_22 = arith.constant 0 : index
    %c0_23 = arith.constant 0 : index
    %22 = vector.load %arg5[%c0_22, %c0_23] : memref<80x128xf32, #tpu.memory_space<vmem>>, vector<80x128xf32>
    %23 = arith.addf %22, %21 : vector<80x128xf32>
    %c0_24 = arith.constant 0 : index
    %c0_25 = arith.constant 0 : index
    %24 = vector.load %arg5[%c0_24, %c0_25] : memref<80x128xf32, #tpu.memory_space<vmem>>, vector<80x128xf32>
    tpu.vector_store %arg5[%c0_24, %c0_25], %23 {strides = array<i32>} : memref<80x128xf32, #tpu.memory_space<vmem>>, vector<80x128xf32>,
    %c0_26 = arith.constant 0 : index
    %c11 = arith.constant 11 : index
    %c0_27 = arith.constant 0 : index
    %25 = vector.load %arg1[%c0_26, %c11, %c0_27] : memref<1x100x32xf32, #tpu.memory_space<vmem>>, vector<1x80x32xf32>
    %26 = vector.shape_cast %25 : vector<1x80x32xf32> to vector<80x32xf32>
    %27 = arith.truncf %26 : vector<80x32xf32> to vector<80x32xbf16>
    %c3 = arith.constant 3 : index
    %c0_28 = arith.constant 0 : index
    %c0_29 = arith.constant 0 : index
    %28 = vector.load %arg2[%c3, %c0_28, %c0_29] : memref<4x32x128xbf16, #tpu.memory_space<vmem>>, vector<1x32x128xbf16>
    %29 = vector.shape_cast %28 : vector<1x32x128xbf16> to vector<32x128xbf16>
    %cst_30 = arith.constant dense<0.000000e+00> : vector<80x128xf32>
    %30 = tpu.matmul %27, %29, %cst_30 {dimension_numbers = #tpu.dot_dimension_numbers<[1], [0], [0], [1], [0, 0, 1, 1], [], []>} : vector<80x32xbf16>, vector<32x128xbf16>, vector<80x128xf32> -> vector<80x128xf32>
    %c0_31 = arith.constant 0 : index
    %c0_32 = arith.constant 0 : index
    %31 = vector.load %arg5[%c0_31, %c0_32] : memref<80x128xf32, #tpu.memory_space<vmem>>, vector<80x128xf32>
    %32 = arith.addf %31, %30 : vector<80x128xf32>
    %c0_33 = arith.constant 0 : index
    %c0_34 = arith.constant 0 : index
    %33 = vector.load %arg5[%c0_33, %c0_34] : memref<80x128xf32, #tpu.memory_space<vmem>>, vector<80x128xf32>
    tpu.vector_store %arg5[%c0_33, %c0_34], %32 {strides = array<i32>} : memref<80x128xf32, #tpu.memory_space<vmem>>, vector<80x128xf32>,
    %c0_35 = arith.constant 0 : index
    %c0_36 = arith.constant 0 : index
    %34 = vector.load %arg5[%c0_35, %c0_36] : memref<80x128xf32, #tpu.memory_space<vmem>>, vector<80x128xf32>
    %c0_37 = arith.constant 0 : index
    %c0_38 = arith.constant 0 : index
    %35 = vector.load %arg3[%c0_37, %c0_38] : memref<1x128xf32, #tpu.memory_space<vmem>>, vector<1x128xf32>
    %36 = vector.broadcast %35 : vector<1x128xf32> to vector<80x128xf32>
    %37 = arith.addf %34, %36 : vector<80x128xf32>
    %cst_39 = arith.constant 0.000000e+00 : f32
    %38 = vector.broadcast %cst_39 : f32 to vector<80x128xf32>
    %39 = arith.cmpf oge, %37, %38 : vector<80x128xf32>
    %cst_40 = arith.constant 0.00999999977 : f32
    %40 = vector.broadcast %cst_40 : f32 to vector<80x128xf32>
    %41 = arith.mulf %40, %37 : vector<80x128xf32>
    %42 = arith.select %39, %37, %41 : vector<80x128xi1>, vector<80x128xf32>
    %43 = arith.truncf %42 : vector<80x128xf32> to vector<80x128xbf16>
    %c0_41 = arith.constant 0 : index
    %c0_42 = arith.constant 0 : index
    %c0_43 = arith.constant 0 : index
    %44 = vector.load %arg4[%c0_41, %c0_42, %c0_43] : memref<1x80x128xbf16, #tpu.memory_space<vmem>>, vector<1x80x128xbf16>
    %45 = vector.shape_cast %44 : vector<1x80x128xbf16> to vector<80x128xbf16>
    %46 = vector.shape_cast %43 : vector<80x128xbf16> to vector<1x80x128xbf16>
    tpu.vector_store %arg4[%c0_41, %c0_42, %c0_43], %46 {strides = array<i32>} : memref<1x80x128xbf16, #tpu.memory_space<vmem>>, vector<1x80x128xbf16>,
    return
  }
  func.func @transform_0(%arg0: i32) -> (i32, i32, i32) {
    %c0_i32 = arith.constant 0 : i32
    %c0_i32_0 = arith.constant 0 : i32
    %c0_i32_1 = arith.constant 0 : i32
    return %arg0, %c0_i32, %c0_i32_0 : i32, i32, i32
  }
  func.func @transform_1(%arg0: i32) -> (i32, i32, i32) {
    %c0_i32 = arith.constant 0 : i32
    %c0_i32_0 = arith.constant 0 : i32
    %c0_i32_1 = arith.constant 0 : i32
    %c0_i32_2 = arith.constant 0 : i32
    return %c0_i32, %c0_i32_0, %c0_i32_1 : i32, i32, i32
  }
  func.func @transform_2(%arg0: i32) -> (i32, i32) {
    %c0_i32 = arith.constant 0 : i32
    %c0_i32_0 = arith.constant 0 : i32
    %c0_i32_1 = arith.constant 0 : i32
    return %c0_i32, %c0_i32_0 : i32, i32
  }
  func.func @transform_3(%arg0: i32) -> (i32, i32, i32) {
    %c0_i32 = arith.constant 0 : i32
    %c0_i32_0 = arith.constant 0 : i32
    %c0_i32_1 = arith.constant 0 : i32
    return %arg0, %c0_i32, %c0_i32_0 : i32, i32, i32
  }
}

module attributes {stable_mosaic.version = 11 : i64} {
  func.func @_conv_s2d_kernel(%arg0: i32, %arg1: memref<1x36x512xf32, #tpu.memory_space<vmem>>, %arg2: memref<4x512x128xbf16, #tpu.memory_space<vmem>>, %arg3: memref<1x128xf32, #tpu.memory_space<vmem>>, %arg4: memref<1x24x128xbf16, #tpu.memory_space<vmem>>, %arg5: memref<24x128xf32, #tpu.memory_space<vmem>>) attributes {dimension_semantics = [#tpu.dimension_semantics<parallel>], iteration_bounds = array<i64: 2>, scalar_prefetch = 0 : i64, scratch_operands = 1 : i64, tpu.core_type = #tpu.core_type<tc>, window_params = [{transform_indices = @transform_0, window_bounds = array<i64: 1, 36, 512>}, {pipeline_mode = #tpu.pipeline_mode<synchronous>, transform_indices = @transform_1, window_bounds = array<i64: 4, 512, 128>}, {pipeline_mode = #tpu.pipeline_mode<synchronous>, transform_indices = @transform_2, window_bounds = array<i64: 1, 128>}, {transform_indices = @transform_3, window_bounds = array<i64: 1, 24, 128>}]} {
    %c0 = arith.constant 0 : index
    %c0_0 = arith.constant 0 : index
    %c0_1 = arith.constant 0 : index
    %0 = vector.load %arg1[%c0, %c0_0, %c0_1] : memref<1x36x512xf32, #tpu.memory_space<vmem>>, vector<1x24x512xf32>
    %1 = vector.shape_cast %0 : vector<1x24x512xf32> to vector<24x512xf32>
    %2 = arith.truncf %1 : vector<24x512xf32> to vector<24x512xbf16>
    %c0_2 = arith.constant 0 : index
    %c0_3 = arith.constant 0 : index
    %c0_4 = arith.constant 0 : index
    %3 = vector.load %arg2[%c0_2, %c0_3, %c0_4] : memref<4x512x128xbf16, #tpu.memory_space<vmem>>, vector<1x512x128xbf16>
    %4 = vector.shape_cast %3 : vector<1x512x128xbf16> to vector<512x128xbf16>
    %cst = arith.constant dense<0.000000e+00> : vector<24x128xf32>
    %5 = tpu.matmul %2, %4, %cst {dimension_numbers = #tpu.dot_dimension_numbers<[1], [0], [0], [1], [0, 0, 1, 1], [], []>} : vector<24x512xbf16>, vector<512x128xbf16>, vector<24x128xf32> -> vector<24x128xf32>
    %c0_5 = arith.constant 0 : index
    %c0_6 = arith.constant 0 : index
    %6 = vector.load %arg5[%c0_5, %c0_6] : memref<24x128xf32, #tpu.memory_space<vmem>>, vector<24x128xf32>
    tpu.vector_store %arg5[%c0_5, %c0_6], %5 {strides = array<i32>} : memref<24x128xf32, #tpu.memory_space<vmem>>, vector<24x128xf32>,
    %c0_7 = arith.constant 0 : index
    %c1 = arith.constant 1 : index
    %c0_8 = arith.constant 0 : index
    %7 = vector.load %arg1[%c0_7, %c1, %c0_8] : memref<1x36x512xf32, #tpu.memory_space<vmem>>, vector<1x24x512xf32>
    %8 = vector.shape_cast %7 : vector<1x24x512xf32> to vector<24x512xf32>
    %9 = arith.truncf %8 : vector<24x512xf32> to vector<24x512xbf16>
    %c1_9 = arith.constant 1 : index
    %c0_10 = arith.constant 0 : index
    %c0_11 = arith.constant 0 : index
    %10 = vector.load %arg2[%c1_9, %c0_10, %c0_11] : memref<4x512x128xbf16, #tpu.memory_space<vmem>>, vector<1x512x128xbf16>
    %11 = vector.shape_cast %10 : vector<1x512x128xbf16> to vector<512x128xbf16>
    %cst_12 = arith.constant dense<0.000000e+00> : vector<24x128xf32>
    %12 = tpu.matmul %9, %11, %cst_12 {dimension_numbers = #tpu.dot_dimension_numbers<[1], [0], [0], [1], [0, 0, 1, 1], [], []>} : vector<24x512xbf16>, vector<512x128xbf16>, vector<24x128xf32> -> vector<24x128xf32>
    %c0_13 = arith.constant 0 : index
    %c0_14 = arith.constant 0 : index
    %13 = vector.load %arg5[%c0_13, %c0_14] : memref<24x128xf32, #tpu.memory_space<vmem>>, vector<24x128xf32>
    %14 = arith.addf %13, %12 : vector<24x128xf32>
    %c0_15 = arith.constant 0 : index
    %c0_16 = arith.constant 0 : index
    %15 = vector.load %arg5[%c0_15, %c0_16] : memref<24x128xf32, #tpu.memory_space<vmem>>, vector<24x128xf32>
    tpu.vector_store %arg5[%c0_15, %c0_16], %14 {strides = array<i32>} : memref<24x128xf32, #tpu.memory_space<vmem>>, vector<24x128xf32>,
    %c0_17 = arith.constant 0 : index
    %c6 = arith.constant 6 : index
    %c0_18 = arith.constant 0 : index
    %16 = vector.load %arg1[%c0_17, %c6, %c0_18] : memref<1x36x512xf32, #tpu.memory_space<vmem>>, vector<1x24x512xf32>
    %17 = vector.shape_cast %16 : vector<1x24x512xf32> to vector<24x512xf32>
    %18 = arith.truncf %17 : vector<24x512xf32> to vector<24x512xbf16>
    %c2 = arith.constant 2 : index
    %c0_19 = arith.constant 0 : index
    %c0_20 = arith.constant 0 : index
    %19 = vector.load %arg2[%c2, %c0_19, %c0_20] : memref<4x512x128xbf16, #tpu.memory_space<vmem>>, vector<1x512x128xbf16>
    %20 = vector.shape_cast %19 : vector<1x512x128xbf16> to vector<512x128xbf16>
    %cst_21 = arith.constant dense<0.000000e+00> : vector<24x128xf32>
    %21 = tpu.matmul %18, %20, %cst_21 {dimension_numbers = #tpu.dot_dimension_numbers<[1], [0], [0], [1], [0, 0, 1, 1], [], []>} : vector<24x512xbf16>, vector<512x128xbf16>, vector<24x128xf32> -> vector<24x128xf32>
    %c0_22 = arith.constant 0 : index
    %c0_23 = arith.constant 0 : index
    %22 = vector.load %arg5[%c0_22, %c0_23] : memref<24x128xf32, #tpu.memory_space<vmem>>, vector<24x128xf32>
    %23 = arith.addf %22, %21 : vector<24x128xf32>
    %c0_24 = arith.constant 0 : index
    %c0_25 = arith.constant 0 : index
    %24 = vector.load %arg5[%c0_24, %c0_25] : memref<24x128xf32, #tpu.memory_space<vmem>>, vector<24x128xf32>
    tpu.vector_store %arg5[%c0_24, %c0_25], %23 {strides = array<i32>} : memref<24x128xf32, #tpu.memory_space<vmem>>, vector<24x128xf32>,
    %c0_26 = arith.constant 0 : index
    %c7 = arith.constant 7 : index
    %c0_27 = arith.constant 0 : index
    %25 = vector.load %arg1[%c0_26, %c7, %c0_27] : memref<1x36x512xf32, #tpu.memory_space<vmem>>, vector<1x24x512xf32>
    %26 = vector.shape_cast %25 : vector<1x24x512xf32> to vector<24x512xf32>
    %27 = arith.truncf %26 : vector<24x512xf32> to vector<24x512xbf16>
    %c3 = arith.constant 3 : index
    %c0_28 = arith.constant 0 : index
    %c0_29 = arith.constant 0 : index
    %28 = vector.load %arg2[%c3, %c0_28, %c0_29] : memref<4x512x128xbf16, #tpu.memory_space<vmem>>, vector<1x512x128xbf16>
    %29 = vector.shape_cast %28 : vector<1x512x128xbf16> to vector<512x128xbf16>
    %cst_30 = arith.constant dense<0.000000e+00> : vector<24x128xf32>
    %30 = tpu.matmul %27, %29, %cst_30 {dimension_numbers = #tpu.dot_dimension_numbers<[1], [0], [0], [1], [0, 0, 1, 1], [], []>} : vector<24x512xbf16>, vector<512x128xbf16>, vector<24x128xf32> -> vector<24x128xf32>
    %c0_31 = arith.constant 0 : index
    %c0_32 = arith.constant 0 : index
    %31 = vector.load %arg5[%c0_31, %c0_32] : memref<24x128xf32, #tpu.memory_space<vmem>>, vector<24x128xf32>
    %32 = arith.addf %31, %30 : vector<24x128xf32>
    %c0_33 = arith.constant 0 : index
    %c0_34 = arith.constant 0 : index
    %33 = vector.load %arg5[%c0_33, %c0_34] : memref<24x128xf32, #tpu.memory_space<vmem>>, vector<24x128xf32>
    tpu.vector_store %arg5[%c0_33, %c0_34], %32 {strides = array<i32>} : memref<24x128xf32, #tpu.memory_space<vmem>>, vector<24x128xf32>,
    %c0_35 = arith.constant 0 : index
    %c0_36 = arith.constant 0 : index
    %34 = vector.load %arg5[%c0_35, %c0_36] : memref<24x128xf32, #tpu.memory_space<vmem>>, vector<24x128xf32>
    %c0_37 = arith.constant 0 : index
    %c0_38 = arith.constant 0 : index
    %35 = vector.load %arg3[%c0_37, %c0_38] : memref<1x128xf32, #tpu.memory_space<vmem>>, vector<1x128xf32>
    %36 = vector.broadcast %35 : vector<1x128xf32> to vector<24x128xf32>
    %37 = arith.addf %34, %36 : vector<24x128xf32>
    %cst_39 = arith.constant 0.000000e+00 : f32
    %38 = vector.broadcast %cst_39 : f32 to vector<24x128xf32>
    %39 = arith.cmpf oge, %37, %38 : vector<24x128xf32>
    %cst_40 = arith.constant 0.00999999977 : f32
    %40 = vector.broadcast %cst_40 : f32 to vector<24x128xf32>
    %41 = arith.mulf %40, %37 : vector<24x128xf32>
    %42 = arith.select %39, %37, %41 : vector<24x128xi1>, vector<24x128xf32>
    %43 = arith.truncf %42 : vector<24x128xf32> to vector<24x128xbf16>
    %c0_41 = arith.constant 0 : index
    %c0_42 = arith.constant 0 : index
    %c0_43 = arith.constant 0 : index
    %44 = vector.load %arg4[%c0_41, %c0_42, %c0_43] : memref<1x24x128xbf16, #tpu.memory_space<vmem>>, vector<1x24x128xbf16>
    %45 = vector.shape_cast %44 : vector<1x24x128xbf16> to vector<24x128xbf16>
    %46 = vector.shape_cast %43 : vector<24x128xbf16> to vector<1x24x128xbf16>
    tpu.vector_store %arg4[%c0_41, %c0_42, %c0_43], %46 {strides = array<i32>} : memref<1x24x128xbf16, #tpu.memory_space<vmem>>, vector<1x24x128xbf16>,
    return
  }
  func.func @transform_0(%arg0: i32) -> (i32, i32, i32) {
    %c0_i32 = arith.constant 0 : i32
    %c0_i32_0 = arith.constant 0 : i32
    %c0_i32_1 = arith.constant 0 : i32
    return %arg0, %c0_i32, %c0_i32_0 : i32, i32, i32
  }
  func.func @transform_1(%arg0: i32) -> (i32, i32, i32) {
    %c0_i32 = arith.constant 0 : i32
    %c0_i32_0 = arith.constant 0 : i32
    %c0_i32_1 = arith.constant 0 : i32
    %c0_i32_2 = arith.constant 0 : i32
    return %c0_i32, %c0_i32_0, %c0_i32_1 : i32, i32, i32
  }
  func.func @transform_2(%arg0: i32) -> (i32, i32) {
    %c0_i32 = arith.constant 0 : i32
    %c0_i32_0 = arith.constant 0 : i32
    %c0_i32_1 = arith.constant 0 : i32
    return %c0_i32, %c0_i32_0 : i32, i32
  }
  func.func @transform_3(%arg0: i32) -> (i32, i32, i32) {
    %c0_i32 = arith.constant 0 : i32
    %c0_i32_0 = arith.constant 0 : i32
    %c0_i32_1 = arith.constant 0 : i32
    return %arg0, %c0_i32, %c0_i32_0 : i32, i32, i32
  }
}

module attributes {stable_mosaic.version = 11 : i64} {
  func.func @_conv_s2d_kernel(%arg0: i32, %arg1: memref<1x16x512xf32, #tpu.memory_space<vmem>>, %arg2: memref<4x512x256xbf16, #tpu.memory_space<vmem>>, %arg3: memref<1x256xf32, #tpu.memory_space<vmem>>, %arg4: memref<1x8x256xbf16, #tpu.memory_space<vmem>>, %arg5: memref<8x256xf32, #tpu.memory_space<vmem>>) attributes {dimension_semantics = [#tpu.dimension_semantics<parallel>], iteration_bounds = array<i64: 2>, scalar_prefetch = 0 : i64, scratch_operands = 1 : i64, tpu.core_type = #tpu.core_type<tc>, window_params = [{transform_indices = @transform_0, window_bounds = array<i64: 1, 16, 512>}, {pipeline_mode = #tpu.pipeline_mode<synchronous>, transform_indices = @transform_1, window_bounds = array<i64: 4, 512, 256>}, {pipeline_mode = #tpu.pipeline_mode<synchronous>, transform_indices = @transform_2, window_bounds = array<i64: 1, 256>}, {transform_indices = @transform_3, window_bounds = array<i64: 1, 8, 256>}]} {
    %c0 = arith.constant 0 : index
    %c0_0 = arith.constant 0 : index
    %c0_1 = arith.constant 0 : index
    %0 = vector.load %arg1[%c0, %c0_0, %c0_1] : memref<1x16x512xf32, #tpu.memory_space<vmem>>, vector<1x8x512xf32>
    %1 = vector.shape_cast %0 : vector<1x8x512xf32> to vector<8x512xf32>
    %2 = arith.truncf %1 : vector<8x512xf32> to vector<8x512xbf16>
    %c0_2 = arith.constant 0 : index
    %c0_3 = arith.constant 0 : index
    %c0_4 = arith.constant 0 : index
    %3 = vector.load %arg2[%c0_2, %c0_3, %c0_4] : memref<4x512x256xbf16, #tpu.memory_space<vmem>>, vector<1x512x256xbf16>
    %4 = vector.shape_cast %3 : vector<1x512x256xbf16> to vector<512x256xbf16>
    %cst = arith.constant dense<0.000000e+00> : vector<8x256xf32>
    %5 = tpu.matmul %2, %4, %cst {dimension_numbers = #tpu.dot_dimension_numbers<[1], [0], [0], [1], [0, 0, 1, 1], [], []>} : vector<8x512xbf16>, vector<512x256xbf16>, vector<8x256xf32> -> vector<8x256xf32>
    %c0_5 = arith.constant 0 : index
    %c0_6 = arith.constant 0 : index
    %6 = vector.load %arg5[%c0_5, %c0_6] : memref<8x256xf32, #tpu.memory_space<vmem>>, vector<8x256xf32>
    tpu.vector_store %arg5[%c0_5, %c0_6], %5 {strides = array<i32>} : memref<8x256xf32, #tpu.memory_space<vmem>>, vector<8x256xf32>,
    %c0_7 = arith.constant 0 : index
    %c1 = arith.constant 1 : index
    %c0_8 = arith.constant 0 : index
    %7 = vector.load %arg1[%c0_7, %c1, %c0_8] : memref<1x16x512xf32, #tpu.memory_space<vmem>>, vector<1x8x512xf32>
    %8 = vector.shape_cast %7 : vector<1x8x512xf32> to vector<8x512xf32>
    %9 = arith.truncf %8 : vector<8x512xf32> to vector<8x512xbf16>
    %c1_9 = arith.constant 1 : index
    %c0_10 = arith.constant 0 : index
    %c0_11 = arith.constant 0 : index
    %10 = vector.load %arg2[%c1_9, %c0_10, %c0_11] : memref<4x512x256xbf16, #tpu.memory_space<vmem>>, vector<1x512x256xbf16>
    %11 = vector.shape_cast %10 : vector<1x512x256xbf16> to vector<512x256xbf16>
    %cst_12 = arith.constant dense<0.000000e+00> : vector<8x256xf32>
    %12 = tpu.matmul %9, %11, %cst_12 {dimension_numbers = #tpu.dot_dimension_numbers<[1], [0], [0], [1], [0, 0, 1, 1], [], []>} : vector<8x512xbf16>, vector<512x256xbf16>, vector<8x256xf32> -> vector<8x256xf32>
    %c0_13 = arith.constant 0 : index
    %c0_14 = arith.constant 0 : index
    %13 = vector.load %arg5[%c0_13, %c0_14] : memref<8x256xf32, #tpu.memory_space<vmem>>, vector<8x256xf32>
    %14 = arith.addf %13, %12 : vector<8x256xf32>
    %c0_15 = arith.constant 0 : index
    %c0_16 = arith.constant 0 : index
    %15 = vector.load %arg5[%c0_15, %c0_16] : memref<8x256xf32, #tpu.memory_space<vmem>>, vector<8x256xf32>
    tpu.vector_store %arg5[%c0_15, %c0_16], %14 {strides = array<i32>} : memref<8x256xf32, #tpu.memory_space<vmem>>, vector<8x256xf32>,
    %c0_17 = arith.constant 0 : index
    %c4 = arith.constant 4 : index
    %c0_18 = arith.constant 0 : index
    %16 = vector.load %arg1[%c0_17, %c4, %c0_18] : memref<1x16x512xf32, #tpu.memory_space<vmem>>, vector<1x8x512xf32>
    %17 = vector.shape_cast %16 : vector<1x8x512xf32> to vector<8x512xf32>
    %18 = arith.truncf %17 : vector<8x512xf32> to vector<8x512xbf16>
    %c2 = arith.constant 2 : index
    %c0_19 = arith.constant 0 : index
    %c0_20 = arith.constant 0 : index
    %19 = vector.load %arg2[%c2, %c0_19, %c0_20] : memref<4x512x256xbf16, #tpu.memory_space<vmem>>, vector<1x512x256xbf16>
    %20 = vector.shape_cast %19 : vector<1x512x256xbf16> to vector<512x256xbf16>
    %cst_21 = arith.constant dense<0.000000e+00> : vector<8x256xf32>
    %21 = tpu.matmul %18, %20, %cst_21 {dimension_numbers = #tpu.dot_dimension_numbers<[1], [0], [0], [1], [0, 0, 1, 1], [], []>} : vector<8x512xbf16>, vector<512x256xbf16>, vector<8x256xf32> -> vector<8x256xf32>
    %c0_22 = arith.constant 0 : index
    %c0_23 = arith.constant 0 : index
    %22 = vector.load %arg5[%c0_22, %c0_23] : memref<8x256xf32, #tpu.memory_space<vmem>>, vector<8x256xf32>
    %23 = arith.addf %22, %21 : vector<8x256xf32>
    %c0_24 = arith.constant 0 : index
    %c0_25 = arith.constant 0 : index
    %24 = vector.load %arg5[%c0_24, %c0_25] : memref<8x256xf32, #tpu.memory_space<vmem>>, vector<8x256xf32>
    tpu.vector_store %arg5[%c0_24, %c0_25], %23 {strides = array<i32>} : memref<8x256xf32, #tpu.memory_space<vmem>>, vector<8x256xf32>,
    %c0_26 = arith.constant 0 : index
    %c5 = arith.constant 5 : index
    %c0_27 = arith.constant 0 : index
    %25 = vector.load %arg1[%c0_26, %c5, %c0_27] : memref<1x16x512xf32, #tpu.memory_space<vmem>>, vector<1x8x512xf32>
    %26 = vector.shape_cast %25 : vector<1x8x512xf32> to vector<8x512xf32>
    %27 = arith.truncf %26 : vector<8x512xf32> to vector<8x512xbf16>
    %c3 = arith.constant 3 : index
    %c0_28 = arith.constant 0 : index
    %c0_29 = arith.constant 0 : index
    %28 = vector.load %arg2[%c3, %c0_28, %c0_29] : memref<4x512x256xbf16, #tpu.memory_space<vmem>>, vector<1x512x256xbf16>
    %29 = vector.shape_cast %28 : vector<1x512x256xbf16> to vector<512x256xbf16>
    %cst_30 = arith.constant dense<0.000000e+00> : vector<8x256xf32>
    %30 = tpu.matmul %27, %29, %cst_30 {dimension_numbers = #tpu.dot_dimension_numbers<[1], [0], [0], [1], [0, 0, 1, 1], [], []>} : vector<8x512xbf16>, vector<512x256xbf16>, vector<8x256xf32> -> vector<8x256xf32>
    %c0_31 = arith.constant 0 : index
    %c0_32 = arith.constant 0 : index
    %31 = vector.load %arg5[%c0_31, %c0_32] : memref<8x256xf32, #tpu.memory_space<vmem>>, vector<8x256xf32>
    %32 = arith.addf %31, %30 : vector<8x256xf32>
    %c0_33 = arith.constant 0 : index
    %c0_34 = arith.constant 0 : index
    %33 = vector.load %arg5[%c0_33, %c0_34] : memref<8x256xf32, #tpu.memory_space<vmem>>, vector<8x256xf32>
    tpu.vector_store %arg5[%c0_33, %c0_34], %32 {strides = array<i32>} : memref<8x256xf32, #tpu.memory_space<vmem>>, vector<8x256xf32>,
    %c0_35 = arith.constant 0 : index
    %c0_36 = arith.constant 0 : index
    %34 = vector.load %arg5[%c0_35, %c0_36] : memref<8x256xf32, #tpu.memory_space<vmem>>, vector<8x256xf32>
    %c0_37 = arith.constant 0 : index
    %c0_38 = arith.constant 0 : index
    %35 = vector.load %arg3[%c0_37, %c0_38] : memref<1x256xf32, #tpu.memory_space<vmem>>, vector<1x256xf32>
    %36 = vector.broadcast %35 : vector<1x256xf32> to vector<8x256xf32>
    %37 = arith.addf %34, %36 : vector<8x256xf32>
    %cst_39 = arith.constant 0.000000e+00 : f32
    %38 = vector.broadcast %cst_39 : f32 to vector<8x256xf32>
    %39 = arith.cmpf oge, %37, %38 : vector<8x256xf32>
    %cst_40 = arith.constant 0.00999999977 : f32
    %40 = vector.broadcast %cst_40 : f32 to vector<8x256xf32>
    %41 = arith.mulf %40, %37 : vector<8x256xf32>
    %42 = arith.select %39, %37, %41 : vector<8x256xi1>, vector<8x256xf32>
    %43 = arith.truncf %42 : vector<8x256xf32> to vector<8x256xbf16>
    %c0_41 = arith.constant 0 : index
    %c0_42 = arith.constant 0 : index
    %c0_43 = arith.constant 0 : index
    %44 = vector.load %arg4[%c0_41, %c0_42, %c0_43] : memref<1x8x256xbf16, #tpu.memory_space<vmem>>, vector<1x8x256xbf16>
    %45 = vector.shape_cast %44 : vector<1x8x256xbf16> to vector<8x256xbf16>
    %46 = vector.shape_cast %43 : vector<8x256xbf16> to vector<1x8x256xbf16>
    tpu.vector_store %arg4[%c0_41, %c0_42, %c0_43], %46 {strides = array<i32>} : memref<1x8x256xbf16, #tpu.memory_space<vmem>>, vector<1x8x256xbf16>,
    return
  }
  func.func @transform_0(%arg0: i32) -> (i32, i32, i32) {
    %c0_i32 = arith.constant 0 : i32
    %c0_i32_0 = arith.constant 0 : i32
    %c0_i32_1 = arith.constant 0 : i32
    return %arg0, %c0_i32, %c0_i32_0 : i32, i32, i32
  }
  func.func @transform_1(%arg0: i32) -> (i32, i32, i32) {
    %c0_i32 = arith.constant 0 : i32
    %c0_i32_0 = arith.constant 0 : i32
    %c0_i32_1 = arith.constant 0 : i32
    %c0_i32_2 = arith.constant 0 : i32
    return %c0_i32, %c0_i32_0, %c0_i32_1 : i32, i32, i32
  }
  func.func @transform_2(%arg0: i32) -> (i32, i32) {
    %c0_i32 = arith.constant 0 : i32
    %c0_i32_0 = arith.constant 0 : i32
    %c0_i32_1 = arith.constant 0 : i32
    return %c0_i32, %c0_i32_0 : i32, i32
  }
  func.func @transform_3(%arg0: i32) -> (i32, i32, i32) {
    %c0_i32 = arith.constant 0 : i32
    %c0_i32_0 = arith.constant 0 : i32
    %c0_i32_1 = arith.constant 0 : i32
    return %arg0, %c0_i32, %c0_i32_0 : i32, i32, i32
  }
}

module attributes {stable_mosaic.version = 11 : i64} {
  func.func @_fused_mlp_kernel(%arg0: i32, %arg1: memref<2x1152xbf16, #tpu.memory_space<vmem>>, %arg2: memref<1152x256xbf16, #tpu.memory_space<vmem>>, %arg3: memref<1x256xf32, #tpu.memory_space<vmem>>, %arg4: memref<256x256xbf16, #tpu.memory_space<vmem>>, %arg5: memref<1x256xf32, #tpu.memory_space<vmem>>, %arg6: memref<256x128xbf16, #tpu.memory_space<vmem>>, %arg7: memref<1x128xf32, #tpu.memory_space<vmem>>, %arg8: memref<2x128xf32, #tpu.memory_space<vmem>>, %arg9: memref<2x256xf32, #tpu.memory_space<vmem>>) attributes {dimension_semantics = [#tpu.dimension_semantics<arbitrary>], iteration_bounds = array<i64: 1>, scalar_prefetch = 0 : i64, scratch_operands = 1 : i64, tpu.core_type = #tpu.core_type<tc>, window_params = [{transform_indices = @transform_0, window_bounds = array<i64: 2, 1152>}, {transform_indices = @transform_1, window_bounds = array<i64: 1152, 256>}, {pipeline_mode = #tpu.pipeline_mode<synchronous>, transform_indices = @transform_2, window_bounds = array<i64: 1, 256>}, {pipeline_mode = #tpu.pipeline_mode<synchronous>, transform_indices = @transform_3, window_bounds = array<i64: 256, 256>}, {pipeline_mode = #tpu.pipeline_mode<synchronous>, transform_indices = @transform_4, window_bounds = array<i64: 1, 256>}, {pipeline_mode = #tpu.pipeline_mode<synchronous>, transform_indices = @transform_5, window_bounds = array<i64: 256, 128>}, {pipeline_mode = #tpu.pipeline_mode<synchronous>, transform_indices = @transform_6, window_bounds = array<i64: 1, 128>}, {pipeline_mode = #tpu.pipeline_mode<synchronous>, transform_indices = @transform_7, window_bounds = array<i64: 2, 128>}]} {
    %c0_i32 = arith.constant 0 : i32
    %0 = arith.cmpi eq, %arg0, %c0_i32 : i32
    %1 = arith.extui %0 : i1 to i32
    %c0_i32_0 = arith.constant 0 : i32
    %2 = arith.cmpi ne, %1, %c0_i32_0 : i32
    scf.if %2 {
      %cst_10 = arith.constant 0.000000e+00 : f32
      %12 = vector.broadcast %cst_10 : f32 to vector<2x256xf32>
      %c0_11 = arith.constant 0 : index
      %c0_12 = arith.constant 0 : index
      %13 = vector.load %arg9[%c0_11, %c0_12] : memref<2x256xf32, #tpu.memory_space<vmem>>, vector<2x256xf32>
      tpu.vector_store %arg9[%c0_11, %c0_12], %12 {strides = array<i32>} : memref<2x256xf32, #tpu.memory_space<vmem>>, vector<2x256xf32>,
    } else {
    }
    %c0 = arith.constant 0 : index
    %c0_1 = arith.constant 0 : index
    %3 = vector.load %arg9[%c0, %c0_1] : memref<2x256xf32, #tpu.memory_space<vmem>>, vector<2x256xf32>
    %c0_2 = arith.constant 0 : index
    %c0_3 = arith.constant 0 : index
    %4 = vector.load %arg1[%c0_2, %c0_3] : memref<2x1152xbf16, #tpu.memory_space<vmem>>, vector<2x1152xbf16>
    %c0_4 = arith.constant 0 : index
    %c0_5 = arith.constant 0 : index
    %5 = vector.load %arg2[%c0_4, %c0_5] : memref<1152x256xbf16, #tpu.memory_space<vmem>>, vector<1152x256xbf16>
    %cst = arith.constant dense<0.000000e+00> : vector<2x256xf32>
    %6 = tpu.matmul %4, %5, %cst {dimension_numbers = #tpu.dot_dimension_numbers<[1], [0], [0], [1], [0, 0, 1, 1], [], []>} : vector<2x1152xbf16>, vector<1152x256xbf16>, vector<2x256xf32> -> vector<2x256xf32>
    %7 = arith.addf %3, %6 : vector<2x256xf32>
    %c0_6 = arith.constant 0 : index
    %c0_7 = arith.constant 0 : index
    %8 = vector.load %arg9[%c0_6, %c0_7] : memref<2x256xf32, #tpu.memory_space<vmem>>, vector<2x256xf32>
    tpu.vector_store %arg9[%c0_6, %c0_7], %7 {strides = array<i32>} : memref<2x256xf32, #tpu.memory_space<vmem>>, vector<2x256xf32>,
    %c0_i32_8 = arith.constant 0 : i32
    %9 = arith.cmpi eq, %arg0, %c0_i32_8 : i32
    %10 = arith.extui %9 : i1 to i32
    %c0_i32_9 = arith.constant 0 : i32
    %11 = arith.cmpi ne, %10, %c0_i32_9 : i32
    scf.if %11 {
      %c0_10 = arith.constant 0 : index
      %c0_11 = arith.constant 0 : index
      %12 = vector.load %arg9[%c0_10, %c0_11] : memref<2x256xf32, #tpu.memory_space<vmem>>, vector<2x256xf32>
      %c0_12 = arith.constant 0 : index
      %c0_13 = arith.constant 0 : index
      %13 = vector.load %arg3[%c0_12, %c0_13] : memref<1x256xf32, #tpu.memory_space<vmem>>, vector<1x256xf32>
      %14 = vector.broadcast %13 : vector<1x256xf32> to vector<2x256xf32>
      %15 = arith.addf %12, %14 : vector<2x256xf32>
      %cst_14 = arith.constant 0.000000e+00 : f32
      %16 = vector.broadcast %cst_14 : f32 to vector<2x256xf32>
      %17 = arith.cmpf oge, %15, %16 : vector<2x256xf32>
      %cst_15 = arith.constant 0.00999999977 : f32
      %18 = vector.broadcast %cst_15 : f32 to vector<2x256xf32>
      %19 = arith.mulf %18, %15 : vector<2x256xf32>
      %20 = arith.select %17, %15, %19 : vector<2x256xi1>, vector<2x256xf32>
      %21 = arith.truncf %20 : vector<2x256xf32> to vector<2x256xbf16>
      %c0_16 = arith.constant 0 : index
      %c0_17 = arith.constant 0 : index
      %22 = vector.load %arg4[%c0_16, %c0_17] : memref<256x256xbf16, #tpu.memory_space<vmem>>, vector<256x256xbf16>
      %cst_18 = arith.constant dense<0.000000e+00> : vector<2x256xf32>
      %23 = tpu.matmul %21, %22, %cst_18 {dimension_numbers = #tpu.dot_dimension_numbers<[1], [0], [0], [1], [0, 0, 1, 1], [], []>} : vector<2x256xbf16>, vector<256x256xbf16>, vector<2x256xf32> -> vector<2x256xf32>
      %c0_19 = arith.constant 0 : index
      %c0_20 = arith.constant 0 : index
      %24 = vector.load %arg5[%c0_19, %c0_20] : memref<1x256xf32, #tpu.memory_space<vmem>>, vector<1x256xf32>
      %25 = vector.broadcast %24 : vector<1x256xf32> to vector<2x256xf32>
      %26 = arith.addf %23, %25 : vector<2x256xf32>
      %cst_21 = arith.constant 0.000000e+00 : f32
      %27 = vector.broadcast %cst_21 : f32 to vector<2x256xf32>
      %28 = arith.cmpf oge, %26, %27 : vector<2x256xf32>
      %cst_22 = arith.constant 0.00999999977 : f32
      %29 = vector.broadcast %cst_22 : f32 to vector<2x256xf32>
      %30 = arith.mulf %29, %26 : vector<2x256xf32>
      %31 = arith.select %28, %26, %30 : vector<2x256xi1>, vector<2x256xf32>
      %32 = arith.truncf %31 : vector<2x256xf32> to vector<2x256xbf16>
      %c0_23 = arith.constant 0 : index
      %c0_24 = arith.constant 0 : index
      %33 = vector.load %arg6[%c0_23, %c0_24] : memref<256x128xbf16, #tpu.memory_space<vmem>>, vector<256x128xbf16>
      %cst_25 = arith.constant dense<0.000000e+00> : vector<2x128xf32>
      %34 = tpu.matmul %32, %33, %cst_25 {dimension_numbers = #tpu.dot_dimension_numbers<[1], [0], [0], [1], [0, 0, 1, 1], [], []>} : vector<2x256xbf16>, vector<256x128xbf16>, vector<2x128xf32> -> vector<2x128xf32>
      %c0_26 = arith.constant 0 : index
      %c0_27 = arith.constant 0 : index
      %35 = vector.load %arg7[%c0_26, %c0_27] : memref<1x128xf32, #tpu.memory_space<vmem>>, vector<1x128xf32>
      %36 = vector.broadcast %35 : vector<1x128xf32> to vector<2x128xf32>
      %37 = arith.addf %34, %36 : vector<2x128xf32>
      %c0_28 = arith.constant 0 : index
      %c0_29 = arith.constant 0 : index
      %38 = vector.load %arg8[%c0_28, %c0_29] : memref<2x128xf32, #tpu.memory_space<vmem>>, vector<2x128xf32>
      tpu.vector_store %arg8[%c0_28, %c0_29], %37 {strides = array<i32>} : memref<2x128xf32, #tpu.memory_space<vmem>>, vector<2x128xf32>,
    } else {
    }
    return
  }
  func.func @transform_0(%arg0: i32) -> (i32, i32) {
    %c0_i32 = arith.constant 0 : i32
    %c0_i32_0 = arith.constant 0 : i32
    return %c0_i32, %arg0 : i32, i32
  }
  func.func @transform_1(%arg0: i32) -> (i32, i32) {
    %c0_i32 = arith.constant 0 : i32
    %c0_i32_0 = arith.constant 0 : i32
    return %arg0, %c0_i32 : i32, i32
  }
  func.func @transform_2(%arg0: i32) -> (i32, i32) {
    %c0_i32 = arith.constant 0 : i32
    %c0_i32_0 = arith.constant 0 : i32
    %c0_i32_1 = arith.constant 0 : i32
    return %c0_i32, %c0_i32_0 : i32, i32
  }
  func.func @transform_3(%arg0: i32) -> (i32, i32) {
    %c0_i32 = arith.constant 0 : i32
    %c0_i32_0 = arith.constant 0 : i32
    %c0_i32_1 = arith.constant 0 : i32
    return %c0_i32, %c0_i32_0 : i32, i32
  }
  func.func @transform_4(%arg0: i32) -> (i32, i32) {
    %c0_i32 = arith.constant 0 : i32
    %c0_i32_0 = arith.constant 0 : i32
    %c0_i32_1 = arith.constant 0 : i32
    return %c0_i32, %c0_i32_0 : i32, i32
  }
  func.func @transform_5(%arg0: i32) -> (i32, i32) {
    %c0_i32 = arith.constant 0 : i32
    %c0_i32_0 = arith.constant 0 : i32
    %c0_i32_1 = arith.constant 0 : i32
    return %c0_i32, %c0_i32_0 : i32, i32
  }
  func.func @transform_6(%arg0: i32) -> (i32, i32) {
    %c0_i32 = arith.constant 0 : i32
    %c0_i32_0 = arith.constant 0 : i32
    %c0_i32_1 = arith.constant 0 : i32
    return %c0_i32, %c0_i32_0 : i32, i32
  }
  func.func @transform_7(%arg0: i32) -> (i32, i32) {
    %c0_i32 = arith.constant 0 : i32
    %c0_i32_0 = arith.constant 0 : i32
    %c0_i32_1 = arith.constant 0 : i32
    return %c0_i32, %c0_i32_0 : i32, i32
  }
}

</mosaic_0001>

<bundles_post_ra>
// kernel: bc_visual_policy_forward.4
= control target key start
LH: loop header
LB: loop body
LE: loop exit
PB: predicated region body
PF: predicated region fallthrough
CT: control target
= control target key end

     0   :  { %s1187_s12 = smov 0   ;;  %s1382_s0 = inlined_call_operand.vmem [shape: f32[2,100,32], index: 0, kind: input, shape index: {}]   ;;  %s1383_s1 = inlined_call_operand.vmem [shape: bf16[4,32,128], index: 1, kind: input, shape index: {}]   ;;  %s1384_s2 = inlined_call_operand.vmem [shape: f32[1,128], index: 2, kind: input, shape index: {}]   ;;  %s1385_s3 = inlined_call_operand.vmem [shape: bf16[2,80,128], index: 3, kind: output, shape index: {}]  }
   0x1 LB: > { %s914_s13 = sadd.s32 4294967295, %s1163_s12   ;;  %p918_p0 = scmp.ge.s32.totalorder %s1163_s12, 1  ;;  %s1163_s12 = sphi %s1187_s12, %s13_s12  }
   0x2   : > { %p137_p1 = scmp.lt.s32.totalorder %s1163_s12, 3 }
   0x4   : > { %p138_p2 = pnand %p918_p0, %p137_p1 }
   0x5   : > { %v1149_v0 = vld [vmem:[%s1383_s1] sm:$0xff] (!%p138_p2)   ;;  %v1165_v1 = vmov (!%p138_p2), 0.0   ;;  %v1150_v2 = vld [vmem:[%s1383_s1 + $0x10] sm:$0xff] (!%p138_p2)   ;;  %v1151_v3 = vld [vmem:[%s1383_s1 + $0x8] sm:$0xff] (!%p138_p2)   ;;  %vm1166_vm0 = vmmov (!%p138_p2), 0   ;;  %p161_p3 = scmp.lt.s32.totalorder (!%p138_p2), %s914_s13, 1 }
   0x6   : > { %141 = sbr.rel (%p138_p2) target bundleno = 318 (0x13e), region = 32  ;;  %1041 = vmatprep.subr.bf16.mxu0 (!%p138_p2), %v1165_v1  ;;  %1065 = vmatprep.subr.bf16.mxu1 (!%p138_p2), %v1165_v1  ;;  %v1152_v4 = vld [vmem:[%s1383_s1 + $0x18] sm:$0xff] (!%p138_p2)   ;;  %v1153_v5 = vld [vmem:[%s1383_s1 + $0x20] sm:$0xff] (!%p138_p2)   ;;  %vm203_vm1 = vcmask (!%p138_p2), 261120   ;;  %v1154_v11 = vld [vmem:[%s1383_s1 + $0x30] sm:$0xff] (!%p138_p2)  }
   0x7   : > { %1042 = vmatpush3.bf16.msra.mxu0 (!%p138_p2), %v1149_v0  ;;  %1045 = vmatprep.mubr.msk.bf16.mxu0 (!%p138_p2), %vm1166_vm0, %v1165_v1  ;;  %v1155_v15 = vld [vmem:[%s1383_s1 + $0x28] sm:$0xff] (!%p138_p2)   ;;  %v1156_v18 = vld [vmem:[%s1383_s1 + $0x38] sm:$0xff] (!%p138_p2)  }
   0x8   : > { %1066 = vmatpush3.bf16.msra.mxu1 (!%p138_p2), %v1150_v2  ;;  %1043 = vmatprep.subr.bf16.mxu0 (!%p138_p2), %v1165_v1 }
   0x9   : > { %1067 = vmatprep.subr.bf16.mxu1 (!%p138_p2), %v1165_v1  ;;  %1069 = vmatprep.mubr.msk.bf16.mxu1 (!%p138_p2), %vm1166_vm0, %v1165_v1 }
   0xb   : > { %1044 = vmatpush3.bf16.msra.mxu0 (!%p138_p2), %v1151_v3 }
   0xc   : > { %1068 = vmatpush3.bf16.msra.mxu1 (!%p138_p2), %v1152_v4  ;;  %1089 = vmatprep.subr.bf16.mxu0 (!%p138_p2), %v1165_v1 }
   0xd   : > { %s1387_s13 = smov (!%p161_p3, %s914_s13), 1  ;;  %1113 = vmatprep.subr.bf16.mxu1 %v1165_v1 }
   0xe   : > { %s1137_s22 = smul.u32 104, %s1387_s13 }
   0xf   : > { %s1138_s9 = smul.u32 40, %s1387_s13 }
  0x10   : > { %s1222_s25 = scalar_lea.vmem %s1382_s0, %s1137_s22 }
  0x11   : > { %v172_v6 = vld [vmem:[%s1222_s25] sm:$0xff]  ;;  %v173_v7 = vld [vmem:[%s1222_s25 + $0x8] sm:$0xff]  ;;  %v174_v13 = vld [vmem:[%s1222_s25 + $0x10] sm:$0xff]  ;;  %s1358_s14 = scalar_lea.vmem %s1385_s3, %s1138_s9 }
  0x12   : > { %v302_v8 = vld [vmem:[%s1222_s25 + $0x1] sm:$0xff]  ;;  %v182_v9 = vpack.c.bf16 %v173_v7, %v172_v6  ;;  %v303_v10 = vld [vmem:[%s1222_s25 + $0x9] sm:$0xff]  ;;  %v175_v14 = vld [vmem:[%s1222_s25 + $0x18] sm:$0xff] }
  0x13   : > { %v312_v12 = vpack.c.bf16 %v303_v10, %v302_v8  ;;  %v304_v16 = vld [vmem:[%s1222_s25 + $0x11] sm:$0xff]  ;;  %v305_v17 = vld [vmem:[%s1222_s25 + $0x19] sm:$0xff]  ;;  %v183_v19 = vpack.c.bf16 %v175_v14, %v174_v13  ;;  %v177_v22 = vld [vmem:[%s1222_s25 + $0x28] sm:$0xff] }
  0x14   : > { %1046 = vmatmul.mubr.msk.bf16.vlgmr.msra.gmra.mrb[0].mxu0 %vm203_vm1, %v182_v9  ;;  %v313_v20 = vpack.c.bf16 %v305_v17, %v304_v16  ;;  %v176_v21 = vld [vmem:[%s1222_s25 + $0x20] sm:$0xff]  ;;  %v307_v24 = vld [vmem:[%s1222_s25 + $0x29] sm:$0xff]  ;;  %v179_v28 = vld [vmem:[%s1222_s25 + $0x38] sm:$0xff] }
  0x15   : > { %1070 = vmatmul.mubr.msk.bf16.vlgmr.msra.gmra.mrb[0].mxu1 %vm203_vm1, %v312_v12  ;;  %1090 = vmatpush3.bf16.msra.mxu0 %v1153_v5  ;;  %v306_v23 = vld [vmem:[%s1222_s25 + $0x21] sm:$0xff]  ;;  %v184_v25 = vpack.c.bf16 %v177_v22, %v176_v21  ;;  %v178_v27 = vld [vmem:[%s1222_s25 + $0x30] sm:$0xff]  ;;  %v309_v30 = vld [vmem:[%s1222_s25 + $0x39] sm:$0xff] }
  0x16   : > { %1114 = vmatpush3.bf16.msra.mxu1 %v1154_v11  ;;  %1049 = vmatprep.mubr.msk.bf16.mxu0 %vm1166_vm0, %v1165_v1  ;;  %v314_v26 = vpack.c.bf16 %v307_v24, %v306_v23  ;;  %v308_v29 = vld [vmem:[%s1222_s25 + $0x31] sm:$0xff]  ;;  %v185_v31 = vpack.c.bf16 %v179_v28, %v178_v27  ;;  %v180_v33 = vld [vmem:[%s1222_s25 + $0x40] sm:$0xff]  ;;  %v181_v34 = vld [vmem:[%s1222_s25 + $0x48] sm:$0xff] }
  0x17   : > { %1073 = vmatprep.mubr.msk.bf16.mxu1 %vm1166_vm0, %v1165_v1  ;;  %1091 = vmatprep.subr.bf16.mxu0 %v1165_v1  ;;  %v315_v32 = vpack.c.bf16 %v309_v30, %v308_v29  ;;  %v310_v35 = vld [vmem:[%s1222_s25 + $0x41] sm:$0xff]  ;;  %v311_v36 = vld [vmem:[%s1222_s25 + $0x49] sm:$0xff]  ;;  %v186_v37 = vpack.c.bf16 %v181_v34, %v180_v33  ;;  %v453_v40 = vld [vmem:[%s1222_s25 + $0x12] sm:$0xff] }
  0x18   : > { %1115 = vmatprep.subr.bf16.mxu1 %v1165_v1  ;;  %v316_v38 = vpack.c.bf16 %v311_v36, %v310_v35  ;;  %v452_v39 = vld [vmem:[%s1222_s25 + $0xa] sm:$0xff]  ;;  %v603_v42 = vld [vmem:[%s1222_s25 + $0x13] sm:$0xff]  ;;  %v455_v46 = vld [vmem:[%s1222_s25 + $0x22] sm:$0xff] }
  0x19   : > { %1092 = vmatpush3.bf16.msra.mxu0 %v1155_v15  ;;  %v602_v41 = vld [vmem:[%s1222_s25 + $0xb] sm:$0xff]  ;;  %v462_v43 = vpack.c.bf16 %v453_v40, %v452_v39  ;;  %v454_v45 = vld [vmem:[%s1222_s25 + $0x1a] sm:$0xff]  ;;  %v605_v48 = vld [vmem:[%s1222_s25 + $0x23] sm:$0xff] }
  0x1a   : > { %1116 = vmatpush3.bf16.msra.mxu1 %v1156_v18  ;;  %v612_v44 = vpack.c.bf16 %v603_v42, %v602_v41  ;;  %v604_v47 = vld [vmem:[%s1222_s25 + $0x1b] sm:$0xff]  ;;  %v463_v49 = vpack.c.bf16 %v455_v46, %v454_v45  ;;  %v456_v51 = vld [vmem:[%s1222_s25 + $0x2a] sm:$0xff]  ;;  %v457_v52 = vld [vmem:[%s1222_s25 + $0x32] sm:$0xff] }
  0x1b   : > { %v613_v50 = vpack.c.bf16 %v605_v48, %v604_v47  ;;  %v606_v53 = vld [vmem:[%s1222_s25 + $0x2b] sm:$0xff]  ;;  %v607_v54 = vld [vmem:[%s1222_s25 + $0x33] sm:$0xff]  ;;  %v464_v55 = vpack.c.bf16 %v457_v52, %v456_v51  ;;  %v459_v58 = vld [vmem:[%s1222_s25 + $0x42] sm:$0xff] }
  0x1c   : > { %1050 = vmatmul.mubr.msk.bf16.gmra.mrb[4].mxu0 %vm203_vm1, %v183_v19  ;;  %v614_v56 = vpack.c.bf16 %v607_v54, %v606_v53  ;;  %v458_v57 = vld [vmem:[%s1222_s25 + $0x3a] sm:$0xff]  ;;  %v609_v60 = vld [vmem:[%s1222_s25 + $0x43] sm:$0xff]  ;;  %v461_v0 = vld [vmem:[%s1222_s25 + $0x52] sm:$0xff] }
  0x1d   : > { %1074 = vmatmul.mubr.msk.bf16.gmra.mrb[4].mxu1 %vm203_vm1, %v313_v20  ;;  %1053 = vmatprep.mubr.msk.bf16.mxu0 %vm1166_vm0, %v1165_v1  ;;  %v608_v59 = vld [vmem:[%s1222_s25 + $0x3b] sm:$0xff]  ;;  %v465_v61 = vpack.c.bf16 %v459_v58, %v458_v57  ;;  %v460_v63 = vld [vmem:[%s1222_s25 + $0x4a] sm:$0xff]  ;;  %v611_v3 = vld [vmem:[%s1222_s25 + $0x53] sm:$0xff] }
  0x1e   : > { %1077 = vmatprep.mubr.msk.bf16.mxu1 %vm1166_vm0, %v1165_v1  ;;  %v615_v62 = vpack.c.bf16 %v609_v60, %v608_v59  ;;  %v610_v2 = vld [vmem:[%s1222_s25 + $0x4b] sm:$0xff]  ;;  %v466_v4 = vpack.c.bf16 %v461_v0, %v460_v63  ;;  %v1350_v59 = vld [vmem:[%s1384_s2] ss:$0 sm:$0xff] }
  0x1f   : > { %v616_v5 = vpack.c.bf16 %v611_v3, %v610_v2 }
  0x24   : > { %1054 = vmatmul.mubr.msk.bf16.gmra.mrb[8].mxu0 %vm203_vm1, %v184_v25 }
  0x25   : > { %1078 = vmatmul.mubr.msk.bf16.gmra.mrb[8].mxu1 %vm203_vm1, %v314_v26  ;;  %1057 = vmatprep.mubr.msk.bf16.mxu0 %vm1166_vm0, %v1165_v1 }
  0x26   : > { %1081 = vmatprep.mubr.msk.bf16.mxu1 %vm1166_vm0, %v1165_v1 }
  0x2c   : > { %1058 = vmatmul.mubr.msk.bf16.gmra.mrb[12].mxu0 %vm203_vm1, %v185_v31 }
  0x2d   : > { %1082 = vmatmul.mubr.msk.bf16.gmra.mrb[12].mxu1 %vm203_vm1, %v315_v32  ;;  %1061 = vmatprep.mubr.msk.bf16.mxu0 %vm1166_vm0, %v1165_v1 }
  0x2e   : > { %1085 = vmatprep.mubr.msk.bf16.mxu1 %vm1166_vm0, %v1165_v1 }
  0x34   : > { %1062 = vmatmul.mubr.msk.bf16.gmra.mrb[16].mxu0 %vm203_vm1, %v186_v37 }
  0x35   : > { %1086 = vmatmul.mubr.msk.bf16.gmra.mrb[16].mxu1 %vm203_vm1, %v316_v38  ;;  %1093 = vmatprep.mubr.msk.bf16.mxu0 %vm1166_vm0, %v1165_v1 }
  0x36   : > { %1117 = vmatprep.mubr.msk.bf16.mxu1 %vm1166_vm0, %v1165_v1 }
  0x3c   : > { %1094 = vmatmul.mubr.msk.bf16.vlgmr.msra.gmra.mrb[20].mxu0 %vm203_vm1, %v462_v43 }
  0x3d   : > { %1118 = vmatmul.mubr.msk.bf16.vlgmr.msra.gmra.mrb[20].mxu1 %vm203_vm1, %v612_v44  ;;  %1097 = vmatprep.mubr.msk.bf16.mxu0 %vm1166_vm0, %v1165_v1 }
  0x3e   : > { %1121 = vmatprep.mubr.msk.bf16.mxu1 %vm1166_vm0, %v1165_v1 }
  0x44   : > { %1098 = vmatmul.mubr.msk.bf16.gmra.mrb[24].mxu0 %vm203_vm1, %v463_v49 }
  0x45   : > { %1122 = vmatmul.mubr.msk.bf16.gmra.mrb[24].mxu1 %vm203_vm1, %v613_v50  ;;  %1101 = vmatprep.mubr.msk.bf16.mxu0 %vm1166_vm0, %v1165_v1 }
  0x46   : > { %1125 = vmatprep.mubr.msk.bf16.mxu1 %vm1166_vm0, %v1165_v1 }
  0x4c   : > { %1102 = vmatmul.mubr.msk.bf16.gmra.mrb[28].mxu0 %vm203_vm1, %v464_v55 }
  0x4d   : > { %1126 = vmatmul.mubr.msk.bf16.gmra.mrb[28].mxu1 %vm203_vm1, %v614_v56  ;;  %1105 = vmatprep.mubr.msk.bf16.mxu0 %vm1166_vm0, %v1165_v1 }
  0x4e   : > { %1129 = vmatprep.mubr.msk.bf16.mxu1 %vm1166_vm0, %v1165_v1 }
  0x54   : > { %1106 = vmatmul.mubr.msk.bf16.gmra.mrb[32].mxu0 %vm203_vm1, %v465_v61 }
  0x55   : > { %1130 = vmatmul.mubr.msk.bf16.gmra.mrb[32].mxu1 %vm203_vm1, %v615_v62  ;;  %1109 = vmatprep.mubr.msk.bf16.mxu0 %vm1166_vm0, %v1165_v1 }
  0x56   : > { %1133 = vmatprep.mubr.msk.bf16.mxu1 %vm1166_vm0, %v1165_v1 }
  0x5c   : > { %1110 = vmatmul.mubr.msk.bf16.gmra.mrb[36].mxu0 %vm203_vm1, %v466_v4 }
  0x5d   : > { %1134 = vmatmul.mubr.msk.bf16.gmra.mrb[36].mxu1 %vm203_vm1, %v616_v5 }
  0xe7   : > { %v253_v6 = vpop.f32.mrb[0].mxu0 }
  0xe8   : > { %v383_v7 = vpop.f32.mrb[0].mxu1  ;;  %v1047_v8 = vpop.f32.mrb[1].mxu0 }
  0xe9   : > { %v432_v9 = vadd.f32 %v383_v7, %v253_v6  ;;  %v1071_v10 = vpop.f32.mrb[1].mxu1  ;;  %v256_v11 = vpop.f32.mrb[2].mxu0 }
  0xea   : > { %v386_v12 = vpop.f32.mrb[2].mxu1  ;;  %v1048_v13 = vpop.f32.mrb[3].mxu0 }
  0xeb   : > { %v433_v14 = vadd.f32 %v386_v12, %v256_v11  ;;  %v1072_v15 = vpop.f32.mrb[3].mxu1 }
  0xef   : > { %v261_v16 = vpop.f32.mrb[4].mxu0 }
  0xf0   : > { %v391_v1 = vpop.f32.mrb[4].mxu1  ;;  %v1051_v17 = vpop.f32.mrb[5].mxu0 }
  0xf1   : > { %v434_v18 = vadd.f32 %v391_v1, %v261_v16  ;;  %v1075_v19 = vpop.f32.mrb[5].mxu1  ;;  %v264_v20 = vpop.f32.mrb[6].mxu0 }
  0xf2   : > { %v394_v21 = vpop.f32.mrb[6].mxu1  ;;  %v1052_v22 = vpop.f32.mrb[7].mxu0 }
  0xf3   : > { %v435_v23 = vadd.f32 %v394_v21, %v264_v20  ;;  %v1076_v24 = vpop.f32.mrb[7].mxu1 }
  0xf7   : > { %v269_v25 = vpop.f32.mrb[8].mxu0 }
  0xf8   : > { %v399_v26 = vpop.f32.mrb[8].mxu1  ;;  %v1055_v27 = vpop.f32.mrb[9].mxu0 }
  0xf9   : > { %v1335_v28 = vadd.f32 %v399_v26, %v269_v25  ;;  %v1079_v29 = vpop.f32.mrb[9].mxu1  ;;  %v272_v30 = vpop.f32.mrb[10].mxu0 }
  0xfa   : > { %v402_v31 = vpop.f32.mrb[10].mxu1  ;;  %v1056_v32 = vpop.f32.mrb[11].mxu0 }
  0xfb   : > { %v1337_v33 = vadd.f32 %v402_v31, %v272_v30  ;;  %v1080_v34 = vpop.f32.mrb[11].mxu1 }
  0xff   : > { %v277_v35 = vpop.f32.mrb[12].mxu0 }
 0x100   : > { %v407_v36 = vpop.f32.mrb[12].mxu1  ;;  %v1059_v37 = vpop.f32.mrb[13].mxu0 }
 0x101   : > { %v1339_v38 = vadd.f32 %v407_v36, %v277_v35  ;;  %v1083_v39 = vpop.f32.mrb[13].mxu1  ;;  %v280_v40 = vpop.f32.mrb[14].mxu0 }
 0x102   : > { %v410_v41 = vpop.f32.mrb[14].mxu1  ;;  %v1060_v42 = vpop.f32.mrb[15].mxu0 }
 0x103   : > { %v1341_v43 = vadd.f32 %v410_v41, %v280_v40  ;;  %v1084_v44 = vpop.f32.mrb[15].mxu1 }
 0x107   : > { %v285_v45 = vpop.f32.mrb[16].mxu0 }
 0x108   : > { %v415_v46 = vpop.f32.mrb[16].mxu1  ;;  %v1063_v47 = vpop.f32.mrb[17].mxu0 }
 0x109   : > { %v1343_v48 = vadd.f32 %v415_v46, %v285_v45  ;;  %v1087_v49 = vpop.f32.mrb[17].mxu1  ;;  %v288_v50 = vpop.f32.mrb[18].mxu0 }
 0x10a   : > { %v418_v51 = vpop.f32.mrb[18].mxu1  ;;  %v1064_v52 = vpop.f32.mrb[19].mxu0 }
 0x10b   : > { %v1345_v53 = vadd.f32 %v418_v51, %v288_v50  ;;  %v1088_v54 = vpop.f32.mrb[19].mxu1 }
 0x10f   : > { %v533_v55 = vpop.f32.mrb[20].mxu0 }
 0x110   : > { %v582_v56 = vadd.f32 %v533_v55, %v432_v9  ;;  %v683_v57 = vpop.f32.mrb[20].mxu1  ;;  %v1095_v58 = vpop.f32.mrb[21].mxu0 }
 0x111   : > { %v1119_v60 = vpop.f32.mrb[21].mxu1  ;;  %v536_v61 = vpop.f32.mrb[22].mxu0 }
 0x112   : > { %v732_v62 = vadd.f32 %v683_v57, %v582_v56  ;;  %v583_v63 = vadd.f32 %v536_v61, %v433_v14  ;;  %v686_v0 = vpop.f32.mrb[22].mxu1  ;;  %v1096_v2 = vpop.f32.mrb[23].mxu0 }
 0x113   : > { %v1120_v3 = vpop.f32.mrb[23].mxu1 }
 0x114   : > { %v769_v4 = vadd.f32 %v1350_v59, %v732_v62  ;;  %v733_v5 = vadd.f32 %v686_v0, %v583_v63 }
 0x116   : > { %v789_v6 = vmul.f32 0.01, %v769_v4  ;;  %v770_v7 = vadd.f32 %v1350_v59, %v733_v5  ;;  %vm779_vm2 = vcmp.ge.f32.partialorder %v769_v4, 0.0 }
 0x117   : > { %v541_v8 = vpop.f32.mrb[24].mxu0 }
 0x118   : > { %vm780_vm3 = vcmp.ge.f32.partialorder %v770_v7, 0.0  ;;  %v790_v9 = vmul.f32 0.01, %v770_v7  ;;  %v584_v10 = vadd.f32 %v541_v8, %v434_v18  ;;  %v691_v11 = vpop.f32.mrb[24].mxu1  ;;  %v1099_v12 = vpop.f32.mrb[25].mxu0  ;;  %v799_v14 = vsel %vm779_vm2, %v769_v4, %v789_v6 }
 0x119   : > { %v1123_v13 = vpop.f32.mrb[25].mxu1  ;;  %v544_v15 = vpop.f32.mrb[26].mxu0 }
 0x11a   : > { %v800_v16 = vsel %vm780_vm3, %v770_v7, %v790_v9  ;;  %v734_v1 = vadd.f32 %v691_v11, %v584_v10  ;;  %v585_v17 = vadd.f32 %v544_v15, %v435_v23  ;;  %v694_v19 = vpop.f32.mrb[26].mxu1  ;;  %v1100_v20 = vpop.f32.mrb[27].mxu0 }
 0x11b   : > { %v987_v21 = vpack.c.bf16 %v800_v16, %v799_v14  ;;  %v1124_v22 = vpop.f32.mrb[27].mxu1 }
 0x11c   : > { %v771_v18 = vadd.f32 %v1350_v59, %v734_v1  ;;  %v735_v24 = vadd.f32 %v694_v19, %v585_v17 }
 0x11d   : > { %988 = vst [vmem:[%s1358_s14] sm:$0xff] %v987_v21  }
 0x11e   : > { %v791_v25 = vmul.f32 0.01, %v771_v18  ;;  %v772_v26 = vadd.f32 %v1350_v59, %v735_v24  ;;  %vm781_vm4 = vcmp.ge.f32.partialorder %v771_v18, 0.0 }
 0x11f   : > { %v549_v27 = vpop.f32.mrb[28].mxu0 }
 0x120   : > { %vm782_vm5 = vcmp.ge.f32.partialorder %v772_v26, 0.0  ;;  %v792_v29 = vmul.f32 0.01, %v772_v26  ;;  %v586_v30 = vadd.f32 %v549_v27, %v1335_v28  ;;  %v699_v31 = vpop.f32.mrb[28].mxu1  ;;  %v1103_v23 = vpop.f32.mrb[29].mxu0  ;;  %v801_v35 = vsel %vm781_vm4, %v771_v18, %v791_v25 }
 0x121   : > { %v1127_v32 = vpop.f32.mrb[29].mxu1  ;;  %v552_v34 = vpop.f32.mrb[30].mxu0 }
 0x122   : > { %v802_v36 = vsel %vm782_vm5, %v772_v26, %v792_v29  ;;  %v736_v37 = vadd.f32 %v699_v31, %v586_v30  ;;  %v587_v39 = vadd.f32 %v552_v34, %v1337_v33  ;;  %v702_v40 = vpop.f32.mrb[30].mxu1  ;;  %v1104_v41 = vpop.f32.mrb[31].mxu0 }
 0x123   : > { %v992_v42 = vpack.c.bf16 %v802_v36, %v801_v35  ;;  %v1128_v44 = vpop.f32.mrb[31].mxu1 }
 0x124   : > { %v773_v45 = vadd.f32 %v1350_v59, %v736_v37  ;;  %v737_v46 = vadd.f32 %v702_v40, %v587_v39 }
 0x125   : > { %1009 = vst [vmem:[%s1358_s14 + $0x8] sm:$0xff] %v992_v42  }
 0x126   : > { %v793_v47 = vmul.f32 0.01, %v773_v45  ;;  %v774_v28 = vadd.f32 %v1350_v59, %v737_v46  ;;  %vm783_vm6 = vcmp.ge.f32.partialorder %v773_v45, 0.0 }
 0x127   : > { %v557_v49 = vpop.f32.mrb[32].mxu0 }
 0x128   : > { %vm784_vm7 = vcmp.ge.f32.partialorder %v774_v28, 0.0  ;;  %v794_v50 = vmul.f32 0.01, %v774_v28  ;;  %v588_v51 = vadd.f32 %v557_v49, %v1339_v38  ;;  %v707_v52 = vpop.f32.mrb[32].mxu1  ;;  %v1107_v33 = vpop.f32.mrb[33].mxu0  ;;  %v803_v56 = vsel %vm783_vm6, %v773_v45, %v793_v47 }
 0x129   : > { %v1131_v54 = vpop.f32.mrb[33].mxu1  ;;  %v560_v55 = vpop.f32.mrb[34].mxu0 }
 0x12a   : > { %v804_v57 = vsel %vm784_vm7, %v774_v28, %v794_v50  ;;  %v738_v58 = vadd.f32 %v707_v52, %v588_v51  ;;  %v589_v60 = vadd.f32 %v560_v55, %v1341_v43  ;;  %v710_v61 = vpop.f32.mrb[34].mxu1  ;;  %v1108_v62 = vpop.f32.mrb[35].mxu0 }
 0x12b   : > { %v997_v63 = vpack.c.bf16 %v804_v57, %v803_v56  ;;  %v1132_v0 = vpop.f32.mrb[35].mxu1 }
 0x12c   : > { %v775_v2 = vadd.f32 %v1350_v59, %v738_v58  ;;  %v739_v3 = vadd.f32 %v710_v61, %v589_v60 }
 0x12d   : > { %1010 = vst [vmem:[%s1358_s14 + $0x10] sm:$0xff] %v997_v63  }
 0x12e   : > { %v795_v4 = vmul.f32 0.01, %v775_v2  ;;  %v776_v38 = vadd.f32 %v1350_v59, %v739_v3  ;;  %vm785_vm8 = vcmp.ge.f32.partialorder %v775_v2, 0.0 }
 0x12f   : > { %v565_v5 = vpop.f32.mrb[36].mxu0 }
 0x130   : > { %vm786_vm9 = vcmp.ge.f32.partialorder %v776_v38, 0.0  ;;  %v796_v6 = vmul.f32 0.01, %v776_v38  ;;  %v590_v7 = vadd.f32 %v565_v5, %v1343_v48  ;;  %v715_v8 = vpop.f32.mrb[36].mxu1  ;;  %v1111_v43 = vpop.f32.mrb[37].mxu0  ;;  %v805_v11 = vsel %vm785_vm8, %v775_v2, %v795_v4 }
 0x131   : > { %v1135_v9 = vpop.f32.mrb[37].mxu1  ;;  %v568_v10 = vpop.f32.mrb[38].mxu0 }
 0x132   : > { %v806_v12 = vsel %vm786_vm9, %v776_v38, %v796_v6  ;;  %v740_v13 = vadd.f32 %v715_v8, %v590_v7  ;;  %v591_v15 = vadd.f32 %v568_v10, %v1345_v53  ;;  %v718_v14 = vpop.f32.mrb[38].mxu1  ;;  %v1112_v16 = vpop.f32.mrb[39].mxu0 }
 0x133   : > { %v1002_v1 = vpack.c.bf16 %v806_v12, %v805_v11  ;;  %v1136_v17 = vpop.f32.mrb[39].mxu1 }
 0x134   : > { %v777_v19 = vadd.f32 %v1350_v59, %v740_v13  ;;  %v741_v20 = vadd.f32 %v718_v14, %v591_v15 }
 0x135   : > { %1011 = vst [vmem:[%s1358_s14 + $0x18] sm:$0xff] %v1002_v1  }
 0x136   : > { %v797_v21 = vmul.f32 0.01, %v777_v19  ;;  %v778_v48 = vadd.f32 %v1350_v59, %v741_v20  ;;  %vm787_vm10 = vcmp.ge.f32.partialorder %v777_v19, 0.0 }
 0x138   : > { %vm788_vm11 = vcmp.ge.f32.partialorder %v778_v48, 0.0  ;;  %v798_v22 = vmul.f32 0.01, %v778_v48  ;;  %v807_v18 = vsel %vm787_vm10, %v777_v19, %v797_v21 }
 0x13a   : > { %v808_v24 = vsel %vm788_vm11, %v778_v48, %v798_v22 }
 0x13b   : > { %v1007_v25 = vpack.c.bf16 %v808_v24, %v807_v18 }
 0x13d   : > { %1012 = vst [vmem:[%s1358_s14 + $0x20] sm:$0xff] %v1007_v25  }
 0x13e PF: > { %s13_s12 = sadd.s32 1, %s1163_s12  }
 0x13f   : > { %p10_p4 = scmp.ge.s32.totalorder %s13_s12, 4  }
 0x141   :  { %12 = sbr.rel (!%p10_p4) target bundleno = 1 (0x1), region = 65 }

// kernel: bc_visual_policy_forward.5
= control target key start
LH: loop header
LB: loop body
LE: loop exit
PB: predicated region body
PF: predicated region fallthrough
CT: control target
= control target key end

     0   :  { %s2704_s12 = smov 0   ;;  %s3218_s0 = inlined_call_operand.vmem [shape: f32[2,36,512], index: 0, kind: input, shape index: {}]   ;;  %s3219_s1 = inlined_call_operand.vmem [shape: bf16[4,512,128], index: 1, kind: input, shape index: {}]   ;;  %s3220_s2 = inlined_call_operand.vmem [shape: f32[1,128], index: 2, kind: input, shape index: {}]   ;;  %s3221_s3 = inlined_call_operand.vmem [shape: bf16[2,24,128], index: 3, kind: output, shape index: {}]  }
   0x1 LB: > { %s1973_s13 = sadd.s32 4294967295, %s2682_s12   ;;  %p1977_p0 = scmp.ge.s32.totalorder %s2682_s12, 1  ;;  %s2682_s12 = sphi %s2704_s12, %s13_s12  }
   0x2   : > { %p137_p1 = scmp.lt.s32.totalorder %s2682_s12, 3 }
   0x4   : > { %p138_p2 = pnand %p1977_p0, %p137_p1 }
   0x5   : > { %v2548_v0 = vld [vmem:[%s3219_s1 + $0x40] sm:$0xff] (!%p138_p2)   ;;  %v2552_v4 = vld [vmem:[%s3219_s1 + $0x48] sm:$0xff] (!%p138_p2)   ;;  %v2556_v8 = vld [vmem:[%s3219_s1 + $0x50] sm:$0xff] (!%p138_p2)   ;;  %p161_p3 = scmp.lt.s32.totalorder (!%p138_p2), %s1973_s13, 1  ;;  %vm636_vm0 = vsmask.f32 (!%p138_p2), 7424 }
   0x6   : > { %141 = sbr.rel (%p138_p2) target bundleno = 371 (0x173), region = 32  ;;  %v2549_v1 = vld [vmem:[%s3219_s1 + $0xc0] sm:$0xff] (!%p138_p2)   ;;  %2314 = vmatprep.subr.bf16.mxu0 (!%p138_p2), %v2548_v0  ;;  %v2553_v5 = vld [vmem:[%s3219_s1 + $0xc8] sm:$0xff] (!%p138_p2)   ;;  %v2557_v9 = vld [vmem:[%s3219_s1 + $0xd0] sm:$0xff] (!%p138_p2)   ;;  %vm1099_vm1 = vcmask (!%p138_p2), 1044480  }
   0x7   : > { %v2550_v2 = vld [vmem:[%s3219_s1] sm:$0xff] (!%p138_p2)   ;;  %2342 = vmatprep.subr.bf16.mxu1 (!%p138_p2), %v2549_v1  ;;  %v2554_v6 = vld [vmem:[%s3219_s1 + $0x8] sm:$0xff] (!%p138_p2)   ;;  %v2558_v10 = vld [vmem:[%s3219_s1 + $0x10] sm:$0xff] (!%p138_p2)   ;;  %vm1506_vm2 = vsmask.f32 (!%p138_p2), 4352 }
   0x8   : > { %v2551_v3 = vld [vmem:[%s3219_s1 + $0x80] sm:$0xff] (!%p138_p2)   ;;  %2315 = vmatpush3.bf16.msra.mxu0 (!%p138_p2), %v2550_v2  ;;  %v2555_v7 = vld [vmem:[%s3219_s1 + $0x88] sm:$0xff] (!%p138_p2)   ;;  %v2559_v11 = vld [vmem:[%s3219_s1 + $0x90] sm:$0xff] (!%p138_p2)  }
   0x9   : > { %2343 = vmatpush3.bf16.msra.mxu1 (!%p138_p2), %v2551_v3  ;;  %2316 = vmatprep.subr.bf16.mxu0 (!%p138_p2), %v2552_v4  ;;  %v2560_v12 = vld [vmem:[%s3219_s1 + $0x58] sm:$0xff] (!%p138_p2)   ;;  %v2564_v16 = vld [vmem:[%s3219_s1 + $0x60] sm:$0xff] (!%p138_p2)   ;;  %v2568_v20 = vld [vmem:[%s3219_s1 + $0x68] sm:$0xff] (!%p138_p2)  }
   0xa   : > { %2344 = vmatprep.subr.bf16.mxu1 (!%p138_p2), %v2553_v5  ;;  %v2561_v13 = vld [vmem:[%s3219_s1 + $0xd8] sm:$0xff] (!%p138_p2)   ;;  %v2565_v17 = vld [vmem:[%s3219_s1 + $0xe0] sm:$0xff] (!%p138_p2)   ;;  %v2569_v21 = vld [vmem:[%s3219_s1 + $0xe8] sm:$0xff] (!%p138_p2)  }
   0xb   : > { %v2562_v14 = vld [vmem:[%s3219_s1 + $0x18] sm:$0xff] (!%p138_p2)   ;;  %v2566_v18 = vld [vmem:[%s3219_s1 + $0x20] sm:$0xff] (!%p138_p2)   ;;  %v2570_v22 = vld [vmem:[%s3219_s1 + $0x28] sm:$0xff] (!%p138_p2)  }
   0xc   : > { %2317 = vmatpush3.bf16.msra.mxu0 (!%p138_p2), %v2554_v6  ;;  %v2563_v15 = vld [vmem:[%s3219_s1 + $0x98] sm:$0xff] (!%p138_p2)   ;;  %v2567_v19 = vld [vmem:[%s3219_s1 + $0xa0] sm:$0xff] (!%p138_p2)   ;;  %v2571_v23 = vld [vmem:[%s3219_s1 + $0xa8] sm:$0xff] (!%p138_p2)  }
   0xd   : > { %2345 = vmatpush3.bf16.msra.mxu1 %v2555_v7  ;;  %2318 = vmatprep.subr.bf16.mxu0 %v2556_v8  ;;  %s3223_s13 = smov (!%p161_p3, %s1973_s13), 1  ;;  %v2572_v24 = vld [vmem:[%s3219_s1 + $0x70] sm:$0xff]   ;;  %v2576_v28 = vld [vmem:[%s3219_s1 + $0x78] sm:$0xff]   ;;  %v2580_v44 = vld [vmem:[%s3219_s1 + $0x140] sm:$0xff]  }
   0xe   : > { %2346 = vmatprep.subr.bf16.mxu1 %v2557_v9  ;;  %v2573_v25 = vld [vmem:[%s3219_s1 + $0xf0] sm:$0xff]   ;;  %s2538_s16 = smul.u32 160, %s3223_s13  ;;  %v2577_v29 = vld [vmem:[%s3219_s1 + $0xf8] sm:$0xff]   ;;  %v2581_v45 = vld [vmem:[%s3219_s1 + $0x1c0] sm:$0xff]  }
   0xf   : > { %v2574_v26 = vld [vmem:[%s3219_s1 + $0x30] sm:$0xff]   ;;  %v2578_v30 = vld [vmem:[%s3219_s1 + $0x38] sm:$0xff]   ;;  %v2582_v46 = vld [vmem:[%s3219_s1 + $0x100] sm:$0xff]   ;;  %s2539_s6 = smul.u32 12, %s3223_s13 }
  0x10   : > { %2319 = vmatpush3.bf16.msra.mxu0 %v2558_v10  ;;  %v2575_v27 = vld [vmem:[%s3219_s1 + $0xb0] sm:$0xff]   ;;  %s2812_s27 = scalar_lea.vmem %s3218_s0, %s2538_s16  ;;  %v2579_v31 = vld [vmem:[%s3219_s1 + $0xb8] sm:$0xff]   ;;  %v2583_v47 = vld [vmem:[%s3219_s1 + $0x180] sm:$0xff]  }
  0x11   : > { %2347 = vmatpush3.bf16.msra.mxu1 %v2559_v11  ;;  %2320 = vmatprep.subr.bf16.mxu0 %v2560_v12  ;;  %v173_v32 = vld [vmem:[%s2812_s27 + $0x8] sm:$0xff]  ;;  %v175_v34 = vld [vmem:[%s2812_s27 + $0x18] sm:$0xff]  ;;  %v172_v37 = vld [vmem:[%s2812_s27] sm:$0xff]  ;;  %s170_s9 = scalar_lea.vmem %s3221_s3, %s2539_s6 }
  0x12   : > { %2348 = vmatprep.subr.bf16.mxu1 %v2561_v13  ;;  %v2822_v33 = vld [vmem:[%s2812_s27 + $0x28] sm:$0xff]  ;;  %v2827_v36 = vld [vmem:[%s2812_s27 + $0x38] sm:$0xff]  ;;  %v2831_v38 = vld [vmem:[%s2812_s27 + $0x20] sm:$0xff] }
  0x13   : > { %v185_v35 = vpack.c.bf16 %v2822_v33, %v173_v32  ;;  %v187_v39 = vpack.c.bf16 %v2827_v36, %v175_v34  ;;  %v184_v40 = vpack.c.bf16 %v2831_v38, %v172_v37  ;;  %v174_v41 = vld [vmem:[%s2812_s27 + $0x10] sm:$0xff]  ;;  %v2584_v48 = vld [vmem:[%s3219_s1 + $0x148] sm:$0xff]   ;;  %v2592_v56 = vld [vmem:[%s3219_s1 + $0x158] sm:$0xff]  }
  0x14   : > { %2321 = vmatpush3.bf16.msra.mxu0 %v2562_v14  ;;  %v2837_v42 = vld [vmem:[%s2812_s27 + $0x30] sm:$0xff]  ;;  %v2585_v49 = vld [vmem:[%s3219_s1 + $0x1c8] sm:$0xff]   ;;  %v2593_v57 = vld [vmem:[%s3219_s1 + $0x1d8] sm:$0xff]  }
  0x15   : > { %2349 = vmatpush3.bf16.msra.mxu1 %v2563_v15  ;;  %2322 = vmatprep.subr.bf16.mxu0 %v2564_v16  ;;  %v186_v43 = vpack.c.bf16 %v2837_v42, %v174_v41  ;;  %v2586_v50 = vld [vmem:[%s3219_s1 + $0x108] sm:$0xff]   ;;  %v2588_v52 = vld [vmem:[%s3219_s1 + $0x150] sm:$0xff]   ;;  %v2594_v58 = vld [vmem:[%s3219_s1 + $0x118] sm:$0xff]  }
  0x16   : > { %2350 = vmatprep.subr.bf16.mxu1 %v2565_v17  ;;  %480 = vmatprep.mubr.bf16.mxu0 %v185_v35  ;;  %v2587_v51 = vld [vmem:[%s3219_s1 + $0x188] sm:$0xff]   ;;  %v2589_v53 = vld [vmem:[%s3219_s1 + $0x1d0] sm:$0xff]   ;;  %v2595_v59 = vld [vmem:[%s3219_s1 + $0x198] sm:$0xff]  }
  0x17   : > { %528 = vmatprep.mubr.bf16.mxu1 %v187_v39  ;;  %v2590_v54 = vld [vmem:[%s3219_s1 + $0x110] sm:$0xff]   ;;  %v2596_v60 = vld [vmem:[%s3219_s1 + $0x160] sm:$0xff]   ;;  %v2600_v0 = vld [vmem:[%s3219_s1 + $0x168] sm:$0xff]  }
  0x18   : > { %2323 = vmatpush3.bf16.msra.mxu0 %v2566_v18  ;;  %v2591_v55 = vld [vmem:[%s3219_s1 + $0x190] sm:$0xff]   ;;  %v2597_v61 = vld [vmem:[%s3219_s1 + $0x1e0] sm:$0xff]   ;;  %v2601_v1 = vld [vmem:[%s3219_s1 + $0x1e8] sm:$0xff]  }
  0x19   : > { %2351 = vmatpush3.bf16.msra.mxu1 %v2567_v19  ;;  %2324 = vmatprep.subr.bf16.mxu0 %v2568_v20  ;;  %v2598_v62 = vld [vmem:[%s3219_s1 + $0x120] sm:$0xff]   ;;  %v2907_v2 = vld [vmem:[%s2812_s27 + $0x48] sm:$0xff]  ;;  %v2912_v4 = vld [vmem:[%s2812_s27 + $0x58] sm:$0xff] }
  0x1a   : > { %2352 = vmatprep.subr.bf16.mxu1 %v2569_v21  ;;  %v2599_v63 = vld [vmem:[%s3219_s1 + $0x1a0] sm:$0xff]   ;;  %v189_v3 = vpack.c.bf16 %v2907_v2, %v2907_v2  ;;  %v191_v5 = vpack.c.bf16 %v2912_v4, %v2912_v4  ;;  %v2602_v6 = vld [vmem:[%s3219_s1 + $0x128] sm:$0xff]   ;;  %v2926_v9 = vld [vmem:[%s2812_s27 + $0x50] sm:$0xff] }
  0x1b   : > { %v2603_v7 = vld [vmem:[%s3219_s1 + $0x1a8] sm:$0xff]   ;;  %v2923_v8 = vld [vmem:[%s2812_s27 + $0x40] sm:$0xff]  ;;  %v190_v11 = vpack.c.bf16 %v2926_v9, %v2926_v9  ;;  %v2604_v12 = vld [vmem:[%s3219_s1 + $0x170] sm:$0xff]  }
  0x1c   : > { %2325 = vmatpush3.bf16.msra.mxu0 %v2570_v22  ;;  %v188_v10 = vpack.c.bf16 %v2923_v8, %v2923_v8  ;;  %v2605_v13 = vld [vmem:[%s3219_s1 + $0x1f0] sm:$0xff]   ;;  %v2608_v16 = vld [vmem:[%s3219_s1 + $0x178] sm:$0xff]   ;;  %v548_v20 = vld [vmem:[%s2812_s27 + $0x8] sm:$0xfe] }
  0x1d   : > { %2353 = vmatpush3.bf16.msra.mxu1 %v2571_v23  ;;  %2326 = vmatprep.subr.bf16.mxu0 %v2572_v24  ;;  %v2606_v14 = vld [vmem:[%s3219_s1 + $0x130] sm:$0xff]   ;;  %v2609_v17 = vld [vmem:[%s3219_s1 + $0x1f8] sm:$0xff]   ;;  %v560_v21 = vld [vmem:[%s2812_s27 + $0x68] sm:$0x1]  ;;  %v564_v23 = vpack.c.bf16 %v2822_v33, %v548_v20 }
  0x1e   : > { %2354 = vmatprep.subr.bf16.mxu1 %v2573_v25  ;;  %v2607_v15 = vld [vmem:[%s3219_s1 + $0x1b0] sm:$0xff]   ;;  %v2610_v18 = vld [vmem:[%s3219_s1 + $0x138] sm:$0xff]   ;;  %v568_v24 = vpack.c.bf16 %v560_v21, %v2907_v2 }
  0x1f   : > { %v2611_v19 = vld [vmem:[%s3219_s1 + $0x1b8] sm:$0xff]   ;;  %v549_v32 = vld [vmem:[%s2812_s27 + $0x10] sm:$0xfe]  ;;  %v561_v34 = vld [vmem:[%s2812_s27 + $0x70] sm:$0x1]  ;;  %v650_v35 = vshrl.u32 %v564_v23, 16 }
  0x20   : > { %2327 = vmatpush3.bf16.msra.mxu0 %v2574_v26  ;;  %v550_v22 = vld [vmem:[%s2812_s27 + $0x18] sm:$0xfe]  ;;  %v562_v25 = vld [vmem:[%s2812_s27 + $0x78] sm:$0x1]  ;;  %v652_v37 = vshll.u32 %v564_v23, 16  ;;  %v657_v39 = vshll.u32 %v568_v24, 16 }
  0x21   : > { %2355 = vmatpush3.bf16.msra.mxu1 %v2575_v27  ;;  %2328 = vmatprep.subr.bf16.mxu0 %v2576_v28  ;;  %v566_v26 = vpack.c.bf16 %v2827_v36, %v550_v22  ;;  %v547_v27 = vld [vmem:[%s2812_s27] sm:$0xfe]  ;;  %v559_v28 = vld [vmem:[%s2812_s27 + $0x60] sm:$0x1]  ;;  %v2620_v22 = vld [vmem:[%s3219_s1 + $0x250] sm:$0xff]  }
  0x22   : > { %2356 = vmatprep.subr.bf16.mxu1 %v2577_v29  ;;  %v570_v29 = vpack.c.bf16 %v562_v25, %v2912_v4  ;;  %v2622_v25 = vld [vmem:[%s3219_s1 + $0x210] sm:$0xff]  }
  0x23   : > { %v676_v41 = vshll.u32 %v566_v26, 16 }
  0x24   : > { %2329 = vmatpush3.bf16.msra.mxu0 %v2578_v30  ;;  %v563_v30 = vpack.c.bf16 %v2831_v38, %v547_v27 }
  0x25   : > { %2357 = vmatpush3.bf16.msra.mxu1 %v2579_v31  ;;  %2370 = vmatprep.subr.bf16.mxu0 %v2580_v44  ;;  %v567_v31 = vpack.c.bf16 %v559_v28, %v2923_v8  ;;  %v2624_v28 = vld [vmem:[%s3219_s1 + $0x258] sm:$0xff]  }
  0x26   : > { %2398 = vmatprep.subr.bf16.mxu1 %v2581_v45  ;;  %v638_v44 = vshrl.u32 %v563_v30, 16  ;;  %v640_v45 = vshll.u32 %v563_v30, 16  ;;  %v2626_v30 = vld [vmem:[%s3219_s1 + $0x218] sm:$0xff]  }
  0x27   : > { %481 = vmatmul.mubr.bf16.vlgmr.msra.gmra.mrb[0].mxu0 %v184_v40  ;;  %v674_v40 = vshrl.u32 %v566_v26, 16  ;;  %v2623_v26 = vld [vmem:[%s3219_s1 + $0x290] sm:$0xff]  }
  0x28   : > { %529 = vmatmul.mubr.bf16.vlgmr.msra.gmra.mrb[0].mxu1 %v186_v43  ;;  %2371 = vmatpush3.bf16.msra.mxu0 %v2582_v46  ;;  %v681_v43 = vshll.u32 %v570_v29, 16  ;;  %v2612_v46 = vld [vmem:[%s3219_s1 + $0x240] sm:$0xff]  }
  0x29   : > { %2399 = vmatpush3.bf16.msra.mxu1 %v2583_v47  ;;  %2372 = vmatprep.subr.bf16.mxu0 %v2584_v48  ;;  %v2613_v47 = vld [vmem:[%s3219_s1 + $0x2c0] sm:$0xff]   ;;  %v654_v48 = vrot.slane %v652_v37, 1 }
  0x2a   : > { %2400 = vmatprep.subr.bf16.mxu1 %v2585_v49  ;;  %488 = vmatprep.mubr.bf16.mxu0 %v189_v3  ;;  %v659_v49 = vrot.slane %v657_v39, 1  ;;  %v2615_v3 = vld [vmem:[%s3219_s1 + $0x280] sm:$0xff]   ;;  %v2632_v39 = vld [vmem:[%s3219_s1 + $0x268] sm:$0xff]  }
  0x2b   : > { %536 = vmatprep.mubr.bf16.mxu1 %v191_v5  ;;  %v2616_v5 = vld [vmem:[%s3219_s1 + $0x248] sm:$0xff]   ;;  %v2631_v37 = vld [vmem:[%s3219_s1 + $0x2a0] sm:$0xff]  }
  0x2c   : > { %2373 = vmatpush3.bf16.msra.mxu0 %v2586_v50  ;;  %v645_v50 = vshll.u32 %v567_v31, 16 }
  0x2d   : > { %2401 = vmatpush3.bf16.msra.mxu1 %v2587_v51  ;;  %2374 = vmatprep.subr.bf16.mxu0 %v2588_v52  ;;  %v565_v51 = vpack.c.bf16 %v2837_v42, %v549_v32  ;;  %v678_v52 = vrot.slane %v676_v41, 1  ;;  %v2628_v32 = vld [vmem:[%s3219_s1 + $0x260] sm:$0xff]   ;;  %v2634_v41 = vld [vmem:[%s3219_s1 + $0x228] sm:$0xff]  }
  0x2e   : > { %2402 = vmatprep.subr.bf16.mxu1 %v2589_v53  ;;  %v683_v53 = vrot.slane %v681_v43, 1  ;;  %v2635_v43 = vld [vmem:[%s3219_s1 + $0x2a8] sm:$0xff]  }
  0x2f   : > { %489 = vmatmul.mubr.bf16.gmra.mrb[4].mxu0 %v188_v10 }
  0x30   : > { %2375 = vmatpush3.bf16.msra.mxu0 %v2590_v54  ;;  %537 = vmatmul.mubr.bf16.gmra.mrb[4].mxu1 %v190_v11  ;;  %v642_v54 = vrot.slane %v640_v45, 1  ;;  %v2617_v11 = vld [vmem:[%s3219_s1 + $0x2c8] sm:$0xff]   ;;  %v2637_v45 = vld [vmem:[%s3219_s1 + $0x2f0] sm:$0xff]  }
  0x31   : > { %2403 = vmatpush3.bf16.msra.mxu1 %v2591_v55  ;;  %2376 = vmatprep.subr.bf16.mxu0 %v2592_v56  ;;  %v569_v55 = vpack.c.bf16 %v561_v34, %v2926_v9  ;;  %v655_v56 = vor.u32 %v654_v48, %v650_v35  ;;  %v2629_v34 = vld [vmem:[%s3219_s1 + $0x2e0] sm:$0xff]   ;;  %v2640_v48 = vld [vmem:[%s3219_s1 + $0x278] sm:$0xff]  }
  0x32   : > { %2404 = vmatprep.subr.bf16.mxu1 %v2593_v57  ;;  %v647_v57 = vrot.slane %v645_v50, 1  ;;  %v2630_v35 = vld [vmem:[%s3219_s1 + $0x220] sm:$0xff]   ;;  %v2642_v50 = vld [vmem:[%s3219_s1 + $0x238] sm:$0xff]  }
  0x33   : > { %v691_v21 = vshrl.u32 %v569_v55, 16 }
  0x34   : > { %2377 = vmatpush3.bf16.msra.mxu0 %v2594_v58  ;;  %v662_v58 = vshrl.u32 %v565_v51, 16 }
  0x35   : > { %2405 = vmatpush3.bf16.msra.mxu1 %v2595_v59  ;;  %2378 = vmatprep.subr.bf16.mxu0 %v2596_v60  ;;  %v664_v59 = vshll.u32 %v565_v51, 16  ;;  %v679_v60 = vor.u32 %v678_v52, %v674_v40  ;;  %v2633_v40 = vld [vmem:[%s3219_s1 + $0x2e8] sm:$0xff]   ;;  %v2643_v51 = vld [vmem:[%s3219_s1 + $0x2b8] sm:$0xff]  }
  0x36   : > { %2406 = vmatprep.subr.bf16.mxu1 %v2597_v61  ;;  %v643_v61 = vor.u32 %v642_v54, %v638_v44  ;;  %v2636_v44 = vld [vmem:[%s3219_s1 + $0x270] sm:$0xff]   ;;  %v1003_v52 = vld [vmem:[%s2812_s27 + $0x8] sm:$0xc0] }
  0x37   : > { %v1019_v54 = vpack.c.bf16 %v2822_v33, %v1003_v52  ;;  %v1418_v52 = vld [vmem:[%s2812_s27 + $0x8] sm:$0x80] }
  0x38   : > { %2379 = vmatpush3.bf16.msra.mxu0 %v2598_v62  ;;  %v669_v62 = vshll.u32 %v569_v55, 16 }
  0x39   : > { %2407 = vmatpush3.bf16.msra.mxu1 %v2599_v63  ;;  %2380 = vmatprep.subr.bf16.mxu0 %v2600_v0  ;;  %v2614_v63 = vld [vmem:[%s3219_s1 + $0x200] sm:$0xff]   ;;  %v660_v0 = vsel %vm636_vm0, %v655_v56, %v659_v49  ;;  %v1005_v56 = vld [vmem:[%s2812_s27 + $0x18] sm:$0xc0] }
  0x3a   : > { %2408 = vmatprep.subr.bf16.mxu1 %v2601_v1  ;;  %v666_v1 = vrot.slane %v664_v59, 1  ;;  %929 = vmatprep.mubr.bf16.mxu0 %v660_v0  ;;  %v671_v10 = vrot.slane %v669_v62, 1  ;;  %v1021_v59 = vpack.c.bf16 %v2827_v36, %v1005_v56  ;;  %v1016_v0 = vld [vmem:[%s2812_s27 + $0x70] sm:$0x3f] }
  0x3b   : > { %v1024_v36 = vpack.c.bf16 %v1016_v0, %v2926_v9 }
  0x3c   : > { %2381 = vmatpush3.bf16.msra.mxu0 %v2602_v6  ;;  %v684_v6 = vsel %vm636_vm0, %v679_v60, %v683_v53  ;;  %v693_v27 = vor.u32 %v691_v21, %v671_v10  ;;  %v2649_v21 = vld [vmem:[%s3219_s1 + $0x3c8] sm:$0xff]  }
  0x3d   : > { %2409 = vmatpush3.bf16.msra.mxu1 %v2603_v7  ;;  %2382 = vmatprep.subr.bf16.mxu0 %v2604_v12  ;;  %v648_v7 = vsel %vm636_vm0, %v643_v61, %v647_v57  ;;  %v2618_v12 = vld [vmem:[%s3219_s1 + $0x208] sm:$0xff]   ;;  %v1014_v61 = vld [vmem:[%s2812_s27 + $0x60] sm:$0x3f] }
  0x3e   : > { %2410 = vmatprep.subr.bf16.mxu1 %v2605_v13  ;;  %977 = vmatprep.mubr.bf16.mxu1 %v684_v6  ;;  %v667_v13 = vor.u32 %v666_v1, %v662_v58  ;;  %v1002_v58 = vld [vmem:[%s2812_s27] sm:$0xc0]  ;;  %v1103_v1 = vrot.slane %v1019_v54, 3  ;;  %v1022_v33 = vpack.c.bf16 %v1014_v61, %v2923_v8  ;;  %v1109_v6 = vrot.slane %v1021_v59, 3  ;;  %v1430_v54 = vld [vmem:[%s2812_s27 + $0x68] sm:$0x7f] }
  0x3f   : > { %v1018_v62 = vpack.c.bf16 %v2831_v38, %v1002_v58  ;;  %v1424_v58 = vld [vmem:[%s2812_s27 + $0x38] sm:$0xff] }
  0x40   : > { %2383 = vmatpush3.bf16.msra.mxu0 %v2606_v14  ;;  %v688_v14 = vshrl.u32 %v568_v24, 16  ;;  %v2621_v24 = vld [vmem:[%s3219_s1 + $0x2d0] sm:$0xff]   ;;  %v1432_v59 = vld [vmem:[%s2812_s27 + $0x78] sm:$0x7f] }
  0x41   : > { %2411 = vmatpush3.bf16.msra.mxu1 %v2607_v15  ;;  %2384 = vmatprep.subr.bf16.mxu0 %v2608_v16  ;;  %v694_v15 = vshrl.u32 %v570_v29, 16  ;;  %v672_v16 = vsel %vm636_vm0, %v667_v13, %v671_v10  ;;  %v2625_v29 = vld [vmem:[%s3219_s1 + $0x2d8] sm:$0xff]   ;;  %v1100_v10 = vrot.slane %v1018_v62, 3  ;;  %v1440_v61 = vpack.c.bf16 %v1432_v59, %v2912_v4  ;;  %v1417_v62 = vld [vmem:[%s2812_s27] sm:$0x80] }
  0x42   : > { %2412 = vmatprep.subr.bf16.mxu1 %v2609_v17  ;;  %v2619_v17 = vld [vmem:[%s3219_s1 + $0x288] sm:$0xff]  }
  0x43   : > { %v696_v20 = vor.u32 %v694_v15, %v683_v53  ;;  %v1015_v53 = vld [vmem:[%s2812_s27 + $0x68] sm:$0x3f] }
  0x44   : > { %2385 = vmatpush3.bf16.msra.mxu0 %v2610_v18  ;;  %v685_v18 = vshrl.u32 %v567_v31, 16  ;;  %v2627_v31 = vld [vmem:[%s3219_s1 + $0x298] sm:$0xff]   ;;  %v1023_v55 = vpack.c.bf16 %v1015_v53, %v2907_v2  ;;  %v1422_v53 = vld [vmem:[%s2812_s27 + $0x28] sm:$0xff] }
  0x45   : > { %2413 = vmatpush3.bf16.msra.mxu1 %v2611_v19  ;;  %2426 = vmatprep.subr.bf16.mxu0 %v2612_v46  ;;  %v690_v19 = vor.u32 %v688_v14, %v659_v49  ;;  %v2638_v46 = vld [vmem:[%s3219_s1 + $0x230] sm:$0xff]   ;;  %v2641_v49 = vld [vmem:[%s3219_s1 + $0x2f8] sm:$0xff]   ;;  %v2645_v14 = vld [vmem:[%s3219_s1 + $0x3c0] sm:$0xff]   ;;  %v1434_v56 = vpack.c.bf16 %v1422_v53, %v1418_v52 }
  0x46   : > { %2454 = vmatprep.subr.bf16.mxu1 %v2613_v47  ;;  %v687_v23 = vor.u32 %v685_v18, %v647_v57  ;;  %v2639_v47 = vld [vmem:[%s3219_s1 + $0x2b0] sm:$0xff]   ;;  %v1017_v57 = vld [vmem:[%s2812_s27 + $0x78] sm:$0x3f] }
  0x47   : > { %930 = vmatmul.mubr.bf16.vlgmr.msra.gmra.mrb[8].mxu0 %v648_v7  ;;  %v1025_v60 = vpack.c.bf16 %v1017_v57, %v2912_v4  ;;  %v1438_v57 = vpack.c.bf16 %v1430_v54, %v2907_v2  ;;  %v1525_v0 = vshrl.u32 %v1434_v56, 16  ;;  %v1567_v2 = vshrl.u32 %v1440_v61, 16 }
  0x48   : > { %2427 = vmatpush3.bf16.msra.mxu0 %v2614_v63  ;;  %978 = vmatmul.mubr.bf16.vlgmr.msra.gmra.mrb[8].mxu1 %v672_v16  ;;  %v1004_v63 = vld [vmem:[%s2812_s27 + $0x10] sm:$0xc0]  ;;  %v1107_v16 = vrot.slane %v1024_v36, 3  ;;  %v1421_v36 = vld [vmem:[%s2812_s27 + $0x20] sm:$0xff] }
  0x49   : > { %2428 = vmatprep.subr.bf16.mxu0 %v2616_v5  ;;  %2455 = vmatpush3.bf16.msra.mxu1 %v2615_v3  ;;  %v1104_v3 = vrot.slane %v1023_v55, 3  ;;  %v1020_v5 = vpack.c.bf16 %v2837_v42, %v1004_v63  ;;  %v1110_v7 = vrot.slane %v1025_v60, 3  ;;  %v2646_v42 = vld [vmem:[%s3219_s1 + $0x300] sm:$0xff]   ;;  %v1420_v55 = vld [vmem:[%s2812_s27 + $0x18] sm:$0x80] }
  0x4a   : > { %2456 = vmatprep.subr.bf16.mxu1 %v2617_v11  ;;  %937 = vmatprep.mubr.bf16.mxu0 %v690_v19  ;;  %v2644_v11 = vld [vmem:[%s3219_s1 + $0x340] sm:$0xff]   ;;  %v1436_v60 = vpack.c.bf16 %v1424_v58, %v1420_v55 }
  0x4b   : > { %985 = vmatprep.mubr.bf16.mxu1 %v696_v20  ;;  %v1105_v38 = vsel %vm1099_vm1, %v1103_v1, %v1104_v3  ;;  %v1106_v13 = vrot.slane %v1020_v5, 3  ;;  %v1111_v15 = vsel %vm1099_vm1, %v1109_v6, %v1110_v7  ;;  %v2648_v20 = vld [vmem:[%s3219_s1 + $0x348] sm:$0xff]   ;;  %v1429_v63 = vld [vmem:[%s2812_s27 + $0x60] sm:$0x7f]  ;;  %v1528_v1 = vshll.u32 %v1434_v56, 16 }
  0x4c   : > { %2429 = vmatpush3.bf16.msra.mxu0 %v2618_v12  ;;  %v1101_v12 = vrot.slane %v1022_v33, 3  ;;  %v1536_v33 = vshll.u32 %v1438_v57, 16  ;;  %v1419_v5 = vld [vmem:[%s2812_s27 + $0x10] sm:$0x80]  ;;  %v1559_v6 = vshrl.u32 %v1436_v60, 16 }
  0x4d   : > { %2430 = vmatprep.subr.bf16.mxu0 %v2620_v22  ;;  %2457 = vmatpush3.bf16.msra.mxu1 %v2619_v17  ;;  %v2647_v17 = vld [vmem:[%s3219_s1 + $0x380] sm:$0xff]   ;;  %v1108_v19 = vsel %vm1099_vm1, %v1106_v13, %v1107_v16  ;;  %v2650_v22 = vld [vmem:[%s3219_s1 + $0x308] sm:$0xff]  }
  0x4e   : > { %2458 = vmatprep.subr.bf16.mxu1 %v2621_v24  ;;  %v1102_v18 = vsel %vm1099_vm1, %v1100_v10, %v1101_v12  ;;  %v2652_v24 = vld [vmem:[%s3219_s1 + $0x350] sm:$0xff]   ;;  %v1570_v10 = vshll.u32 %v1440_v61, 16  ;;  %v1561_v4 = vrot.slane %v1559_v6, 3 }
  0x4f   : > { %938 = vmatmul.mubr.bf16.gmra.mrb[12].mxu0 %v687_v23  ;;  %v2651_v23 = vld [vmem:[%s3219_s1 + $0x388] sm:$0xff]  }
  0x50   : > { %2431 = vmatpush3.bf16.msra.mxu0 %v2622_v25  ;;  %986 = vmatmul.mubr.bf16.gmra.mrb[12].mxu1 %v693_v27  ;;  %v2653_v25 = vld [vmem:[%s3219_s1 + $0x3d0] sm:$0xff]  }
  0x51   : > { %2432 = vmatprep.subr.bf16.mxu0 %v2624_v28  ;;  %2459 = vmatpush3.bf16.msra.mxu1 %v2623_v26  ;;  %v2654_v26 = vld [vmem:[%s3219_s1 + $0x310] sm:$0xff]   ;;  %v2656_v28 = vld [vmem:[%s3219_s1 + $0x358] sm:$0xff]  }
  0x52   : > { %2460 = vmatprep.subr.bf16.mxu1 %v2625_v29  ;;  %1344 = vmatprep.mubr.bf16.mxu0 %v1105_v38  ;;  %v2655_v27 = vld [vmem:[%s3219_s1 + $0x390] sm:$0xff]   ;;  %v2657_v29 = vld [vmem:[%s3219_s1 + $0x3d8] sm:$0xff]   ;;  %v1527_v38 = vrot.slane %v1525_v0, 3 }
  0x53   : > { %1392 = vmatprep.mubr.bf16.mxu1 %v1111_v15 }
  0x54   : > { %2433 = vmatpush3.bf16.msra.mxu0 %v2626_v30  ;;  %v2658_v30 = vld [vmem:[%s3219_s1 + $0x318] sm:$0xff]  }
  0x55   : > { %2434 = vmatprep.subr.bf16.mxu0 %v2628_v32  ;;  %2461 = vmatpush3.bf16.msra.mxu1 %v2627_v31  ;;  %v2659_v31 = vld [vmem:[%s3219_s1 + $0x398] sm:$0xff]   ;;  %v2660_v32 = vld [vmem:[%s3219_s1 + $0x360] sm:$0xff]  }
  0x56   : > { %2462 = vmatprep.subr.bf16.mxu1 %v2629_v34  ;;  %v2661_v34 = vld [vmem:[%s3219_s1 + $0x3e0] sm:$0xff]  }
  0x58   : > { %2435 = vmatpush3.bf16.msra.mxu0 %v2630_v35  ;;  %v2662_v35 = vld [vmem:[%s3219_s1 + $0x320] sm:$0xff]  }
  0x59   : > { %2436 = vmatprep.subr.bf16.mxu0 %v2632_v39  ;;  %2463 = vmatpush3.bf16.msra.mxu1 %v2631_v37  ;;  %v2663_v37 = vld [vmem:[%s3219_s1 + $0x3a0] sm:$0xff]   ;;  %v2664_v39 = vld [vmem:[%s3219_s1 + $0x368] sm:$0xff]  }
  0x5a   : > { %2464 = vmatprep.subr.bf16.mxu1 %v2633_v40  ;;  %v2665_v40 = vld [vmem:[%s3219_s1 + $0x3e8] sm:$0xff]  }
  0x5c   : > { %2437 = vmatpush3.bf16.msra.mxu0 %v2634_v41  ;;  %v2666_v41 = vld [vmem:[%s3219_s1 + $0x328] sm:$0xff]  }
  0x5d   : > { %2438 = vmatprep.subr.bf16.mxu0 %v2636_v44  ;;  %2465 = vmatpush3.bf16.msra.mxu1 %v2635_v43  ;;  %v2667_v43 = vld [vmem:[%s3219_s1 + $0x3a8] sm:$0xff]   ;;  %v2668_v44 = vld [vmem:[%s3219_s1 + $0x370] sm:$0xff]  }
  0x5e   : > { %2466 = vmatprep.subr.bf16.mxu1 %v2637_v45  ;;  %v2669_v45 = vld [vmem:[%s3219_s1 + $0x3f0] sm:$0xff]  }
  0x60   : > { %2439 = vmatpush3.bf16.msra.mxu0 %v2638_v46  ;;  %v2670_v46 = vld [vmem:[%s3219_s1 + $0x330] sm:$0xff]  }
  0x61   : > { %2440 = vmatprep.subr.bf16.mxu0 %v2640_v48  ;;  %2467 = vmatpush3.bf16.msra.mxu1 %v2639_v47  ;;  %v2671_v47 = vld [vmem:[%s3219_s1 + $0x3b0] sm:$0xff]   ;;  %v2672_v48 = vld [vmem:[%s3219_s1 + $0x378] sm:$0xff]  }
  0x62   : > { %2468 = vmatprep.subr.bf16.mxu1 %v2641_v49  ;;  %v2673_v49 = vld [vmem:[%s3219_s1 + $0x3f8] sm:$0xff]  }
  0x64   : > { %2441 = vmatpush3.bf16.msra.mxu0 %v2642_v50  ;;  %v2674_v50 = vld [vmem:[%s3219_s1 + $0x338] sm:$0xff]  }
  0x65   : > { %2469 = vmatpush3.bf16.msra.mxu1 %v2643_v51  ;;  %2482 = vmatprep.subr.bf16.mxu0 %v2644_v11  ;;  %v2675_v51 = vld [vmem:[%s3219_s1 + $0x3b8] sm:$0xff]   ;;  %v1423_v11 = vld [vmem:[%s2812_s27 + $0x30] sm:$0xff] }
  0x66   : > { %2510 = vmatprep.subr.bf16.mxu1 %v2645_v14  ;;  %v1538_v14 = vrot.slane %v1536_v33, 4 }
  0x67   : > { %1345 = vmatmul.mubr.bf16.vlgmr.msra.gmra.mrb[16].mxu0 %v1102_v18 }
  0x68   : > { %1393 = vmatmul.mubr.bf16.vlgmr.msra.gmra.mrb[16].mxu1 %v1108_v19  ;;  %2483 = vmatpush3.bf16.msra.mxu0 %v2646_v42  ;;  %v1431_v42 = vld [vmem:[%s2812_s27 + $0x70] sm:$0x7f] }
  0x69   : > { %2511 = vmatpush3.bf16.msra.mxu1 %v2647_v17  ;;  %2484 = vmatprep.subr.bf16.mxu0 %v2648_v20  ;;  %v1572_v17 = vrot.slane %v1570_v10, 4  ;;  %v1433_v20 = vpack.c.bf16 %v1421_v36, %v1417_v62 }
  0x6a   : > { %2512 = vmatprep.subr.bf16.mxu1 %v2649_v21  ;;  %1352 = vmatprep.mubr.bf16.mxu0 %v1104_v3  ;;  %v1533_v3 = vshrl.u32 %v1438_v57, 16  ;;  %v1437_v21 = vpack.c.bf16 %v1429_v63, %v2923_v8 }
  0x6b   : > { %1400 = vmatprep.mubr.bf16.mxu1 %v1110_v7  ;;  %v1562_v7 = vshll.u32 %v1436_v60, 16 }
  0x6c   : > { %2485 = vmatpush3.bf16.msra.mxu0 %v2650_v22  ;;  %v1535_v13 = vrot.slane %v1533_v3, 3 }
  0x6d   : > { %2513 = vmatpush3.bf16.msra.mxu1 %v2651_v23  ;;  %2486 = vmatprep.subr.bf16.mxu0 %v2652_v24  ;;  %v1564_v15 = vrot.slane %v1562_v7, 4  ;;  %v1435_v24 = vpack.c.bf16 %v1423_v11, %v1419_v5 }
  0x6e   : > { %2514 = vmatprep.subr.bf16.mxu1 %v2653_v25  ;;  %v1539_v19 = vor.u32 %v1538_v14, %v1535_v13  ;;  %v1439_v25 = vpack.c.bf16 %v1431_v42, %v2926_v9 }
  0x6f   : > { %1353 = vmatmul.mubr.bf16.gmra.mrb[20].mxu0 %v1101_v12  ;;  %v1530_v12 = vrot.slane %v1528_v1, 4  ;;  %v1565_v22 = vor.u32 %v1564_v15, %v1561_v4 }
  0x70   : > { %1401 = vmatmul.mubr.bf16.gmra.mrb[20].mxu1 %v1107_v16  ;;  %2487 = vmatpush3.bf16.msra.mxu0 %v2654_v26  ;;  %v1569_v16 = vrot.slane %v1567_v2, 3  ;;  %v1553_v9 = vshll.u32 %v1439_v25, 16 }
  0x71   : > { %2515 = vmatpush3.bf16.msra.mxu1 %v2655_v27  ;;  %2488 = vmatprep.subr.bf16.mxu0 %v2656_v28  ;;  %v1531_v18 = vor.u32 %v1530_v12, %v1527_v38  ;;  %v1508_v27 = vshrl.u32 %v1433_v20, 16  ;;  %v1511_v28 = vshll.u32 %v1433_v20, 16 }
  0x72   : > { %2516 = vmatprep.subr.bf16.mxu1 %v2657_v29  ;;  %v1573_v23 = vor.u32 %v1572_v17, %v1569_v16  ;;  %v1516_v29 = vshrl.u32 %v1437_v21, 16 }
  0x73   : > { %v1540_v26 = vsel %vm1506_vm2, %v1531_v18, %v1539_v19 }
  0x74   : > { %2489 = vmatpush3.bf16.msra.mxu0 %v2658_v30  ;;  %1807 = vmatprep.mubr.bf16.mxu0 %v1540_v26  ;;  %v1574_v30 = vsel %vm1506_vm2, %v1565_v22, %v1573_v23  ;;  %v1518_v8 = vrot.slane %v1516_v29, 3 }
  0x75   : > { %2517 = vmatpush3.bf16.msra.mxu1 %v2659_v31  ;;  %2490 = vmatprep.subr.bf16.mxu0 %v2660_v32  ;;  %v1519_v31 = vshll.u32 %v1437_v21, 16  ;;  %v1542_v32 = vshrl.u32 %v1435_v24, 16 }
  0x76   : > { %2518 = vmatprep.subr.bf16.mxu1 %v2661_v34  ;;  %v1545_v34 = vshll.u32 %v1435_v24, 16  ;;  %1855 = vmatprep.mubr.bf16.mxu1 %v1574_v30 }
  0x78   : > { %2491 = vmatpush3.bf16.msra.mxu0 %v2662_v35  ;;  %v1510_v35 = vrot.slane %v1508_v27, 3 }
  0x79   : > { %2519 = vmatpush3.bf16.msra.mxu1 %v2663_v37  ;;  %2492 = vmatprep.subr.bf16.mxu0 %v2664_v39  ;;  %v1513_v37 = vrot.slane %v1511_v28, 4  ;;  %v1550_v39 = vshrl.u32 %v1439_v25, 16 }
  0x7a   : > { %2520 = vmatprep.subr.bf16.mxu1 %v2665_v40  ;;  %v1521_v40 = vrot.slane %v1519_v31, 4 }
  0x7c   : > { %2493 = vmatpush3.bf16.msra.mxu0 %v2666_v41  ;;  %v1544_v41 = vrot.slane %v1542_v32, 3 }
  0x7d   : > { %2521 = vmatpush3.bf16.msra.mxu1 %v2667_v43  ;;  %2494 = vmatprep.subr.bf16.mxu0 %v2668_v44  ;;  %v1547_v43 = vrot.slane %v1545_v34, 4  ;;  %v1514_v44 = vor.u32 %v1513_v37, %v1510_v35 }
  0x7e   : > { %2522 = vmatprep.subr.bf16.mxu1 %v2669_v45  ;;  %v1552_v45 = vrot.slane %v1550_v39, 3 }
  0x80   : > { %2495 = vmatpush3.bf16.msra.mxu0 %v2670_v46  ;;  %v1522_v46 = vor.u32 %v1521_v40, %v1518_v8 }
  0x81   : > { %2523 = vmatpush3.bf16.msra.mxu1 %v2671_v47  ;;  %2496 = vmatprep.subr.bf16.mxu0 %v2672_v48  ;;  %v1548_v47 = vor.u32 %v1547_v43, %v1544_v41  ;;  %v1555_v48 = vrot.slane %v1553_v9, 4 }
  0x82   : > { %2524 = vmatprep.subr.bf16.mxu1 %v2673_v49  ;;  %v1523_v49 = vsel %vm1506_vm2, %v1514_v44, %v1522_v46 }
  0x84   : > { %2497 = vmatpush3.bf16.msra.mxu0 %v2674_v50  ;;  %v1556_v50 = vor.u32 %v1555_v48, %v1552_v45 }
  0x85   : > { %2525 = vmatpush3.bf16.msra.mxu1 %v2675_v51 }
  0x86   : > { %v1557_v51 = vsel %vm1506_vm2, %v1548_v47, %v1556_v50 }
  0x87   : > { %1808 = vmatmul.mubr.bf16.vlgmr.msra.gmra.mrb[24].mxu0 %v1523_v49 }
  0x88   : > { %1815 = vmatprep.mubr.bf16.mxu0 %v1539_v19  ;;  %1856 = vmatmul.mubr.bf16.vlgmr.msra.gmra.mrb[24].mxu1 %v1557_v51 }
  0x89   : > { %1863 = vmatprep.mubr.bf16.mxu1 %v1573_v23 }
  0x8f   : > { %1816 = vmatmul.mubr.bf16.gmra.mrb[28].mxu0 %v1522_v46 }
  0x90   : > { %1864 = vmatmul.mubr.bf16.gmra.mrb[28].mxu1 %v1556_v50 }
  0xfa   : > { %v2330_v52 = vpop.f32.mrb[0].mxu0 }
  0xfb   : > { %v2358_v53 = vpop.f32.mrb[0].mxu1  ;;  %v2331_v54 = vpop.f32.mrb[1].mxu0 }
  0xfc   : > { %v2332_v55 = vadd.f32 %v2331_v54, %v2330_v52  ;;  %v2359_v56 = vpop.f32.mrb[1].mxu1  ;;  %v2333_v57 = vpop.f32.mrb[2].mxu0 }
  0xfd   : > { %v2360_v58 = vadd.f32 %v2359_v56, %v2358_v53  ;;  %v2361_v59 = vpop.f32.mrb[2].mxu1  ;;  %v2334_v60 = vpop.f32.mrb[3].mxu0 }
  0xfe   : > { %v2335_v61 = vadd.f32 %v2334_v60, %v2333_v57  ;;  %v2362_v62 = vpop.f32.mrb[3].mxu1 }
  0xff   : > { %v531_v63 = vadd.f32 %v2360_v58, %v2332_v55  ;;  %v2363_v0 = vadd.f32 %v2362_v62, %v2361_v59 }
 0x101   : > { %v534_v1 = vadd.f32 %v2363_v0, %v2335_v61 }
 0x102   : > { %v2336_v3 = vpop.f32.mrb[4].mxu0 }
 0x103   : > { %v2364_v33 = vpop.f32.mrb[4].mxu1  ;;  %v2337_v5 = vpop.f32.mrb[5].mxu0 }
 0x104   : > { %v2365_v6 = vpop.f32.mrb[5].mxu1  ;;  %v2338_v7 = vadd.f32 %v2337_v5, %v2336_v3  ;;  %v2339_v10 = vpop.f32.mrb[6].mxu0 }
 0x105   : > { %v2366_v2 = vadd.f32 %v2365_v6, %v2364_v33  ;;  %v2367_v36 = vpop.f32.mrb[6].mxu1  ;;  %v2340_v11 = vpop.f32.mrb[7].mxu0 }
 0x106   : > { %v2368_v38 = vpop.f32.mrb[7].mxu1 }
 0x107   : > { %v539_v12 = vadd.f32 %v2366_v2, %v2338_v7 }
 0x11a   : > { %v2386_v13 = vpop.f32.mrb[8].mxu0 }
 0x11b   : > { %v2387_v14 = vpop.f32.mrb[9].mxu0  ;;  %v2414_v15 = vpop.f32.mrb[8].mxu1 }
 0x11c   : > { %v2388_v42 = vadd.f32 %v2387_v14, %v2386_v13  ;;  %v2389_v4 = vpop.f32.mrb[10].mxu0  ;;  %v2415_v17 = vpop.f32.mrb[9].mxu1 }
 0x11d   : > { %v2390_v16 = vpop.f32.mrb[11].mxu0  ;;  %v2416_v19 = vadd.f32 %v2415_v17, %v2414_v15  ;;  %v2417_v20 = vpop.f32.mrb[10].mxu1 }
 0x11e   : > { %v2391_v18 = vadd.f32 %v2390_v16, %v2389_v4  ;;  %v2418_v21 = vpop.f32.mrb[11].mxu1  ;;  %v2300_v16 = vld [vmem:[%s3220_s2] ss:$0 sm:$0xff] }
 0x11f   : > { %v980_v22 = vadd.f32 %v2416_v19, %v2388_v42  ;;  %v2419_v23 = vadd.f32 %v2418_v21, %v2417_v20 }
 0x121   : > { %v996_v25 = vadd.f32 %v980_v22, %v531_v63  ;;  %v983_v26 = vadd.f32 %v2419_v23, %v2391_v18 }
 0x122   : > { %v2392_v24 = vpop.f32.mrb[12].mxu0 }
 0x123   : > { %v2393_v27 = vpop.f32.mrb[13].mxu0  ;;  %v997_v30 = vadd.f32 %v983_v26, %v534_v1  ;;  %v2420_v31 = vpop.f32.mrb[12].mxu1 }
 0x124   : > { %v2394_v28 = vadd.f32 %v2393_v27, %v2392_v24  ;;  %v2395_v29 = vpop.f32.mrb[14].mxu0  ;;  %v2421_v34 = vpop.f32.mrb[13].mxu1 }
 0x125   : > { %v2396_v32 = vpop.f32.mrb[15].mxu0  ;;  %v2422_v35 = vadd.f32 %v2421_v34, %v2420_v31  ;;  %v2423_v37 = vpop.f32.mrb[14].mxu1 }
 0x126   : > { %v2424_v8 = vpop.f32.mrb[15].mxu1 }
 0x127   : > { %v988_v39 = vadd.f32 %v2422_v35, %v2394_v28 }
 0x129   : > { %v998_v40 = vadd.f32 %v988_v39, %v539_v12 }
 0x13a   : > { %v2442_v41 = vpop.f32.mrb[16].mxu0 }
 0x13b   : > { %v2470_v43 = vpop.f32.mrb[16].mxu1  ;;  %v2443_v9 = vpop.f32.mrb[17].mxu0 }
 0x13c   : > { %v2444_v44 = vadd.f32 %v2443_v9, %v2442_v41  ;;  %v2471_v45 = vpop.f32.mrb[17].mxu1  ;;  %v2445_v46 = vpop.f32.mrb[18].mxu0 }
 0x13d   : > { %v2472_v47 = vadd.f32 %v2471_v45, %v2470_v43  ;;  %v2473_v48 = vpop.f32.mrb[18].mxu1  ;;  %v2446_v49 = vpop.f32.mrb[19].mxu0 }
 0x13e   : > { %v2447_v50 = vadd.f32 %v2446_v49, %v2445_v46  ;;  %v2474_v51 = vpop.f32.mrb[19].mxu1 }
 0x13f   : > { %v1395_v52 = vadd.f32 %v2472_v47, %v2444_v44  ;;  %v2475_v53 = vadd.f32 %v2474_v51, %v2473_v48 }
 0x141   : > { %v1411_v54 = vadd.f32 %v1395_v52, %v996_v25  ;;  %v1398_v55 = vadd.f32 %v2475_v53, %v2447_v50 }
 0x142   : > { %v2448_v56 = vpop.f32.mrb[20].mxu0 }
 0x143   : > { %v1412_v57 = vadd.f32 %v1398_v55, %v997_v30  ;;  %v2476_v58 = vpop.f32.mrb[20].mxu1  ;;  %v2449_v59 = vpop.f32.mrb[21].mxu0 }
 0x144   : > { %v2450_v60 = vadd.f32 %v2449_v59, %v2448_v56  ;;  %v2477_v61 = vpop.f32.mrb[21].mxu1  ;;  %v2451_v62 = vpop.f32.mrb[22].mxu0 }
 0x145   : > { %v2478_v63 = vadd.f32 %v2477_v61, %v2476_v58  ;;  %v2479_v0 = vpop.f32.mrb[22].mxu1  ;;  %v2452_v1 = vpop.f32.mrb[23].mxu0 }
 0x146   : > { %v2480_v3 = vpop.f32.mrb[23].mxu1 }
 0x147   : > { %v1403_v33 = vadd.f32 %v2478_v63, %v2450_v60 }
 0x149   : > { %v1413_v5 = vadd.f32 %v1403_v33, %v998_v40 }
 0x15a   : > { %v2498_v6 = vpop.f32.mrb[24].mxu0 }
 0x15b   : > { %v2499_v7 = vpop.f32.mrb[25].mxu0  ;;  %v2526_v2 = vpop.f32.mrb[24].mxu1 }
 0x15c   : > { %v2500_v10 = vadd.f32 %v2499_v7, %v2498_v6  ;;  %v2501_v36 = vpop.f32.mrb[26].mxu0  ;;  %v2527_v11 = vpop.f32.mrb[25].mxu1 }
 0x15d   : > { %v2502_v38 = vpop.f32.mrb[27].mxu0  ;;  %v2528_v12 = vadd.f32 %v2527_v11, %v2526_v2  ;;  %v2529_v13 = vpop.f32.mrb[26].mxu1 }
 0x15e   : > { %v2503_v14 = vadd.f32 %v2502_v38, %v2501_v36  ;;  %v2530_v42 = vpop.f32.mrb[27].mxu1 }
 0x15f   : > { %v1858_v4 = vadd.f32 %v2528_v12, %v2500_v10  ;;  %v2531_v15 = vadd.f32 %v2530_v42, %v2529_v13 }
 0x161   : > { %v1874_v17 = vadd.f32 %v1858_v4, %v1411_v54  ;;  %v1861_v18 = vadd.f32 %v2531_v15, %v2503_v14 }
 0x162   : > { %v2504_v19 = vpop.f32.mrb[28].mxu0 }
 0x163   : > { %v2505_v20 = vpop.f32.mrb[29].mxu0  ;;  %v1890_v21 = vadd.f32 %v2300_v16, %v1874_v17  ;;  %v1875_v22 = vadd.f32 %v1861_v18, %v1412_v57  ;;  %v2532_v23 = vpop.f32.mrb[28].mxu1 }
 0x164   : > { %v2506_v24 = vadd.f32 %v2505_v20, %v2504_v19  ;;  %v2507_v25 = vpop.f32.mrb[30].mxu0  ;;  %v2533_v26 = vpop.f32.mrb[29].mxu1 }
 0x165   : > { %v2508_v27 = vpop.f32.mrb[31].mxu0  ;;  %v1896_v28 = vmul.f32 0.01, %v1890_v21  ;;  %v1891_v29 = vadd.f32 %v2300_v16, %v1875_v22  ;;  %v2534_v30 = vadd.f32 %v2533_v26, %v2532_v23  ;;  %v2535_v31 = vpop.f32.mrb[30].mxu1  ;;  %vm1893_vm3 = vcmp.ge.f32.partialorder %v1890_v21, 0.0 }
 0x166   : > { %v2536_v32 = vpop.f32.mrb[31].mxu1 }
 0x167   : > { %vm1894_vm4 = vcmp.ge.f32.partialorder %v1891_v29, 0.0  ;;  %v1897_v34 = vmul.f32 0.01, %v1891_v29  ;;  %v1866_v35 = vadd.f32 %v2534_v30, %v2506_v24  ;;  %v1899_v37 = vsel %vm1893_vm3, %v1890_v21, %v1896_v28 }
 0x169   : > { %v1900_v8 = vsel %vm1894_vm4, %v1891_v29, %v1897_v34  ;;  %v1876_v39 = vadd.f32 %v1866_v35, %v1413_v5 }
 0x16a   : > { %v2312_v40 = vpack.c.bf16 %v1900_v8, %v1899_v37 }
 0x16b   : > { %v1892_v41 = vadd.f32 %v2300_v16, %v1876_v39 }
 0x16c   : > { %2313 = vst [vmem:[%s170_s9] sm:$0xff] %v2312_v40  }
 0x16d   : > { %vm1895_vm5 = vcmp.ge.f32.partialorder %v1892_v41, 0.0  ;;  %v1898_v43 = vmul.f32 0.01, %v1892_v41 }
 0x16f   : > { %v1901_v9 = vsel %vm1895_vm5, %v1892_v41, %v1898_v43 }
 0x170   : > { %v2308_v44 = vpack.c.bf16 %v1901_v9, %v1901_v9 }
 0x172   : > { %1917 = vst [vmem:[%s170_s9 + $0x8] sm:$0xf] %v2308_v44 }
 0x173 PF: > { %s13_s12 = sadd.s32 1, %s2682_s12  }
 0x174   : > { %p10_p4 = scmp.ge.s32.totalorder %s13_s12, 4  }
 0x176   :  { %12 = sbr.rel (!%p10_p4) target bundleno = 1 (0x1), region = 65 }

// kernel: bc_visual_policy_forward.6
= control target key start
LH: loop header
LB: loop body
LE: loop exit
PB: predicated region body
PF: predicated region fallthrough
CT: control target
= control target key end

     0   :  { %s3151_s12 = smov 0   ;;  %s3977_s0 = inlined_call_operand.vmem [shape: f32[2,16,512], index: 0, kind: input, shape index: {}]   ;;  %s3978_s1 = inlined_call_operand.vmem [shape: bf16[4,512,256], index: 1, kind: input, shape index: {}]   ;;  %s3979_s2 = inlined_call_operand.vmem [shape: f32[1,256], index: 2, kind: input, shape index: {}]   ;;  %s3980_s3 = inlined_call_operand.vmem [shape: bf16[2,8,256], index: 3, kind: output, shape index: {}]  }
   0x1 LB: > { %s2268_s13 = sadd.s32 4294967295, %s3129_s12   ;;  %p2272_p0 = scmp.ge.s32.totalorder %s3129_s12, 1  ;;  %s3129_s12 = sphi %s3151_s12, %s13_s12  }
   0x2   : > { %p137_p1 = scmp.lt.s32.totalorder %s3129_s12, 3 }
   0x4   : > { %p138_p2 = pnand %p2272_p0, %p137_p1 }
   0x5   : > { %v2739_v0 = vld [vmem:[%s3978_s1 + $0x4] ss:$8 sps:$4 sm:$0xff] (!%p138_p2)   ;;  %v2743_v2 = vld [vmem:[%s3978_s1] ss:$8 sps:$4 sm:$0xff] (!%p138_p2)   ;;  %v2745_v4 = vld [vmem:[%s3978_s1 + $0x14] ss:$8 sps:$4 sm:$0xff] (!%p138_p2)  }
   0x6   : > { %141 = sbr.rel (%p138_p2) target bundleno = 488 (0x1e8), region = 32  ;;  %v2741_v1 = vld [vmem:[%s3978_s1 + $0x104] ss:$8 sps:$4 sm:$0xff] (!%p138_p2)   ;;  %563 = vmatprep.subr.bf16.mxu0 (!%p138_p2), %v2739_v0  ;;  %v2744_v3 = vld [vmem:[%s3978_s1 + $0x100] ss:$8 sps:$4 sm:$0xff] (!%p138_p2)   ;;  %p161_p3 = scmp.lt.s32.totalorder (!%p138_p2), %s2268_s13, 1 }
   0x7   : > { %604 = vmatprep.subr.bf16.mxu1 (!%p138_p2), %v2741_v1  ;;  %564 = vmatpush1.bf16.msra.mxu0 (!%p138_p2), %v2743_v2  ;;  %v2747_v5 = vld [vmem:[%s3978_s1 + $0x114] ss:$8 sps:$4 sm:$0xff] (!%p138_p2)   ;;  %v2749_v6 = vld [vmem:[%s3978_s1 + $0x10] ss:$8 sps:$4 sm:$0xff] (!%p138_p2)   ;;  %v2751_v8 = vld [vmem:[%s3978_s1 + $0x24] ss:$8 sps:$4 sm:$0xff] (!%p138_p2)  }
   0x8   : > { %605 = vmatpush1.bf16.msra.mxu1 (!%p138_p2), %v2744_v3  ;;  %565 = vmatprep.subr.bf16.mxu0 (!%p138_p2), %v2745_v4  ;;  %v2750_v7 = vld [vmem:[%s3978_s1 + $0x110] ss:$8 sps:$4 sm:$0xff] (!%p138_p2)   ;;  %v2753_v9 = vld [vmem:[%s3978_s1 + $0x124] ss:$8 sps:$4 sm:$0xff] (!%p138_p2)   ;;  %v2755_v10 = vld [vmem:[%s3978_s1 + $0x20] ss:$8 sps:$4 sm:$0xff] (!%p138_p2)  }
   0x9   : > { %606 = vmatprep.subr.bf16.mxu1 (!%p138_p2), %v2747_v5  ;;  %v2756_v11 = vld [vmem:[%s3978_s1 + $0x120] ss:$8 sps:$4 sm:$0xff] (!%p138_p2)   ;;  %v2757_v12 = vld [vmem:[%s3978_s1 + $0x34] ss:$8 sps:$4 sm:$0xff] (!%p138_p2)   ;;  %v2761_v14 = vld [vmem:[%s3978_s1 + $0x30] ss:$8 sps:$4 sm:$0xff] (!%p138_p2)  }
   0xa   : > { %v2759_v13 = vld [vmem:[%s3978_s1 + $0x134] ss:$8 sps:$4 sm:$0xff] (!%p138_p2)   ;;  %v2762_v15 = vld [vmem:[%s3978_s1 + $0x130] ss:$8 sps:$4 sm:$0xff] (!%p138_p2)   ;;  %v2763_v16 = vld [vmem:[%s3978_s1 + $0x44] ss:$8 sps:$4 sm:$0xff] (!%p138_p2)  }
   0xb   : > { %566 = vmatpush1.bf16.msra.mxu0 (!%p138_p2), %v2749_v6  ;;  %v2765_v17 = vld [vmem:[%s3978_s1 + $0x144] ss:$8 sps:$4 sm:$0xff] (!%p138_p2)   ;;  %v2767_v18 = vld [vmem:[%s3978_s1 + $0x40] ss:$8 sps:$4 sm:$0xff] (!%p138_p2)   ;;  %v2769_v20 = vld [vmem:[%s3978_s1 + $0x54] ss:$8 sps:$4 sm:$0xff] (!%p138_p2)  }
   0xc   : > { %607 = vmatpush1.bf16.msra.mxu1 (!%p138_p2), %v2750_v7  ;;  %567 = vmatprep.subr.bf16.mxu0 (!%p138_p2), %v2751_v8  ;;  %v2768_v19 = vld [vmem:[%s3978_s1 + $0x140] ss:$8 sps:$4 sm:$0xff] (!%p138_p2)   ;;  %v2771_v21 = vld [vmem:[%s3978_s1 + $0x154] ss:$8 sps:$4 sm:$0xff] (!%p138_p2)   ;;  %v2773_v22 = vld [vmem:[%s3978_s1 + $0x50] ss:$8 sps:$4 sm:$0xff] (!%p138_p2)  }
   0xd   : > { %608 = vmatprep.subr.bf16.mxu1 %v2753_v9  ;;  %v2774_v23 = vld [vmem:[%s3978_s1 + $0x150] ss:$8 sps:$4 sm:$0xff]   ;;  %v2775_v24 = vld [vmem:[%s3978_s1 + $0x64] ss:$8 sps:$4 sm:$0xff]   ;;  %v2779_v26 = vld [vmem:[%s3978_s1 + $0x60] ss:$8 sps:$4 sm:$0xff]  }
   0xe   : > { %v2777_v25 = vld [vmem:[%s3978_s1 + $0x164] ss:$8 sps:$4 sm:$0xff]   ;;  %v2780_v27 = vld [vmem:[%s3978_s1 + $0x160] ss:$8 sps:$4 sm:$0xff]   ;;  %v2781_v28 = vld [vmem:[%s3978_s1 + $0x74] ss:$8 sps:$4 sm:$0xff]  }
   0xf   : > { %568 = vmatpush1.bf16.msra.mxu0 %v2755_v10  ;;  %v2783_v29 = vld [vmem:[%s3978_s1 + $0x174] ss:$8 sps:$4 sm:$0xff]   ;;  %v2785_v30 = vld [vmem:[%s3978_s1 + $0x70] ss:$8 sps:$4 sm:$0xff]   ;;  %v2787_v32 = vld [vmem:[%s3978_s1 + $0x84] ss:$8 sps:$4 sm:$0xff]  }
  0x10   : > { %609 = vmatpush1.bf16.msra.mxu1 %v2756_v11  ;;  %569 = vmatprep.subr.bf16.mxu0 %v2757_v12  ;;  %v2786_v31 = vld [vmem:[%s3978_s1 + $0x170] ss:$8 sps:$4 sm:$0xff]   ;;  %v2789_v33 = vld [vmem:[%s3978_s1 + $0x184] ss:$8 sps:$4 sm:$0xff]   ;;  %v2791_v34 = vld [vmem:[%s3978_s1 + $0x80] ss:$8 sps:$4 sm:$0xff]  }
  0x11   : > { %610 = vmatprep.subr.bf16.mxu1 %v2759_v13  ;;  %v2792_v35 = vld [vmem:[%s3978_s1 + $0x180] ss:$8 sps:$4 sm:$0xff]   ;;  %v2793_v36 = vld [vmem:[%s3978_s1 + $0x94] ss:$8 sps:$4 sm:$0xff]   ;;  %s3982_s13 = smov (!%p161_p3, %s2268_s13), 1 }
  0x12   : > { %v2795_v37 = vld [vmem:[%s3978_s1 + $0x194] ss:$8 sps:$4 sm:$0xff]   ;;  %v2797_v38 = vld [vmem:[%s3978_s1 + $0x90] ss:$8 sps:$4 sm:$0xff]   ;;  %v2799_v40 = vld [vmem:[%s3978_s1 + $0xa4] ss:$8 sps:$4 sm:$0xff]  }
  0x13   : > { %570 = vmatpush1.bf16.msra.mxu0 %v2761_v14  ;;  %v2798_v39 = vld [vmem:[%s3978_s1 + $0x190] ss:$8 sps:$4 sm:$0xff]   ;;  %s2728_s21 = sshll.u32 %s3982_s13, 6  ;;  %v2801_v41 = vld [vmem:[%s3978_s1 + $0x1a4] ss:$8 sps:$4 sm:$0xff]   ;;  %s2729_s23 = sshll.u32 %s3982_s13, 3 }
  0x14   : > { %611 = vmatpush1.bf16.msra.mxu1 %v2762_v15  ;;  %571 = vmatprep.subr.bf16.mxu0 %v2763_v16  ;;  %v2803_v42 = vld [vmem:[%s3978_s1 + $0xa0] ss:$8 sps:$4 sm:$0xff]   ;;  %s3301_s30 = scalar_lea.vmem %s3977_s0, %s2728_s21  ;;  %v2805_v44 = vld [vmem:[%s3978_s1 + $0xb4] ss:$8 sps:$4 sm:$0xff]   ;;  %v2809_v47 = vld [vmem:[%s3978_s1 + $0xb0] ss:$8 sps:$4 sm:$0xff]   ;;  %s170_s26 = scalar_lea.vmem %s3980_s3, %s2729_s23 }
  0x15   : > { %612 = vmatprep.subr.bf16.mxu1 %v2765_v17  ;;  %v2804_v43 = vld [vmem:[%s3978_s1 + $0x1a0] ss:$8 sps:$4 sm:$0xff]   ;;  %v2807_v45 = vld [vmem:[%s3978_s1 + $0x1b4] ss:$8 sps:$4 sm:$0xff]   ;;  %v2810_v48 = vld [vmem:[%s3978_s1 + $0x1b0] ss:$8 sps:$4 sm:$0xff]  }
  0x16   : > { %v172_v46 = vld [vmem:[%s3301_s30 + $0x8] sm:$0xff]  ;;  %v174_v50 = vld [vmem:[%s3301_s30 + $0x18] sm:$0xff]  ;;  %v171_v4 = vld [vmem:[%s3301_s30] sm:$0xff] }
  0x17   : > { %572 = vmatpush1.bf16.msra.mxu0 %v2767_v18  ;;  %v176_v49 = vpack.c.bf16 %v172_v46, %v172_v46  ;;  %v2811_v51 = vld [vmem:[%s3978_s1 + $0xc4] ss:$8 sps:$4 sm:$0xff]   ;;  %v178_v52 = vpack.c.bf16 %v174_v50, %v174_v50  ;;  %v2815_v54 = vld [vmem:[%s3978_s1 + $0xc0] ss:$8 sps:$4 sm:$0xff]   ;;  %v2817_v56 = vld [vmem:[%s3978_s1 + $0xd4] ss:$8 sps:$4 sm:$0xff]   ;;  %v175_v8 = vpack.c.bf16 %v171_v4, %v171_v4 }
  0x18   : > { %613 = vmatpush1.bf16.msra.mxu1 %v2768_v19  ;;  %573 = vmatprep.subr.bf16.mxu0 %v2769_v20  ;;  %v2813_v53 = vld [vmem:[%s3978_s1 + $0x1c4] ss:$8 sps:$4 sm:$0xff]   ;;  %v2816_v55 = vld [vmem:[%s3978_s1 + $0x1c0] ss:$8 sps:$4 sm:$0xff]   ;;  %v2819_v57 = vld [vmem:[%s3978_s1 + $0x1d4] ss:$8 sps:$4 sm:$0xff]  }
  0x19   : > { %614 = vmatprep.subr.bf16.mxu1 %v2771_v21  ;;  %595 = vmatprep.mubr.bf16.mxu0 %v176_v49  ;;  %v2821_v58 = vld [vmem:[%s3978_s1 + $0xd0] ss:$8 sps:$4 sm:$0xff]   ;;  %v2823_v60 = vld [vmem:[%s3978_s1 + $0xe4] ss:$8 sps:$4 sm:$0xff]   ;;  %v2827_v62 = vld [vmem:[%s3978_s1 + $0xe0] ss:$8 sps:$4 sm:$0xff]  }
  0x1a   : > { %636 = vmatprep.mubr.bf16.mxu1 %v178_v52  ;;  %v2822_v59 = vld [vmem:[%s3978_s1 + $0x1d0] ss:$8 sps:$4 sm:$0xff]   ;;  %v2825_v61 = vld [vmem:[%s3978_s1 + $0x1e4] ss:$8 sps:$4 sm:$0xff]   ;;  %v2828_v63 = vld [vmem:[%s3978_s1 + $0x1e0] ss:$8 sps:$4 sm:$0xff]  }
  0x1b   : > { %574 = vmatpush1.bf16.msra.mxu0 %v2773_v22  ;;  %v2829_v0 = vld [vmem:[%s3978_s1 + $0xf4] ss:$8 sps:$4 sm:$0xff]   ;;  %v2833_v2 = vld [vmem:[%s3978_s1 + $0xf0] ss:$8 sps:$4 sm:$0xff]   ;;  %v2837_v6 = vld [vmem:[%s3978_s1 + $0x204] ss:$8 sps:$4 sm:$0xff]  }
  0x1c   : > { %615 = vmatpush1.bf16.msra.mxu1 %v2774_v23  ;;  %575 = vmatprep.subr.bf16.mxu0 %v2775_v24  ;;  %v2831_v1 = vld [vmem:[%s3978_s1 + $0x1f4] ss:$8 sps:$4 sm:$0xff]   ;;  %v2834_v3 = vld [vmem:[%s3978_s1 + $0x1f0] ss:$8 sps:$4 sm:$0xff]   ;;  %v2840_v7 = vld [vmem:[%s3978_s1 + $0x304] ss:$8 sps:$4 sm:$0xff]  }
  0x1d   : > { %616 = vmatprep.subr.bf16.mxu1 %v2777_v25  ;;  %v173_v5 = vld [vmem:[%s3301_s30 + $0x10] sm:$0xff]  ;;  %v2835_v10 = vld [vmem:[%s3978_s1 + $0x200] ss:$8 sps:$4 sm:$0xff]   ;;  %v2849_v16 = vld [vmem:[%s3978_s1 + $0x224] ss:$8 sps:$4 sm:$0xff]  }
  0x1e   : > { %v177_v9 = vpack.c.bf16 %v173_v5, %v173_v5  ;;  %v2838_v11 = vld [vmem:[%s3978_s1 + $0x300] ss:$8 sps:$4 sm:$0xff]   ;;  %v2843_v12 = vld [vmem:[%s3978_s1 + $0x214] ss:$8 sps:$4 sm:$0xff]   ;;  %v2841_v14 = vld [vmem:[%s3978_s1 + $0x210] ss:$8 sps:$4 sm:$0xff]  }
  0x1f   : > { %576 = vmatpush1.bf16.msra.mxu0 %v2779_v26  ;;  %v2846_v13 = vld [vmem:[%s3978_s1 + $0x314] ss:$8 sps:$4 sm:$0xff]   ;;  %v2844_v15 = vld [vmem:[%s3978_s1 + $0x310] ss:$8 sps:$4 sm:$0xff]   ;;  %v2852_v17 = vld [vmem:[%s3978_s1 + $0x324] ss:$8 sps:$4 sm:$0xff]  }
  0x20   : > { %617 = vmatpush1.bf16.msra.mxu1 %v2780_v27  ;;  %577 = vmatprep.subr.bf16.mxu0 %v2781_v28  ;;  %v2847_v18 = vld [vmem:[%s3978_s1 + $0x220] ss:$8 sps:$4 sm:$0xff]   ;;  %v2855_v20 = vld [vmem:[%s3978_s1 + $0x234] ss:$8 sps:$4 sm:$0xff]   ;;  %v2853_v22 = vld [vmem:[%s3978_s1 + $0x230] ss:$8 sps:$4 sm:$0xff]  }
  0x21   : > { %618 = vmatprep.subr.bf16.mxu1 %v2783_v29  ;;  %v2850_v19 = vld [vmem:[%s3978_s1 + $0x320] ss:$8 sps:$4 sm:$0xff]   ;;  %v2858_v21 = vld [vmem:[%s3978_s1 + $0x334] ss:$8 sps:$4 sm:$0xff]   ;;  %v2856_v23 = vld [vmem:[%s3978_s1 + $0x330] ss:$8 sps:$4 sm:$0xff]  }
  0x22   : > { %v2861_v24 = vld [vmem:[%s3978_s1 + $0x244] ss:$8 sps:$4 sm:$0xff]   ;;  %v2859_v26 = vld [vmem:[%s3978_s1 + $0x240] ss:$8 sps:$4 sm:$0xff]   ;;  %v2867_v28 = vld [vmem:[%s3978_s1 + $0x254] ss:$8 sps:$4 sm:$0xff]  }
  0x23   : > { %578 = vmatpush1.bf16.msra.mxu0 %v2785_v30  ;;  %v2864_v25 = vld [vmem:[%s3978_s1 + $0x344] ss:$8 sps:$4 sm:$0xff]   ;;  %v2862_v27 = vld [vmem:[%s3978_s1 + $0x340] ss:$8 sps:$4 sm:$0xff]   ;;  %v2870_v29 = vld [vmem:[%s3978_s1 + $0x354] ss:$8 sps:$4 sm:$0xff]  }
  0x24   : > { %619 = vmatpush1.bf16.msra.mxu1 %v2786_v31  ;;  %579 = vmatprep.subr.bf16.mxu0 %v2787_v32  ;;  %v2865_v30 = vld [vmem:[%s3978_s1 + $0x250] ss:$8 sps:$4 sm:$0xff]   ;;  %v2873_v32 = vld [vmem:[%s3978_s1 + $0x264] ss:$8 sps:$4 sm:$0xff]  }
  0x25   : > { %620 = vmatprep.subr.bf16.mxu1 %v2789_v33  ;;  %v2868_v31 = vld [vmem:[%s3978_s1 + $0x350] ss:$8 sps:$4 sm:$0xff]   ;;  %v2876_v33 = vld [vmem:[%s3978_s1 + $0x364] ss:$8 sps:$4 sm:$0xff]  }
  0x26   : > { %v2880_v49 = vld [vmem:[%s3978_s1 + $0x370] ss:$8 sps:$4 sm:$0xff]   ;;  %v2885_v50 = vld [vmem:[%s3978_s1 + $0x284] ss:$8 sps:$4 sm:$0xff]  }
  0x27   : > { %580 = vmatpush1.bf16.msra.mxu0 %v2791_v34  ;;  %v648_v34 = vld [vmem:[%s3301_s30 + $0x8] sm:$0xfe]  ;;  %v2901_v4 = vld [vmem:[%s3978_s1 + $0x2b0] ss:$8 sps:$4 sm:$0xff]  }
  0x28   : > { %621 = vmatpush1.bf16.msra.mxu1 %v2792_v35  ;;  %581 = vmatprep.subr.bf16.mxu0 %v2793_v36  ;;  %v652_v35 = vld [vmem:[%s3301_s30 + $0x28] sm:$0x1]  ;;  %v650_v36 = vld [vmem:[%s3301_s30 + $0x18] sm:$0xfe] }
  0x29   : > { %622 = vmatprep.subr.bf16.mxu1 %v2795_v37  ;;  %v654_v37 = vld [vmem:[%s3301_s30 + $0x38] sm:$0x1] }
  0x2a   : > { %v2904_v5 = vld [vmem:[%s3978_s1 + $0x3b0] ss:$8 sps:$4 sm:$0xff]  }
  0x2b   : > { %582 = vmatpush1.bf16.msra.mxu0 %v2797_v38  ;;  %v2871_v38 = vld [vmem:[%s3978_s1 + $0x260] ss:$8 sps:$4 sm:$0xff]  }
  0x2c   : > { %623 = vmatpush1.bf16.msra.mxu1 %v2798_v39  ;;  %583 = vmatprep.subr.bf16.mxu0 %v2799_v40  ;;  %v2874_v39 = vld [vmem:[%s3978_s1 + $0x360] ss:$8 sps:$4 sm:$0xff]   ;;  %v2879_v40 = vld [vmem:[%s3978_s1 + $0x274] ss:$8 sps:$4 sm:$0xff]  }
  0x2d   : > { %624 = vmatprep.subr.bf16.mxu1 %v2801_v41  ;;  %v656_v41 = vpack.c.bf16 %v652_v35, %v648_v34  ;;  %v2933_v34 = vld [vmem:[%s3978_s1 + $0x404] ss:$8 sps:$4 sm:$0xff]  }
  0x2e   : > { %v2936_v35 = vld [vmem:[%s3978_s1 + $0x504] ss:$8 sps:$4 sm:$0xff]  }
  0x2f   : > { %584 = vmatpush1.bf16.msra.mxu0 %v2803_v42  ;;  %v658_v42 = vpack.c.bf16 %v654_v37, %v650_v36  ;;  %v734_v46 = vshll.u32 %v656_v41, 16 }
  0x30   : > { %625 = vmatpush1.bf16.msra.mxu1 %v2804_v43  ;;  %585 = vmatprep.subr.bf16.mxu0 %v2805_v44  ;;  %v2882_v43 = vld [vmem:[%s3978_s1 + $0x374] ss:$8 sps:$4 sm:$0xff]   ;;  %v2877_v44 = vld [vmem:[%s3978_s1 + $0x270] ss:$8 sps:$4 sm:$0xff]  }
  0x31   : > { %626 = vmatprep.subr.bf16.mxu1 %v2807_v45  ;;  %v732_v45 = vshrl.u32 %v656_v41, 16  ;;  %v736_v52 = vrot.slane %v734_v46, 1  ;;  %v2942_v41 = vld [vmem:[%s3978_s1 + $0x514] ss:$8 sps:$4 sm:$0xff]   ;;  %v1165_v46 = vld [vmem:[%s3301_s30 + $0x8] sm:$0xf0] }
  0x33   : > { %586 = vmatpush1.bf16.msra.mxu0 %v2809_v47  ;;  %v746_v47 = vshrl.u32 %v658_v42, 16 }
  0x34   : > { %627 = vmatpush1.bf16.msra.mxu1 %v2810_v48  ;;  %587 = vmatprep.subr.bf16.mxu0 %v2811_v51  ;;  %v748_v48 = vshll.u32 %v658_v42, 16  ;;  %v2888_v51 = vld [vmem:[%s3978_s1 + $0x384] ss:$8 sps:$4 sm:$0xff]   ;;  %v2937_v42 = vld [vmem:[%s3978_s1 + $0x410] ss:$8 sps:$4 sm:$0xff]  }
  0x35   : > { %628 = vmatprep.subr.bf16.mxu1 %v2813_v53 }
  0x36   : > { %v750_v53 = vrot.slane %v748_v48, 1  ;;  %v1167_v48 = vld [vmem:[%s3301_s30 + $0x18] sm:$0xf0] }
  0x37   : > { %588 = vmatpush1.bf16.msra.mxu0 %v2815_v54  ;;  %v737_v54 = vor.u32 %v736_v52, %v732_v45  ;;  %v2948_v45 = vld [vmem:[%s3978_s1 + $0x524] ss:$8 sps:$4 sm:$0xff]  }
  0x38   : > { %629 = vmatpush1.bf16.msra.mxu1 %v2816_v55  ;;  %589 = vmatprep.subr.bf16.mxu0 %v2817_v56  ;;  %v751_v55 = vor.u32 %v750_v53, %v746_v47  ;;  %v2883_v56 = vld [vmem:[%s3978_s1 + $0x280] ss:$8 sps:$4 sm:$0xff]  }
  0x39   : > { %630 = vmatprep.subr.bf16.mxu1 %v2819_v57  ;;  %v2886_v57 = vld [vmem:[%s3978_s1 + $0x380] ss:$8 sps:$4 sm:$0xff]  }
  0x3a   : > { %v1169_v47 = vld [vmem:[%s3301_s30 + $0x28] sm:$0xf] }
  0x3b   : > { %590 = vmatpush1.bf16.msra.mxu0 %v2821_v58  ;;  %v2891_v58 = vld [vmem:[%s3978_s1 + $0x294] ss:$8 sps:$4 sm:$0xff]   ;;  %v2946_v53 = vld [vmem:[%s3978_s1 + $0x520] ss:$8 sps:$4 sm:$0xff]  }
  0x3c   : > { %631 = vmatpush1.bf16.msra.mxu1 %v2822_v59  ;;  %591 = vmatprep.subr.bf16.mxu0 %v2823_v60  ;;  %v2894_v59 = vld [vmem:[%s3978_s1 + $0x394] ss:$8 sps:$4 sm:$0xff]   ;;  %v2889_v60 = vld [vmem:[%s3978_s1 + $0x290] ss:$8 sps:$4 sm:$0xff]  }
  0x3d   : > { %632 = vmatprep.subr.bf16.mxu1 %v2825_v61  ;;  %v2892_v61 = vld [vmem:[%s3978_s1 + $0x390] ss:$8 sps:$4 sm:$0xff]  }
  0x3f   : > { %592 = vmatpush1.bf16.msra.mxu0 %v2827_v62  ;;  %v2897_v62 = vld [vmem:[%s3978_s1 + $0x2a4] ss:$8 sps:$4 sm:$0xff]  }
  0x40   : > { %633 = vmatpush1.bf16.msra.mxu1 %v2828_v63  ;;  %593 = vmatprep.subr.bf16.mxu0 %v2829_v0  ;;  %v2900_v63 = vld [vmem:[%s3978_s1 + $0x3a4] ss:$8 sps:$4 sm:$0xff]   ;;  %v2895_v0 = vld [vmem:[%s3978_s1 + $0x2a0] ss:$8 sps:$4 sm:$0xff]  }
  0x41   : > { %634 = vmatprep.subr.bf16.mxu1 %v2831_v1  ;;  %v2898_v1 = vld [vmem:[%s3978_s1 + $0x3a0] ss:$8 sps:$4 sm:$0xff]  }
  0x43   : > { %594 = vmatpush1.bf16.msra.mxu0 %v2833_v2  ;;  %v2903_v2 = vld [vmem:[%s3978_s1 + $0x2b4] ss:$8 sps:$4 sm:$0xff]  }
  0x44   : > { %635 = vmatpush1.bf16.msra.mxu1 %v2834_v3  ;;  %1076 = vmatprep.subr.bf16.mxu0 %v2837_v6  ;;  %v2906_v3 = vld [vmem:[%s3978_s1 + $0x3b4] ss:$8 sps:$4 sm:$0xff]   ;;  %v2909_v6 = vld [vmem:[%s3978_s1 + $0x2c4] ss:$8 sps:$4 sm:$0xff]  }
  0x45   : > { %1117 = vmatprep.subr.bf16.mxu1 %v2840_v7  ;;  %v2912_v7 = vld [vmem:[%s3978_s1 + $0x3c4] ss:$8 sps:$4 sm:$0xff]  }
  0x46   : > { %596 = vmatmul.mubr.bf16.vlgmr.msra.gmra.mrb[0].mxu0 %v175_v8  ;;  %v2907_v8 = vld [vmem:[%s3978_s1 + $0x2c0] ss:$8 sps:$4 sm:$0xff]  }
  0x47   : > { %637 = vmatmul.mubr.bf16.vlgmr.msra.gmra.mrb[0].mxu1 %v177_v9  ;;  %1077 = vmatpush1.bf16.msra.mxu0 %v2835_v10  ;;  %v2910_v9 = vld [vmem:[%s3978_s1 + $0x3c0] ss:$8 sps:$4 sm:$0xff]   ;;  %v2915_v10 = vld [vmem:[%s3978_s1 + $0x2d4] ss:$8 sps:$4 sm:$0xff]  }
  0x48   : > { %1118 = vmatpush1.bf16.msra.mxu1 %v2838_v11  ;;  %1078 = vmatprep.subr.bf16.mxu0 %v2843_v12  ;;  %v647_v11 = vld [vmem:[%s3301_s30] sm:$0xfe]  ;;  %v651_v12 = vld [vmem:[%s3301_s30 + $0x20] sm:$0x1] }
  0x49   : > { %1119 = vmatprep.subr.bf16.mxu1 %v2846_v13  ;;  %1108 = vmatprep.mubr.bf16.mxu0 %v737_v54  ;;  %v649_v13 = vld [vmem:[%s3301_s30 + $0x10] sm:$0xfe] }
  0x4a   : > { %1149 = vmatprep.mubr.bf16.mxu1 %v751_v55  ;;  %v2951_v54 = vld [vmem:[%s3978_s1 + $0x434] ss:$8 sps:$4 sm:$0xff]  }
  0x4b   : > { %1079 = vmatpush1.bf16.msra.mxu0 %v2841_v14  ;;  %v653_v14 = vld [vmem:[%s3301_s30 + $0x30] sm:$0x1] }
  0x4c   : > { %1120 = vmatpush1.bf16.msra.mxu1 %v2844_v15  ;;  %1080 = vmatprep.subr.bf16.mxu0 %v2849_v16  ;;  %v2918_v15 = vld [vmem:[%s3978_s1 + $0x3d4] ss:$8 sps:$4 sm:$0xff]   ;;  %v2913_v16 = vld [vmem:[%s3978_s1 + $0x2d0] ss:$8 sps:$4 sm:$0xff]  }
  0x4d   : > { %1121 = vmatprep.subr.bf16.mxu1 %v2852_v17  ;;  %v655_v17 = vpack.c.bf16 %v651_v12, %v647_v11  ;;  %v2976_v11 = vld [vmem:[%s3978_s1 + $0x570] ss:$8 sps:$4 sm:$0xff]   ;;  %v2981_v12 = vld [vmem:[%s3978_s1 + $0x484] ss:$8 sps:$4 sm:$0xff]  }
  0x4f   : > { %1081 = vmatpush1.bf16.msra.mxu0 %v2847_v18  ;;  %v657_v18 = vpack.c.bf16 %v653_v14, %v649_v13  ;;  %v2984_v13 = vld [vmem:[%s3978_s1 + $0x584] ss:$8 sps:$4 sm:$0xff]   ;;  %v2979_v14 = vld [vmem:[%s3978_s1 + $0x480] ss:$8 sps:$4 sm:$0xff]  }
  0x50   : > { %1122 = vmatpush1.bf16.msra.mxu1 %v2850_v19  ;;  %1082 = vmatprep.subr.bf16.mxu0 %v2855_v20  ;;  %v2916_v19 = vld [vmem:[%s3978_s1 + $0x3d0] ss:$8 sps:$4 sm:$0xff]   ;;  %v2921_v20 = vld [vmem:[%s3978_s1 + $0x2e4] ss:$8 sps:$4 sm:$0xff]  }
  0x51   : > { %1123 = vmatprep.subr.bf16.mxu1 %v2858_v21  ;;  %v2924_v21 = vld [vmem:[%s3978_s1 + $0x3e4] ss:$8 sps:$4 sm:$0xff]  }
  0x53   : > { %1083 = vmatpush1.bf16.msra.mxu0 %v2853_v22  ;;  %v2919_v22 = vld [vmem:[%s3978_s1 + $0x2e0] ss:$8 sps:$4 sm:$0xff]  }
  0x54   : > { %1124 = vmatpush1.bf16.msra.mxu1 %v2856_v23  ;;  %1084 = vmatprep.subr.bf16.mxu0 %v2861_v24  ;;  %v727_v23 = vshll.u32 %v655_v17, 16  ;;  %v741_v24 = vshll.u32 %v657_v18, 16 }
  0x55   : > { %1125 = vmatprep.subr.bf16.mxu1 %v2864_v25  ;;  %v2922_v25 = vld [vmem:[%s3978_s1 + $0x3e0] ss:$8 sps:$4 sm:$0xff]  }
  0x57   : > { %1085 = vmatpush1.bf16.msra.mxu0 %v2859_v26  ;;  %v2927_v26 = vld [vmem:[%s3978_s1 + $0x2f4] ss:$8 sps:$4 sm:$0xff]  }
  0x58   : > { %1126 = vmatpush1.bf16.msra.mxu1 %v2862_v27  ;;  %1086 = vmatprep.subr.bf16.mxu0 %v2867_v28  ;;  %v2930_v27 = vld [vmem:[%s3978_s1 + $0x3f4] ss:$8 sps:$4 sm:$0xff]   ;;  %v2925_v28 = vld [vmem:[%s3978_s1 + $0x2f0] ss:$8 sps:$4 sm:$0xff]  }
  0x59   : > { %1127 = vmatprep.subr.bf16.mxu1 %v2870_v29  ;;  %v725_v29 = vshrl.u32 %v655_v17, 16  ;;  %v2990_v17 = vld [vmem:[%s3978_s1 + $0x594] ss:$8 sps:$4 sm:$0xff]  }
  0x5b   : > { %1087 = vmatpush1.bf16.msra.mxu0 %v2865_v30  ;;  %v729_v30 = vrot.slane %v727_v23, 1  ;;  %v2994_v23 = vld [vmem:[%s3978_s1 + $0x5a0] ss:$8 sps:$4 sm:$0xff]  }
  0x5c   : > { %1128 = vmatpush1.bf16.msra.mxu1 %v2868_v31  ;;  %1088 = vmatprep.subr.bf16.mxu0 %v2873_v32  ;;  %v739_v31 = vshrl.u32 %v657_v18, 16  ;;  %v743_v32 = vrot.slane %v741_v24, 1  ;;  %v2985_v18 = vld [vmem:[%s3978_s1 + $0x490] ss:$8 sps:$4 sm:$0xff]   ;;  %v2999_v24 = vld [vmem:[%s3978_s1 + $0x4b4] ss:$8 sps:$4 sm:$0xff]  }
  0x5d   : > { %1129 = vmatprep.subr.bf16.mxu1 %v2876_v33  ;;  %v2928_v33 = vld [vmem:[%s3978_s1 + $0x3f0] ss:$8 sps:$4 sm:$0xff]   ;;  %v730_v36 = vor.u32 %v729_v30, %v725_v29  ;;  %v3008_v29 = vld [vmem:[%s3978_s1 + $0x5c4] ss:$8 sps:$4 sm:$0xff]   ;;  %v3003_v30 = vld [vmem:[%s3978_s1 + $0x4c0] ss:$8 sps:$4 sm:$0xff]  }
  0x5e   : > { %v744_v37 = vor.u32 %v743_v32, %v739_v31  ;;  %v3006_v31 = vld [vmem:[%s3978_s1 + $0x5c0] ss:$8 sps:$4 sm:$0xff]   ;;  %v3011_v32 = vld [vmem:[%s3978_s1 + $0x4d4] ss:$8 sps:$4 sm:$0xff]  }
  0x5f   : > { %1089 = vmatpush1.bf16.msra.mxu0 %v2871_v38  ;;  %v2931_v38 = vld [vmem:[%s3978_s1 + $0x400] ss:$8 sps:$4 sm:$0xff]  }
  0x60   : > { %1130 = vmatpush1.bf16.msra.mxu1 %v2874_v39  ;;  %1090 = vmatprep.subr.bf16.mxu0 %v2879_v40  ;;  %v2934_v39 = vld [vmem:[%s3978_s1 + $0x500] ss:$8 sps:$4 sm:$0xff]   ;;  %v2939_v40 = vld [vmem:[%s3978_s1 + $0x414] ss:$8 sps:$4 sm:$0xff]  }
  0x61   : > { %1131 = vmatprep.subr.bf16.mxu1 %v2882_v43  ;;  %v2940_v43 = vld [vmem:[%s3978_s1 + $0x510] ss:$8 sps:$4 sm:$0xff]  }
  0x63   : > { %1091 = vmatpush1.bf16.msra.mxu0 %v2877_v44  ;;  %v2945_v44 = vld [vmem:[%s3978_s1 + $0x424] ss:$8 sps:$4 sm:$0xff]  }
  0x64   : > { %1132 = vmatpush1.bf16.msra.mxu1 %v2880_v49  ;;  %1092 = vmatprep.subr.bf16.mxu0 %v2885_v50  ;;  %v1173_v49 = vpack.c.bf16 %v1169_v47, %v1165_v46  ;;  %v1171_v50 = vld [vmem:[%s3301_s30 + $0x38] sm:$0xf]  ;;  %v1164_v46 = vld [vmem:[%s3301_s30] sm:$0xf0]  ;;  %v1168_v47 = vld [vmem:[%s3301_s30 + $0x20] sm:$0xf] }
  0x65   : > { %1133 = vmatprep.subr.bf16.mxu1 %v2888_v51  ;;  %v2943_v51 = vld [vmem:[%s3978_s1 + $0x420] ss:$8 sps:$4 sm:$0xff]   ;;  %v1175_v52 = vpack.c.bf16 %v1171_v50, %v1167_v48  ;;  %v1166_v48 = vld [vmem:[%s3301_s30 + $0x10] sm:$0xf0] }
  0x66   : > { %v1246_v55 = vrot.slane %v1173_v49, 2  ;;  %v1170_v49 = vld [vmem:[%s3301_s30 + $0x30] sm:$0xf]  ;;  %v3023_v50 = vld [vmem:[%s3978_s1 + $0x4f4] ss:$8 sps:$4 sm:$0xff]  }
  0x67   : > { %1093 = vmatpush1.bf16.msra.mxu0 %v2883_v56  ;;  %v2954_v56 = vld [vmem:[%s3978_s1 + $0x534] ss:$8 sps:$4 sm:$0xff]  }
  0x68   : > { %1134 = vmatpush1.bf16.msra.mxu1 %v2886_v57  ;;  %1094 = vmatprep.subr.bf16.mxu0 %v2891_v58  ;;  %v1248_v57 = vrot.slane %v1175_v52, 2  ;;  %v2949_v58 = vld [vmem:[%s3978_s1 + $0x430] ss:$8 sps:$4 sm:$0xff]  }
  0x69   : > { %1135 = vmatprep.subr.bf16.mxu1 %v2894_v59  ;;  %v2952_v59 = vld [vmem:[%s3978_s1 + $0x530] ss:$8 sps:$4 sm:$0xff]  }
  0x6b   : > { %1095 = vmatpush1.bf16.msra.mxu0 %v2889_v60  ;;  %v2957_v60 = vld [vmem:[%s3978_s1 + $0x444] ss:$8 sps:$4 sm:$0xff]  }
  0x6c   : > { %1136 = vmatpush1.bf16.msra.mxu1 %v2892_v61  ;;  %1096 = vmatprep.subr.bf16.mxu0 %v2897_v62  ;;  %v2960_v61 = vld [vmem:[%s3978_s1 + $0x544] ss:$8 sps:$4 sm:$0xff]   ;;  %v2955_v62 = vld [vmem:[%s3978_s1 + $0x440] ss:$8 sps:$4 sm:$0xff]  }
  0x6d   : > { %1137 = vmatprep.subr.bf16.mxu1 %v2900_v63  ;;  %v2958_v63 = vld [vmem:[%s3978_s1 + $0x540] ss:$8 sps:$4 sm:$0xff]  }
  0x6f   : > { %1097 = vmatpush1.bf16.msra.mxu0 %v2895_v0  ;;  %v2963_v0 = vld [vmem:[%s3978_s1 + $0x454] ss:$8 sps:$4 sm:$0xff]  }
  0x70   : > { %1138 = vmatpush1.bf16.msra.mxu1 %v2898_v1  ;;  %1098 = vmatprep.subr.bf16.mxu0 %v2903_v2  ;;  %v2966_v1 = vld [vmem:[%s3978_s1 + $0x554] ss:$8 sps:$4 sm:$0xff]   ;;  %v2961_v2 = vld [vmem:[%s3978_s1 + $0x450] ss:$8 sps:$4 sm:$0xff]  }
  0x71   : > { %1139 = vmatprep.subr.bf16.mxu1 %v2906_v3  ;;  %v2964_v3 = vld [vmem:[%s3978_s1 + $0x550] ss:$8 sps:$4 sm:$0xff]  }
  0x73   : > { %1099 = vmatpush1.bf16.msra.mxu0 %v2901_v4  ;;  %v2969_v4 = vld [vmem:[%s3978_s1 + $0x464] ss:$8 sps:$4 sm:$0xff]  }
  0x74   : > { %1140 = vmatpush1.bf16.msra.mxu1 %v2904_v5  ;;  %1100 = vmatprep.subr.bf16.mxu0 %v2909_v6  ;;  %v2972_v5 = vld [vmem:[%s3978_s1 + $0x564] ss:$8 sps:$4 sm:$0xff]   ;;  %v2967_v6 = vld [vmem:[%s3978_s1 + $0x460] ss:$8 sps:$4 sm:$0xff]  }
  0x75   : > { %1141 = vmatprep.subr.bf16.mxu1 %v2912_v7  ;;  %v2970_v7 = vld [vmem:[%s3978_s1 + $0x560] ss:$8 sps:$4 sm:$0xff]  }
  0x77   : > { %1101 = vmatpush1.bf16.msra.mxu0 %v2907_v8  ;;  %v2975_v8 = vld [vmem:[%s3978_s1 + $0x474] ss:$8 sps:$4 sm:$0xff]  }
  0x78   : > { %1142 = vmatpush1.bf16.msra.mxu1 %v2910_v9  ;;  %1102 = vmatprep.subr.bf16.mxu0 %v2915_v10  ;;  %v2978_v9 = vld [vmem:[%s3978_s1 + $0x574] ss:$8 sps:$4 sm:$0xff]   ;;  %v2973_v10 = vld [vmem:[%s3978_s1 + $0x470] ss:$8 sps:$4 sm:$0xff]  }
  0x79   : > { %1143 = vmatprep.subr.bf16.mxu1 %v2918_v15  ;;  %v2982_v15 = vld [vmem:[%s3978_s1 + $0x580] ss:$8 sps:$4 sm:$0xff]  }
  0x7b   : > { %1103 = vmatpush1.bf16.msra.mxu0 %v2913_v16  ;;  %v2987_v16 = vld [vmem:[%s3978_s1 + $0x494] ss:$8 sps:$4 sm:$0xff]  }
  0x7c   : > { %1144 = vmatpush1.bf16.msra.mxu1 %v2916_v19  ;;  %1104 = vmatprep.subr.bf16.mxu0 %v2921_v20  ;;  %v2988_v19 = vld [vmem:[%s3978_s1 + $0x590] ss:$8 sps:$4 sm:$0xff]   ;;  %v2993_v20 = vld [vmem:[%s3978_s1 + $0x4a4] ss:$8 sps:$4 sm:$0xff]  }
  0x7d   : > { %1145 = vmatprep.subr.bf16.mxu1 %v2924_v21  ;;  %v2996_v21 = vld [vmem:[%s3978_s1 + $0x5a4] ss:$8 sps:$4 sm:$0xff]  }
  0x7f   : > { %1105 = vmatpush1.bf16.msra.mxu0 %v2919_v22  ;;  %v2991_v22 = vld [vmem:[%s3978_s1 + $0x4a0] ss:$8 sps:$4 sm:$0xff]  }
  0x80   : > { %1146 = vmatpush1.bf16.msra.mxu1 %v2922_v25  ;;  %1106 = vmatprep.subr.bf16.mxu0 %v2927_v26  ;;  %v3002_v25 = vld [vmem:[%s3978_s1 + $0x5b4] ss:$8 sps:$4 sm:$0xff]   ;;  %v2997_v26 = vld [vmem:[%s3978_s1 + $0x4b0] ss:$8 sps:$4 sm:$0xff]  }
  0x81   : > { %1147 = vmatprep.subr.bf16.mxu1 %v2930_v27  ;;  %v3000_v27 = vld [vmem:[%s3978_s1 + $0x5b0] ss:$8 sps:$4 sm:$0xff]  }
  0x83   : > { %1107 = vmatpush1.bf16.msra.mxu0 %v2925_v28  ;;  %v3005_v28 = vld [vmem:[%s3978_s1 + $0x4c4] ss:$8 sps:$4 sm:$0xff]  }
  0x84   : > { %1148 = vmatpush1.bf16.msra.mxu1 %v2928_v33  ;;  %1573 = vmatprep.subr.bf16.mxu0 %v2933_v34  ;;  %v3014_v33 = vld [vmem:[%s3978_s1 + $0x5d4] ss:$8 sps:$4 sm:$0xff]   ;;  %v1662_v34 = vld [vmem:[%s3301_s30 + $0x8] sm:$0xe0] }
  0x85   : > { %1614 = vmatprep.subr.bf16.mxu1 %v2936_v35  ;;  %v1666_v35 = vld [vmem:[%s3301_s30 + $0x28] sm:$0x1f] }
  0x86   : > { %1109 = vmatmul.mubr.bf16.vlgmr.msra.gmra.mrb[4].mxu0 %v730_v36  ;;  %v1664_v36 = vld [vmem:[%s3301_s30 + $0x18] sm:$0xe0] }
  0x87   : > { %1150 = vmatmul.mubr.bf16.vlgmr.msra.gmra.mrb[4].mxu1 %v744_v37  ;;  %1574 = vmatpush1.bf16.msra.mxu0 %v2931_v38  ;;  %v1668_v37 = vld [vmem:[%s3301_s30 + $0x38] sm:$0x1f] }
  0x88   : > { %1615 = vmatpush1.bf16.msra.mxu1 %v2934_v39  ;;  %1575 = vmatprep.subr.bf16.mxu0 %v2939_v40  ;;  %v3009_v38 = vld [vmem:[%s3978_s1 + $0x4d0] ss:$8 sps:$4 sm:$0xff]   ;;  %v3017_v40 = vld [vmem:[%s3978_s1 + $0x4e4] ss:$8 sps:$4 sm:$0xff]  }
  0x89   : > { %1616 = vmatprep.subr.bf16.mxu1 %v2942_v41  ;;  %1605 = vmatprep.mubr.bf16.mxu0 %v1246_v55  ;;  %v3012_v39 = vld [vmem:[%s3978_s1 + $0x5d0] ss:$8 sps:$4 sm:$0xff]   ;;  %v3020_v41 = vld [vmem:[%s3978_s1 + $0x5e4] ss:$8 sps:$4 sm:$0xff]  }
  0x8a   : > { %1646 = vmatprep.mubr.bf16.mxu1 %v1248_v57  ;;  %v1174_v57 = vpack.c.bf16 %v1170_v49, %v1166_v48  ;;  %v3095_v48 = vld [vmem:[%s3978_s1 + $0x6b4] ss:$8 sps:$4 sm:$0xff]  }
  0x8b   : > { %1576 = vmatpush1.bf16.msra.mxu0 %v2937_v42  ;;  %v1670_v42 = vpack.c.bf16 %v1666_v35, %v1662_v34  ;;  %v3069_v34 = vld [vmem:[%s3978_s1 + $0x670] ss:$8 sps:$4 sm:$0xff]   ;;  %v3098_v49 = vld [vmem:[%s3978_s1 + $0x7b4] ss:$8 sps:$4 sm:$0xff]  }
  0x8c   : > { %1617 = vmatpush1.bf16.msra.mxu1 %v2940_v43  ;;  %1577 = vmatprep.subr.bf16.mxu0 %v2945_v44  ;;  %v1672_v43 = vpack.c.bf16 %v1668_v37, %v1664_v36  ;;  %v3015_v44 = vld [vmem:[%s3978_s1 + $0x4e0] ss:$8 sps:$4 sm:$0xff]   ;;  %v3072_v35 = vld [vmem:[%s3978_s1 + $0x770] ss:$8 sps:$4 sm:$0xff]   ;;  %v3077_v36 = vld [vmem:[%s3978_s1 + $0x684] ss:$8 sps:$4 sm:$0xff]  }
  0x8d   : > { %1618 = vmatprep.subr.bf16.mxu1 %v2948_v45  ;;  %v3018_v45 = vld [vmem:[%s3978_s1 + $0x5e0] ss:$8 sps:$4 sm:$0xff]   ;;  %v1747_v52 = vshrl.u32 %v1670_v42, 16  ;;  %v3080_v37 = vld [vmem:[%s3978_s1 + $0x784] ss:$8 sps:$4 sm:$0xff]  }
  0x8e   : > { %v1766_v55 = vshll.u32 %v1672_v43, 16 }
  0x8f   : > { %1578 = vmatpush1.bf16.msra.mxu0 %v2943_v51  ;;  %v3026_v51 = vld [vmem:[%s3978_s1 + $0x5f4] ss:$8 sps:$4 sm:$0xff]  }
  0x90   : > { %1619 = vmatpush1.bf16.msra.mxu1 %v2946_v53  ;;  %1579 = vmatprep.subr.bf16.mxu0 %v2951_v54  ;;  %v1750_v53 = vshll.u32 %v1670_v42, 16  ;;  %v1763_v54 = vshrl.u32 %v1672_v43, 16  ;;  %v3081_v42 = vld [vmem:[%s3978_s1 + $0x690] ss:$8 sps:$4 sm:$0xff]  }
  0x91   : > { %1620 = vmatprep.subr.bf16.mxu1 %v2954_v56  ;;  %v1172_v56 = vpack.c.bf16 %v1168_v47, %v1164_v46  ;;  %v3084_v43 = vld [vmem:[%s3978_s1 + $0x790] ss:$8 sps:$4 sm:$0xff]   ;;  %v3087_v46 = vld [vmem:[%s3978_s1 + $0x6a0] ss:$8 sps:$4 sm:$0xff]  }
  0x92   : > { %v3090_v47 = vld [vmem:[%s3978_s1 + $0x7a0] ss:$8 sps:$4 sm:$0xff]  }
  0x93   : > { %1580 = vmatpush1.bf16.msra.mxu0 %v2949_v58  ;;  %v3021_v58 = vld [vmem:[%s3978_s1 + $0x4f0] ss:$8 sps:$4 sm:$0xff]  }
  0x94   : > { %1621 = vmatpush1.bf16.msra.mxu1 %v2952_v59  ;;  %1581 = vmatprep.subr.bf16.mxu0 %v2957_v60  ;;  %v3024_v59 = vld [vmem:[%s3978_s1 + $0x5f0] ss:$8 sps:$4 sm:$0xff]   ;;  %v3029_v60 = vld [vmem:[%s3978_s1 + $0x604] ss:$8 sps:$4 sm:$0xff]  }
  0x95   : > { %1622 = vmatprep.subr.bf16.mxu1 %v2960_v61  ;;  %v3032_v61 = vld [vmem:[%s3978_s1 + $0x704] ss:$8 sps:$4 sm:$0xff]  }
  0x97   : > { %1582 = vmatpush1.bf16.msra.mxu0 %v2955_v62  ;;  %v1749_v62 = vrot.slane %v1747_v52, 2  ;;  %v3101_v52 = vld [vmem:[%s3978_s1 + $0x6c4] ss:$8 sps:$4 sm:$0xff]  }
  0x98   : > { %1623 = vmatpush1.bf16.msra.mxu1 %v2958_v63  ;;  %1583 = vmatprep.subr.bf16.mxu0 %v2963_v0  ;;  %v1752_v63 = vrot.slane %v1750_v53, 3  ;;  %v1765_v0 = vrot.slane %v1763_v54, 2  ;;  %v3104_v53 = vld [vmem:[%s3978_s1 + $0x7c4] ss:$8 sps:$4 sm:$0xff]   ;;  %v3099_v54 = vld [vmem:[%s3978_s1 + $0x6c0] ss:$8 sps:$4 sm:$0xff]  }
  0x99   : > { %1624 = vmatprep.subr.bf16.mxu1 %v2966_v1  ;;  %v1768_v1 = vrot.slane %v1766_v55, 3  ;;  %v3102_v55 = vld [vmem:[%s3978_s1 + $0x7c0] ss:$8 sps:$4 sm:$0xff]  }
  0x9b   : > { %1584 = vmatpush1.bf16.msra.mxu0 %v2961_v2  ;;  %v1245_v2 = vrot.slane %v1172_v56, 2  ;;  %v1661_v56 = vld [vmem:[%s3301_s30] sm:$0xe0] }
  0x9c   : > { %1625 = vmatpush1.bf16.msra.mxu1 %v2964_v3  ;;  %1585 = vmatprep.subr.bf16.mxu0 %v2969_v4  ;;  %v1247_v3 = vrot.slane %v1174_v57, 2  ;;  %v3027_v4 = vld [vmem:[%s3978_s1 + $0x600] ss:$8 sps:$4 sm:$0xff]  }
  0x9d   : > { %1626 = vmatprep.subr.bf16.mxu1 %v2972_v5  ;;  %v3030_v5 = vld [vmem:[%s3978_s1 + $0x700] ss:$8 sps:$4 sm:$0xff]  }
  0x9e   : > { %v1665_v57 = vld [vmem:[%s3301_s30 + $0x20] sm:$0x1f] }
  0x9f   : > { %1586 = vmatpush1.bf16.msra.mxu0 %v2967_v6  ;;  %v3035_v6 = vld [vmem:[%s3978_s1 + $0x614] ss:$8 sps:$4 sm:$0xff]  }
  0xa0   : > { %1627 = vmatpush1.bf16.msra.mxu1 %v2970_v7  ;;  %1587 = vmatprep.subr.bf16.mxu0 %v2975_v8  ;;  %v3038_v7 = vld [vmem:[%s3978_s1 + $0x714] ss:$8 sps:$4 sm:$0xff]   ;;  %v1753_v8 = vor.u32 %v1752_v63, %v1749_v62  ;;  %v1669_v62 = vpack.c.bf16 %v1665_v57, %v1661_v56  ;;  %v2184_v57 = vld [vmem:[%s3979_s2] sm:$0x3] }
  0xa1   : > { %1628 = vmatprep.subr.bf16.mxu1 %v2978_v9  ;;  %v1769_v9 = vor.u32 %v1768_v1, %v1765_v0  ;;  %v3105_v0 = vld [vmem:[%s3978_s1 + $0x6d0] ss:$8 sps:$4 sm:$0xff]  }
  0xa2   : > { %v3108_v1 = vld [vmem:[%s3978_s1 + $0x7d0] ss:$8 sps:$4 sm:$0xff]  }
  0xa3   : > { %1588 = vmatpush1.bf16.msra.mxu0 %v2973_v10  ;;  %v3033_v10 = vld [vmem:[%s3978_s1 + $0x610] ss:$8 sps:$4 sm:$0xff]  }
  0xa4   : > { %1629 = vmatpush1.bf16.msra.mxu1 %v2976_v11  ;;  %1589 = vmatprep.subr.bf16.mxu0 %v2981_v12  ;;  %v3036_v11 = vld [vmem:[%s3978_s1 + $0x710] ss:$8 sps:$4 sm:$0xff]   ;;  %v3041_v12 = vld [vmem:[%s3978_s1 + $0x624] ss:$8 sps:$4 sm:$0xff]  }
  0xa5   : > { %1630 = vmatprep.subr.bf16.mxu1 %v2984_v13  ;;  %v3044_v13 = vld [vmem:[%s3978_s1 + $0x724] ss:$8 sps:$4 sm:$0xff]  }
  0xa7   : > { %1590 = vmatpush1.bf16.msra.mxu0 %v2979_v14  ;;  %v3039_v14 = vld [vmem:[%s3978_s1 + $0x620] ss:$8 sps:$4 sm:$0xff]  }
  0xa8   : > { %1631 = vmatpush1.bf16.msra.mxu1 %v2982_v15  ;;  %1591 = vmatprep.subr.bf16.mxu0 %v2987_v16  ;;  %v3042_v15 = vld [vmem:[%s3978_s1 + $0x720] ss:$8 sps:$4 sm:$0xff]   ;;  %v3047_v16 = vld [vmem:[%s3978_s1 + $0x634] ss:$8 sps:$4 sm:$0xff]  }
  0xa9   : > { %1632 = vmatprep.subr.bf16.mxu1 %v2990_v17  ;;  %v3050_v17 = vld [vmem:[%s3978_s1 + $0x734] ss:$8 sps:$4 sm:$0xff]  }
  0xab   : > { %1592 = vmatpush1.bf16.msra.mxu0 %v2985_v18  ;;  %v3045_v18 = vld [vmem:[%s3978_s1 + $0x630] ss:$8 sps:$4 sm:$0xff]  }
  0xac   : > { %1633 = vmatpush1.bf16.msra.mxu1 %v2988_v19  ;;  %1593 = vmatprep.subr.bf16.mxu0 %v2993_v20  ;;  %v3048_v19 = vld [vmem:[%s3978_s1 + $0x730] ss:$8 sps:$4 sm:$0xff]   ;;  %v3053_v20 = vld [vmem:[%s3978_s1 + $0x644] ss:$8 sps:$4 sm:$0xff]  }
  0xad   : > { %1634 = vmatprep.subr.bf16.mxu1 %v2996_v21  ;;  %v3056_v21 = vld [vmem:[%s3978_s1 + $0x744] ss:$8 sps:$4 sm:$0xff]  }
  0xaf   : > { %1594 = vmatpush1.bf16.msra.mxu0 %v2991_v22  ;;  %v3051_v22 = vld [vmem:[%s3978_s1 + $0x640] ss:$8 sps:$4 sm:$0xff]  }
  0xb0   : > { %1635 = vmatpush1.bf16.msra.mxu1 %v2994_v23  ;;  %1595 = vmatprep.subr.bf16.mxu0 %v2999_v24  ;;  %v3054_v23 = vld [vmem:[%s3978_s1 + $0x740] ss:$8 sps:$4 sm:$0xff]   ;;  %v3059_v24 = vld [vmem:[%s3978_s1 + $0x654] ss:$8 sps:$4 sm:$0xff]  }
  0xb1   : > { %1636 = vmatprep.subr.bf16.mxu1 %v3002_v25  ;;  %v3062_v25 = vld [vmem:[%s3978_s1 + $0x754] ss:$8 sps:$4 sm:$0xff]  }
  0xb3   : > { %1596 = vmatpush1.bf16.msra.mxu0 %v2997_v26  ;;  %v3057_v26 = vld [vmem:[%s3978_s1 + $0x650] ss:$8 sps:$4 sm:$0xff]  }
  0xb4   : > { %1637 = vmatpush1.bf16.msra.mxu1 %v3000_v27  ;;  %1597 = vmatprep.subr.bf16.mxu0 %v3005_v28  ;;  %v3060_v27 = vld [vmem:[%s3978_s1 + $0x750] ss:$8 sps:$4 sm:$0xff]   ;;  %v3065_v28 = vld [vmem:[%s3978_s1 + $0x664] ss:$8 sps:$4 sm:$0xff]  }
  0xb5   : > { %1638 = vmatprep.subr.bf16.mxu1 %v3008_v29  ;;  %v3068_v29 = vld [vmem:[%s3978_s1 + $0x764] ss:$8 sps:$4 sm:$0xff]  }
  0xb7   : > { %1598 = vmatpush1.bf16.msra.mxu0 %v3003_v30  ;;  %v3063_v30 = vld [vmem:[%s3978_s1 + $0x660] ss:$8 sps:$4 sm:$0xff]  }
  0xb8   : > { %1639 = vmatpush1.bf16.msra.mxu1 %v3006_v31  ;;  %1599 = vmatprep.subr.bf16.mxu0 %v3011_v32  ;;  %v3066_v31 = vld [vmem:[%s3978_s1 + $0x760] ss:$8 sps:$4 sm:$0xff]   ;;  %v3071_v32 = vld [vmem:[%s3978_s1 + $0x674] ss:$8 sps:$4 sm:$0xff]  }
  0xb9   : > { %1640 = vmatprep.subr.bf16.mxu1 %v3014_v33  ;;  %v3074_v33 = vld [vmem:[%s3978_s1 + $0x774] ss:$8 sps:$4 sm:$0xff]  }
  0xbb   : > { %1600 = vmatpush1.bf16.msra.mxu0 %v3009_v38  ;;  %v3075_v38 = vld [vmem:[%s3978_s1 + $0x680] ss:$8 sps:$4 sm:$0xff]  }
  0xbc   : > { %1641 = vmatpush1.bf16.msra.mxu1 %v3012_v39  ;;  %1601 = vmatprep.subr.bf16.mxu0 %v3017_v40  ;;  %v3078_v39 = vld [vmem:[%s3978_s1 + $0x780] ss:$8 sps:$4 sm:$0xff]   ;;  %v3083_v40 = vld [vmem:[%s3978_s1 + $0x694] ss:$8 sps:$4 sm:$0xff]  }
  0xbd   : > { %1642 = vmatprep.subr.bf16.mxu1 %v3020_v41  ;;  %v3086_v41 = vld [vmem:[%s3978_s1 + $0x794] ss:$8 sps:$4 sm:$0xff]  }
  0xbf   : > { %1602 = vmatpush1.bf16.msra.mxu0 %v3015_v44  ;;  %v3089_v44 = vld [vmem:[%s3978_s1 + $0x6a4] ss:$8 sps:$4 sm:$0xff]  }
  0xc0   : > { %1643 = vmatpush1.bf16.msra.mxu1 %v3018_v45  ;;  %1603 = vmatprep.subr.bf16.mxu0 %v3023_v50  ;;  %v3092_v45 = vld [vmem:[%s3978_s1 + $0x7a4] ss:$8 sps:$4 sm:$0xff]   ;;  %v3093_v50 = vld [vmem:[%s3978_s1 + $0x6b0] ss:$8 sps:$4 sm:$0xff]  }
  0xc1   : > { %1644 = vmatprep.subr.bf16.mxu1 %v3026_v51  ;;  %v3096_v51 = vld [vmem:[%s3978_s1 + $0x7b0] ss:$8 sps:$4 sm:$0xff]  }
  0xc3   : > { %1604 = vmatpush1.bf16.msra.mxu0 %v3021_v58  ;;  %v1663_v58 = vld [vmem:[%s3301_s30 + $0x10] sm:$0xe0] }
  0xc4   : > { %1645 = vmatpush1.bf16.msra.mxu1 %v3024_v59  ;;  %2094 = vmatprep.subr.bf16.mxu0 %v3029_v60  ;;  %v1667_v59 = vld [vmem:[%s3301_s30 + $0x30] sm:$0x1f] }
  0xc5   : > { %2135 = vmatprep.subr.bf16.mxu1 %v3032_v61  ;;  %v3107_v60 = vld [vmem:[%s3978_s1 + $0x6d4] ss:$8 sps:$4 sm:$0xff]   ;;  %v1671_v63 = vpack.c.bf16 %v1667_v59, %v1663_v58 }
  0xc6   : > { %1606 = vmatmul.mubr.bf16.vlgmr.msra.gmra.mrb[8].mxu0 %v1245_v2  ;;  %v3110_v61 = vld [vmem:[%s3978_s1 + $0x7d4] ss:$8 sps:$4 sm:$0xff]   ;;  %v3113_v2 = vld [vmem:[%s3978_s1 + $0x6e4] ss:$8 sps:$4 sm:$0xff]  }
  0xc7   : > { %1647 = vmatmul.mubr.bf16.vlgmr.msra.gmra.mrb[8].mxu1 %v1247_v3  ;;  %2095 = vmatpush1.bf16.msra.mxu0 %v3027_v4  ;;  %v3116_v3 = vld [vmem:[%s3978_s1 + $0x7e4] ss:$8 sps:$4 sm:$0xff]   ;;  %v1739_v4 = vshrl.u32 %v1669_v62, 16 }
  0xc8   : > { %2136 = vmatpush1.bf16.msra.mxu1 %v3030_v5  ;;  %2096 = vmatprep.subr.bf16.mxu0 %v3035_v6  ;;  %v1742_v5 = vshll.u32 %v1669_v62, 16  ;;  %v1755_v6 = vshrl.u32 %v1671_v63, 16 }
  0xc9   : > { %2137 = vmatprep.subr.bf16.mxu1 %v3038_v7  ;;  %2126 = vmatprep.mubr.bf16.mxu0 %v1753_v8  ;;  %v1758_v7 = vshll.u32 %v1671_v63, 16  ;;  %v3111_v8 = vld [vmem:[%s3978_s1 + $0x6e0] ss:$8 sps:$4 sm:$0xff]  }
  0xca   : > { %2167 = vmatprep.mubr.bf16.mxu1 %v1769_v9  ;;  %v3114_v9 = vld [vmem:[%s3978_s1 + $0x7e0] ss:$8 sps:$4 sm:$0xff]  }
  0xcb   : > { %2097 = vmatpush1.bf16.msra.mxu0 %v3033_v10  ;;  %v3119_v10 = vld [vmem:[%s3978_s1 + $0x6f4] ss:$8 sps:$4 sm:$0xff]  }
  0xcc   : > { %2138 = vmatpush1.bf16.msra.mxu1 %v3036_v11  ;;  %2098 = vmatprep.subr.bf16.mxu0 %v3041_v12  ;;  %v3122_v11 = vld [vmem:[%s3978_s1 + $0x7f4] ss:$8 sps:$4 sm:$0xff]   ;;  %v1741_v12 = vrot.slane %v1739_v4, 2 }
  0xcd   : > { %2139 = vmatprep.subr.bf16.mxu1 %v3044_v13  ;;  %v1744_v13 = vrot.slane %v1742_v5, 3 }
  0xcf   : > { %2099 = vmatpush1.bf16.msra.mxu0 %v3039_v14  ;;  %v1757_v14 = vrot.slane %v1755_v6, 2 }
  0xd0   : > { %2140 = vmatpush1.bf16.msra.mxu1 %v3042_v15  ;;  %2100 = vmatprep.subr.bf16.mxu0 %v3047_v16  ;;  %v1760_v15 = vrot.slane %v1758_v7, 3  ;;  %v3117_v16 = vld [vmem:[%s3978_s1 + $0x6f0] ss:$8 sps:$4 sm:$0xff]  }
  0xd1   : > { %2141 = vmatprep.subr.bf16.mxu1 %v3050_v17  ;;  %v3120_v17 = vld [vmem:[%s3978_s1 + $0x7f0] ss:$8 sps:$4 sm:$0xff]  }
  0xd3   : > { %2101 = vmatpush1.bf16.msra.mxu0 %v3045_v18  ;;  %v1745_v18 = vor.u32 %v1744_v13, %v1741_v12 }
  0xd4   : > { %2142 = vmatpush1.bf16.msra.mxu1 %v3048_v19  ;;  %2102 = vmatprep.subr.bf16.mxu0 %v3053_v20  ;;  %v1761_v19 = vor.u32 %v1760_v15, %v1757_v14 }
  0xd5   : > { %2143 = vmatprep.subr.bf16.mxu1 %v3056_v21 }
  0xd7   : > { %2103 = vmatpush1.bf16.msra.mxu0 %v3051_v22 }
  0xd8   : > { %2144 = vmatpush1.bf16.msra.mxu1 %v3054_v23  ;;  %2104 = vmatprep.subr.bf16.mxu0 %v3059_v24 }
  0xd9   : > { %2145 = vmatprep.subr.bf16.mxu1 %v3062_v25 }
  0xdb   : > { %2105 = vmatpush1.bf16.msra.mxu0 %v3057_v26 }
  0xdc   : > { %2146 = vmatpush1.bf16.msra.mxu1 %v3060_v27  ;;  %2106 = vmatprep.subr.bf16.mxu0 %v3065_v28 }
  0xdd   : > { %2147 = vmatprep.subr.bf16.mxu1 %v3068_v29 }
  0xdf   : > { %2107 = vmatpush1.bf16.msra.mxu0 %v3063_v30 }
  0xe0   : > { %2148 = vmatpush1.bf16.msra.mxu1 %v3066_v31  ;;  %2108 = vmatprep.subr.bf16.mxu0 %v3071_v32 }
  0xe1   : > { %2149 = vmatprep.subr.bf16.mxu1 %v3074_v33 }
  0xe3   : > { %2109 = vmatpush1.bf16.msra.mxu0 %v3069_v34 }
  0xe4   : > { %2150 = vmatpush1.bf16.msra.mxu1 %v3072_v35  ;;  %2110 = vmatprep.subr.bf16.mxu0 %v3077_v36 }
  0xe5   : > { %2151 = vmatprep.subr.bf16.mxu1 %v3080_v37 }
  0xe7   : > { %2111 = vmatpush1.bf16.msra.mxu0 %v3075_v38 }
  0xe8   : > { %2152 = vmatpush1.bf16.msra.mxu1 %v3078_v39  ;;  %2112 = vmatprep.subr.bf16.mxu0 %v3083_v40 }
  0xe9   : > { %2153 = vmatprep.subr.bf16.mxu1 %v3086_v41 }
  0xeb   : > { %2113 = vmatpush1.bf16.msra.mxu0 %v3081_v42 }
  0xec   : > { %2154 = vmatpush1.bf16.msra.mxu1 %v3084_v43  ;;  %2114 = vmatprep.subr.bf16.mxu0 %v3089_v44 }
  0xed   : > { %2155 = vmatprep.subr.bf16.mxu1 %v3092_v45 }
  0xef   : > { %2115 = vmatpush1.bf16.msra.mxu0 %v3087_v46 }
  0xf0   : > { %2156 = vmatpush1.bf16.msra.mxu1 %v3090_v47  ;;  %2116 = vmatprep.subr.bf16.mxu0 %v3095_v48 }
  0xf1   : > { %2157 = vmatprep.subr.bf16.mxu1 %v3098_v49 }
  0xf3   : > { %2117 = vmatpush1.bf16.msra.mxu0 %v3093_v50 }
  0xf4   : > { %2158 = vmatpush1.bf16.msra.mxu1 %v3096_v51  ;;  %2118 = vmatprep.subr.bf16.mxu0 %v3101_v52 }
  0xf5   : > { %2159 = vmatprep.subr.bf16.mxu1 %v3104_v53 }
  0xf7   : > { %2119 = vmatpush1.bf16.msra.mxu0 %v3099_v54  ;;  %v2186_v54 = vlaneseq }
  0xf8   : > { %2160 = vmatpush1.bf16.msra.mxu1 %v3102_v55  ;;  %2120 = vmatprep.subr.bf16.mxu0 %v3107_v60 }
  0xf9   : > { %2161 = vmatprep.subr.bf16.mxu1 %v3110_v61  ;;  %v2187_v55 = vshrl.u32 %v2186_v54, 7 }
  0xfb   : > { %2121 = vmatpush1.bf16.msra.mxu0 %v3105_v0  ;;  %v2188_v56 = vsub.s32 0, %v2187_v55  ;;  %v2192_v58 = vsub.s32 1, %v2187_v55 }
  0xfc   : > { %2162 = vmatpush1.bf16.msra.mxu1 %v3108_v1  ;;  %2122 = vmatprep.subr.bf16.mxu0 %v3113_v2 }
  0xfd   : > { %2163 = vmatprep.subr.bf16.mxu1 %v3116_v3  ;;  %v2189_v62 = vrot.slane %v2184_v57, %v2188_v56  ;;  %v2193_v2 = vrot.slane %v2184_v57, %v2192_v58 }
  0xff   : > { %2123 = vmatpush1.bf16.msra.mxu0 %v3111_v8 }
 0x100   : > { %2164 = vmatpush1.bf16.msra.mxu1 %v3114_v9  ;;  %2124 = vmatprep.subr.bf16.mxu0 %v3119_v10 }
 0x101   : > { %2165 = vmatprep.subr.bf16.mxu1 %v3122_v11 }
 0x103   : > { %2125 = vmatpush1.bf16.msra.mxu0 %v3117_v16 }
 0x104   : > { %2166 = vmatpush1.bf16.msra.mxu1 %v3120_v17 }
 0x106   : > { %2127 = vmatmul.mubr.bf16.vlgmr.msra.gmra.mrb[12].mxu0 %v1745_v18 }
 0x107   : > { %2168 = vmatmul.mubr.bf16.vlgmr.msra.gmra.mrb[12].mxu1 %v1761_v19 }
 0x119   : > { %v597_v20 = vpop.f32.mrb[0].mxu0 }
 0x11a   : > { %v638_v21 = vpop.f32.mrb[0].mxu1  ;;  %v599_v23 = vpop.f32.mrb[1].mxu0 }
 0x11b   : > { %v639_v22 = vadd.f32 %v638_v21, %v597_v20  ;;  %v640_v24 = vpop.f32.mrb[1].mxu1  ;;  %v601_v26 = vpop.f32.mrb[2].mxu0 }
 0x11c   : > { %v641_v25 = vadd.f32 %v640_v24, %v599_v23  ;;  %v642_v27 = vpop.f32.mrb[2].mxu1  ;;  %v602_v28 = vpop.f32.mrb[3].mxu0 }
 0x11d   : > { %v643_v29 = vpop.f32.mrb[3].mxu1 }
 0x159   : > { %v1110_v30 = vpop.f32.mrb[4].mxu0 }
 0x15a   : > { %v1151_v31 = vpop.f32.mrb[4].mxu1  ;;  %v1112_v33 = vpop.f32.mrb[5].mxu0 }
 0x15b   : > { %v1152_v32 = vadd.f32 %v1151_v31, %v1110_v30  ;;  %v1153_v34 = vpop.f32.mrb[5].mxu1  ;;  %v1114_v36 = vpop.f32.mrb[6].mxu0 }
 0x15c   : > { %v1154_v35 = vadd.f32 %v1153_v34, %v1112_v33  ;;  %v1155_v37 = vpop.f32.mrb[6].mxu1  ;;  %v1115_v39 = vpop.f32.mrb[7].mxu0 }
 0x15d   : > { %v1160_v38 = vadd.f32 %v1152_v32, %v639_v22  ;;  %v1156_v40 = vpop.f32.mrb[7].mxu1 }
 0x15e   : > { %v1161_v41 = vadd.f32 %v1154_v35, %v641_v25 }
 0x199   : > { %v1607_v42 = vpop.f32.mrb[8].mxu0 }
 0x19a   : > { %v1648_v43 = vpop.f32.mrb[8].mxu1  ;;  %v1609_v45 = vpop.f32.mrb[9].mxu0 }
 0x19b   : > { %v1649_v44 = vadd.f32 %v1648_v43, %v1607_v42  ;;  %v1650_v46 = vpop.f32.mrb[9].mxu1  ;;  %v1611_v48 = vpop.f32.mrb[10].mxu0 }
 0x19c   : > { %v1651_v47 = vadd.f32 %v1650_v46, %v1609_v45  ;;  %v1652_v49 = vpop.f32.mrb[10].mxu1  ;;  %v1612_v51 = vpop.f32.mrb[11].mxu0 }
 0x19d   : > { %v1657_v50 = vadd.f32 %v1649_v44, %v1160_v38  ;;  %v1653_v52 = vpop.f32.mrb[11].mxu1 }
 0x19e   : > { %v1658_v53 = vadd.f32 %v1651_v47, %v1161_v41 }
 0x1d9   : > { %v2128_v59 = vpop.f32.mrb[12].mxu0 }
 0x1da   : > { %v2169_v60 = vpop.f32.mrb[12].mxu1  ;;  %v2130_v63 = vpop.f32.mrb[13].mxu0 }
 0x1db   : > { %v2170_v61 = vadd.f32 %v2169_v60, %v2128_v59  ;;  %v2171_v0 = vpop.f32.mrb[13].mxu1  ;;  %v2132_v3 = vpop.f32.mrb[14].mxu0 }
 0x1dc   : > { %v2172_v1 = vadd.f32 %v2171_v0, %v2130_v63  ;;  %v2173_v4 = vpop.f32.mrb[14].mxu1  ;;  %v2133_v6 = vpop.f32.mrb[15].mxu0 }
 0x1dd   : > { %v2178_v5 = vadd.f32 %v2170_v61, %v1657_v50  ;;  %v2174_v7 = vpop.f32.mrb[15].mxu1 }
 0x1de   : > { %v2179_v8 = vadd.f32 %v2172_v1, %v1658_v53 }
 0x1df   : > { %v2196_v9 = vadd.f32 %v2189_v62, %v2178_v5 }
 0x1e0   : > { %v2197_v10 = vadd.f32 %v2193_v2, %v2179_v8 }
 0x1e1   : > { %vm2198_vm0 = vcmp.ge.f32.partialorder %v2196_v9, 0.0  ;;  %v2200_v11 = vmul.f32 0.01, %v2196_v9 }
 0x1e2   : > { %vm2199_vm1 = vcmp.ge.f32.partialorder %v2197_v10, 0.0  ;;  %v2201_v12 = vmul.f32 0.01, %v2197_v10 }
 0x1e3   : > { %v2202_v13 = vsel %vm2198_vm0, %v2196_v9, %v2200_v11 }
 0x1e4   : > { %v2203_v14 = vsel %vm2199_vm1, %v2197_v10, %v2201_v12 }
 0x1e5   : > { %v2730_v15 = vpack.c.bf16 %v2203_v14, %v2202_v13 }
 0x1e7   : > { %2212 = vst [vmem:[%s170_s26] sm:$0xff] %v2730_v15 }
 0x1e8 PF: > { %s13_s12 = sadd.s32 1, %s3129_s12  }
 0x1e9   : > { %p10_p4 = scmp.ge.s32.totalorder %s13_s12, 4  }
 0x1eb   :  { %12 = sbr.rel (!%p10_p4) target bundleno = 1 (0x1), region = 65 }

// kernel: bc_visual_policy_forward.7
= control target key start
LH: loop header
LB: loop body
LE: loop exit
PB: predicated region body
PF: predicated region fallthrough
CT: control target
= control target key end

     0   :  { %v2213_v7 = vmov 1966171168   ;;  %v186_v9 = vlaneseq  ;;  %s2906_s0 = inlined_call_operand.vmem [shape: bf16[2,1152], index: 0, kind: input, shape index: {}]   ;;  %s2907_s1 = inlined_call_operand.vmem [shape: bf16[1152,256], index: 1, kind: input, shape index: {}]   ;;  %s2908_s2 = inlined_call_operand.vmem [shape: f32[1,256], index: 2, kind: input, shape index: {}]   ;;  %s2909_s3 = inlined_call_operand.vmem [shape: bf16[256,256], index: 3, kind: input, shape index: {}]   ;;  %s2910_s4 = inlined_call_operand.vmem [shape: f32[1,256], index: 4, kind: input, shape index: {}]   ;;  %s2911_s5 = inlined_call_operand.vmem [shape: bf16[256,128], index: 5, kind: input, shape index: {}]   ;;  %s2912_s6 = inlined_call_operand.vmem [shape: f32[1,128], index: 6, kind: input, shape index: {}]   ;;  %s2913_s7 = inlined_call_operand.hbm [shape: f32[2,128], index: 7, kind: output, shape index: {}]  }
   0x1   :  { %v1908_v0 = vld [vmem:[%s2907_s1 + $0x104] ss:$8 sps:$4 sm:$0xff]   ;;  %v1910_v1 = vld [vmem:[%s2907_s1 + $0x100] ss:$8 sps:$4 sm:$0xff]   ;;  %v1911_v2 = vld [vmem:[%s2907_s1 + $0x114] ss:$8 sps:$4 sm:$0xff]   ;;  %v184_v8 = vunpack.c.l.s4 %v2213_v7 }
   0x2   :  { %1015 = vmatprep.subr.bf16.mxu0 %v1908_v0  ;;  %v1913_v3 = vld [vmem:[%s2907_s1 + $0x110] ss:$8 sps:$4 sm:$0xff]   ;;  %v1914_v4 = vld [vmem:[%s2907_s1 + $0x124] ss:$8 sps:$4 sm:$0xff]   ;;  %v1916_v5 = vld [vmem:[%s2907_s1 + $0x120] ss:$8 sps:$4 sm:$0xff]  }
   0x3   :  { %1016 = vmatpush1.bf16.msra.mxu0 %v1910_v1  ;;  %v1917_v6 = vld [vmem:[%s2907_s1 + $0x134] ss:$8 sps:$4 sm:$0xff]   ;;  %v1919_v10 = vld [vmem:[%s2907_s1 + $0x130] ss:$8 sps:$4 sm:$0xff]   ;;  %v1920_v11 = vld [vmem:[%s2907_s1 + $0x144] ss:$8 sps:$4 sm:$0xff]   ;;  %v185_v12 = vunpack.c.0.s8 %v184_v8 }
   0x4   :  { %1017 = vmatprep.subr.bf16.mxu0 %v1911_v2  ;;  %v2285_v13 = vshrl.u32 %v186_v9, 7  ;;  %v1922_v14 = vld [vmem:[%s2907_s1 + $0x140] ss:$8 sps:$4 sm:$0xff]   ;;  %v1923_v15 = vld [vmem:[%s2907_s1 + $0x154] ss:$8 sps:$4 sm:$0xff]  }
   0x5   :  { %v1925_v17 = vld [vmem:[%s2907_s1 + $0x150] ss:$8 sps:$4 sm:$0xff]   ;;  %v1926_v18 = vld [vmem:[%s2907_s1 + $0x164] ss:$8 sps:$4 sm:$0xff]   ;;  %v1928_v21 = vld [vmem:[%s2907_s1 + $0x160] ss:$8 sps:$4 sm:$0xff]  }
   0x6   :  { %v2294_v16 = vsub.s32 %v185_v12, %v2285_v13  ;;  %v2305_v19 = vld [vmem:[%s2906_s0] sm:$0xff]  ;;  %v1929_v22 = vld [vmem:[%s2907_s1 + $0x174] ss:$8 sps:$4 sm:$0xff]   ;;  %v1931_v25 = vld [vmem:[%s2907_s1 + $0x170] ss:$8 sps:$4 sm:$0xff]  }
   0x7   :  { %1018 = vmatpush1.bf16.msra.mxu0 %v1913_v3  ;;  %v1932_v26 = vld [vmem:[%s2907_s1 + $0x184] ss:$8 sps:$4 sm:$0xff]   ;;  %v1934_v28 = vld [vmem:[%s2907_s1 + $0x180] ss:$8 sps:$4 sm:$0xff]   ;;  %v1935_v29 = vld [vmem:[%s2907_s1 + $0x194] ss:$8 sps:$4 sm:$0xff]   ;;  %v182_v51 = vcombine.high %v2305_v19, %v2305_v19 }
   0x8   :  { %1019 = vmatprep.subr.bf16.mxu0 %v1914_v4  ;;  %v2309_v20 = vrot.slane %v2305_v19, %v2294_v16  ;;  %v1981_v30 = vld [vmem:[%s2907_s1 + $0x4] ss:$8 sps:$4 sm:$0xff]   ;;  %v1983_v31 = vld [vmem:[%s2907_s1] ss:$8 sps:$4 sm:$0xff]   ;;  %v1937_v32 = vld [vmem:[%s2907_s1 + $0x190] ss:$8 sps:$4 sm:$0xff]  }
   0x9   :  { %v1938_v33 = vld [vmem:[%s2907_s1 + $0x1a4] ss:$8 sps:$4 sm:$0xff]   ;;  %974 = vmatprep.subr.bf16.mxu1 %v1981_v30  ;;  %v1987_v34 = vld [vmem:[%s2907_s1 + $0x14] ss:$8 sps:$4 sm:$0xff]   ;;  %v1989_v35 = vld [vmem:[%s2907_s1 + $0x10] ss:$8 sps:$4 sm:$0xff]   ;;  %v2410_v56 = vrot.slane %v182_v51, %v2294_v16 }
   0xa   :  { %v197_v23 = vcombine.high %v2309_v20, %v2309_v20  ;;  %975 = vmatpush1.bf16.msra.mxu1 %v1983_v31  ;;  %v1940_v36 = vld [vmem:[%s2907_s1 + $0x1a0] ss:$8 sps:$4 sm:$0xff]   ;;  %v1993_v37 = vld [vmem:[%s2907_s1 + $0x24] ss:$8 sps:$4 sm:$0xff]   ;;  %v1941_v38 = vld [vmem:[%s2907_s1 + $0x1b4] ss:$8 sps:$4 sm:$0xff]   ;;  %v2423_v60 = vrot.slane %v2309_v20, %v2294_v16 }
   0xb   :  { %1020 = vmatpush1.bf16.msra.mxu0 %v1916_v5  ;;  %976 = vmatprep.subr.bf16.mxu1 %v1987_v34  ;;  %v1995_v39 = vld [vmem:[%s2907_s1 + $0x20] ss:$8 sps:$4 sm:$0xff]   ;;  %v1999_v40 = vld [vmem:[%s2907_s1 + $0x34] ss:$8 sps:$4 sm:$0xff]   ;;  %v1943_v41 = vld [vmem:[%s2907_s1 + $0x1b0] ss:$8 sps:$4 sm:$0xff]   ;;  %v198_v62 = vcombine.high %v2410_v56, %v2410_v56 }
   0xc   :  { %1021 = vmatprep.subr.bf16.mxu0 %v1917_v6  ;;  %v219_v24 = vrot.slane %v197_v23, %v2294_v16  ;;  %v1944_v42 = vld [vmem:[%s2907_s1 + $0x1c4] ss:$8 sps:$4 sm:$0xff]   ;;  %v2001_v43 = vld [vmem:[%s2907_s1 + $0x30] ss:$8 sps:$4 sm:$0xff]   ;;  %v1946_v45 = vld [vmem:[%s2907_s1 + $0x1c0] ss:$8 sps:$4 sm:$0xff]   ;;  %v227_v2 = vcombine.high %v2423_v60, %v2423_v60 }
   0xd   :  { %v2005_v44 = vld [vmem:[%s2907_s1 + $0x44] ss:$8 sps:$4 sm:$0xff]   ;;  %v1947_v46 = vld [vmem:[%s2907_s1 + $0x1d4] ss:$8 sps:$4 sm:$0xff]   ;;  %v2007_v47 = vld [vmem:[%s2907_s1 + $0x40] ss:$8 sps:$4 sm:$0xff]   ;;  %v2445_v4 = vrot.slane %v198_v62, %v2294_v16 }
   0xe   :  { %v229_v27 = vcombine.high %v219_v24, %v219_v24  ;;  %1006 = vmatprep.mubr.bf16.mxu1 %v219_v24  ;;  %977 = vmatpush1.bf16.msra.mxu1 %v1989_v35  ;;  %v2011_v48 = vld [vmem:[%s2907_s1 + $0x54] ss:$8 sps:$4 sm:$0xff]   ;;  %v1949_v49 = vld [vmem:[%s2907_s1 + $0x1d0] ss:$8 sps:$4 sm:$0xff]   ;;  %v1950_v50 = vld [vmem:[%s2907_s1 + $0x1e4] ss:$8 sps:$4 sm:$0xff]  }
   0xf   :  { %1022 = vmatpush1.bf16.msra.mxu0 %v1919_v10  ;;  %978 = vmatprep.subr.bf16.mxu1 %v1993_v37  ;;  %v2013_v52 = vld [vmem:[%s2907_s1 + $0x50] ss:$8 sps:$4 sm:$0xff]   ;;  %v2017_v53 = vld [vmem:[%s2907_s1 + $0x64] ss:$8 sps:$4 sm:$0xff]   ;;  %v1952_v54 = vld [vmem:[%s2907_s1 + $0x1e0] ss:$8 sps:$4 sm:$0xff]  }
  0x10   :  { %1023 = vmatprep.subr.bf16.mxu0 %v1920_v11  ;;  %1047 = vmatprep.mubr.bf16.mxu0 %v229_v27  ;;  %v1953_v55 = vld [vmem:[%s2907_s1 + $0x1f4] ss:$8 sps:$4 sm:$0xff]   ;;  %v2019_v57 = vld [vmem:[%s2907_s1 + $0x60] ss:$8 sps:$4 sm:$0xff]   ;;  %v1955_v59 = vld [vmem:[%s2907_s1 + $0x1f0] ss:$8 sps:$4 sm:$0xff]  }
  0x11   :  { %v2023_v58 = vld [vmem:[%s2907_s1 + $0x74] ss:$8 sps:$4 sm:$0xff]   ;;  %v1959_v61 = vld [vmem:[%s2907_s1 + $0x204] ss:$8 sps:$4 sm:$0xff]   ;;  %v2025_v63 = vld [vmem:[%s2907_s1 + $0x70] ss:$8 sps:$4 sm:$0xff]  }
  0x12   :  { %979 = vmatpush1.bf16.msra.mxu1 %v1995_v39  ;;  %v2029_v0 = vld [vmem:[%s2907_s1 + $0x84] ss:$8 sps:$4 sm:$0xff]   ;;  %v1957_v1 = vld [vmem:[%s2907_s1 + $0x200] ss:$8 sps:$4 sm:$0xff]   ;;  %v1962_v3 = vld [vmem:[%s2907_s1 + $0x214] ss:$8 sps:$4 sm:$0xff]  }
  0x13   :  { %1024 = vmatpush1.bf16.msra.mxu0 %v1922_v14  ;;  %980 = vmatprep.subr.bf16.mxu1 %v1999_v40  ;;  %v2031_v5 = vld [vmem:[%s2907_s1 + $0x80] ss:$8 sps:$4 sm:$0xff]   ;;  %v2035_v6 = vld [vmem:[%s2907_s1 + $0x94] ss:$8 sps:$4 sm:$0xff]   ;;  %v1960_v7 = vld [vmem:[%s2907_s1 + $0x210] ss:$8 sps:$4 sm:$0xff]  }
  0x14   :  { %1025 = vmatprep.subr.bf16.mxu0 %v1923_v15  ;;  %v1965_v8 = vld [vmem:[%s2907_s1 + $0x224] ss:$8 sps:$4 sm:$0xff]   ;;  %v2037_v9 = vld [vmem:[%s2907_s1 + $0x90] ss:$8 sps:$4 sm:$0xff]   ;;  %v1963_v11 = vld [vmem:[%s2907_s1 + $0x220] ss:$8 sps:$4 sm:$0xff]  }
  0x15   :  { %v2041_v10 = vld [vmem:[%s2907_s1 + $0xa4] ss:$8 sps:$4 sm:$0xff]   ;;  %v1968_v12 = vld [vmem:[%s2907_s1 + $0x234] ss:$8 sps:$4 sm:$0xff]   ;;  %v2043_v14 = vld [vmem:[%s2907_s1 + $0xa0] ss:$8 sps:$4 sm:$0xff]  }
  0x16   :  { %981 = vmatpush1.bf16.msra.mxu1 %v2001_v43  ;;  %v2047_v15 = vld [vmem:[%s2907_s1 + $0xb4] ss:$8 sps:$4 sm:$0xff]   ;;  %v2049_v19 = vld [vmem:[%s2907_s1 + $0xb0] ss:$8 sps:$4 sm:$0xff]   ;;  %v2053_v20 = vld [vmem:[%s2907_s1 + $0xc4] ss:$8 sps:$4 sm:$0xff]  }
  0x17   :  { %1026 = vmatpush1.bf16.msra.mxu0 %v1925_v17  ;;  %982 = vmatprep.subr.bf16.mxu1 %v2005_v44  ;;  %v1966_v17 = vld [vmem:[%s2907_s1 + $0x230] ss:$8 sps:$4 sm:$0xff]   ;;  %v2055_v23 = vld [vmem:[%s2907_s1 + $0xc0] ss:$8 sps:$4 sm:$0xff]   ;;  %v2059_v24 = vld [vmem:[%s2907_s1 + $0xd4] ss:$8 sps:$4 sm:$0xff]  }
  0x18   :  { %1027 = vmatprep.subr.bf16.mxu0 %v1926_v18  ;;  %v1971_v18 = vld [vmem:[%s2907_s1 + $0x244] ss:$8 sps:$4 sm:$0xff]   ;;  %v2061_v27 = vld [vmem:[%s2907_s1 + $0xd0] ss:$8 sps:$4 sm:$0xff]   ;;  %v1980_v30 = vld [vmem:[%s2907_s1 + $0x274] ss:$8 sps:$4 sm:$0xff]  }
  0x19   :  { %v2067_v31 = vld [vmem:[%s2907_s1 + $0xe0] ss:$8 sps:$4 sm:$0xff]   ;;  %v1986_v34 = vld [vmem:[%s2907_s1 + $0x284] ss:$8 sps:$4 sm:$0xff]   ;;  %v2073_v35 = vld [vmem:[%s2907_s1 + $0xf0] ss:$8 sps:$4 sm:$0xff]  }
  0x1a   :  { %983 = vmatpush1.bf16.msra.mxu1 %v2007_v47  ;;  %v1984_v37 = vld [vmem:[%s2907_s1 + $0x280] ss:$8 sps:$4 sm:$0xff]   ;;  %v2085_v40 = vld [vmem:[%s2907_s1 + $0x414] ss:$8 sps:$4 sm:$0xff]   ;;  %v2083_v43 = vld [vmem:[%s2907_s1 + $0x410] ss:$8 sps:$4 sm:$0xff]  }
  0x1b   :  { %1028 = vmatpush1.bf16.msra.mxu0 %v1928_v21  ;;  %984 = vmatprep.subr.bf16.mxu1 %v2011_v48  ;;  %v1969_v21 = vld [vmem:[%s2907_s1 + $0x240] ss:$8 sps:$4 sm:$0xff]   ;;  %v2091_v44 = vld [vmem:[%s2907_s1 + $0x424] ss:$8 sps:$4 sm:$0xff]   ;;  %v2004_v47 = vld [vmem:[%s2907_s1 + $0x2b4] ss:$8 sps:$4 sm:$0xff]  }
  0x1c   :  { %1029 = vmatprep.subr.bf16.mxu0 %v1929_v22  ;;  %v1974_v22 = vld [vmem:[%s2907_s1 + $0x254] ss:$8 sps:$4 sm:$0xff]   ;;  %v2077_v39 = vld [vmem:[%s2907_s1 + $0x400] ss:$8 sps:$4 sm:$0xff]   ;;  %v2010_v51 = vld [vmem:[%s2907_s1 + $0x2c4] ss:$8 sps:$4 sm:$0xff]  }
  0x1d   :  { %v2089_v48 = vld [vmem:[%s2907_s1 + $0x420] ss:$8 sps:$4 sm:$0xff]   ;;  %v2115_v62 = vld [vmem:[%s2907_s1 + $0x464] ss:$8 sps:$4 sm:$0xff]  }
  0x1e   :  { %985 = vmatpush1.bf16.msra.mxu1 %v2013_v52  ;;  %v2095_v52 = vld [vmem:[%s2907_s1 + $0x430] ss:$8 sps:$4 sm:$0xff]  }
  0x1f   :  { %1030 = vmatpush1.bf16.msra.mxu0 %v1931_v25  ;;  %986 = vmatprep.subr.bf16.mxu1 %v2017_v53  ;;  %v1972_v25 = vld [vmem:[%s2907_s1 + $0x250] ss:$8 sps:$4 sm:$0xff]   ;;  %v2103_v53 = vld [vmem:[%s2907_s1 + $0x444] ss:$8 sps:$4 sm:$0xff]  }
  0x20   :  { %1031 = vmatprep.subr.bf16.mxu0 %v1932_v26  ;;  %v1977_v26 = vld [vmem:[%s2907_s1 + $0x264] ss:$8 sps:$4 sm:$0xff]  }
  0x22   :  { %987 = vmatpush1.bf16.msra.mxu1 %v2019_v57  ;;  %v2101_v57 = vld [vmem:[%s2907_s1 + $0x440] ss:$8 sps:$4 sm:$0xff]  }
  0x23   :  { %1032 = vmatpush1.bf16.msra.mxu0 %v1934_v28  ;;  %988 = vmatprep.subr.bf16.mxu1 %v2023_v58  ;;  %v2065_v28 = vld [vmem:[%s2907_s1 + $0xe4] ss:$8 sps:$4 sm:$0xff]   ;;  %v2109_v58 = vld [vmem:[%s2907_s1 + $0x454] ss:$8 sps:$4 sm:$0xff]  }
  0x24   :  { %1033 = vmatprep.subr.bf16.mxu0 %v1935_v29  ;;  %v1975_v29 = vld [vmem:[%s2907_s1 + $0x260] ss:$8 sps:$4 sm:$0xff]  }
  0x26   :  { %989 = vmatpush1.bf16.msra.mxu1 %v2025_v63 }
  0x27   :  { %1034 = vmatpush1.bf16.msra.mxu0 %v1937_v32  ;;  %990 = vmatprep.subr.bf16.mxu1 %v2029_v0  ;;  %v2071_v32 = vld [vmem:[%s2907_s1 + $0xf4] ss:$8 sps:$4 sm:$0xff]  }
  0x28   :  { %1035 = vmatprep.subr.bf16.mxu0 %v1938_v33  ;;  %v1978_v33 = vld [vmem:[%s2907_s1 + $0x270] ss:$8 sps:$4 sm:$0xff]  }
  0x2a   :  { %991 = vmatpush1.bf16.msra.mxu1 %v2031_v5 }
  0x2b   :  { %1036 = vmatpush1.bf16.msra.mxu0 %v1940_v36  ;;  %992 = vmatprep.subr.bf16.mxu1 %v2035_v6  ;;  %v2079_v36 = vld [vmem:[%s2907_s1 + $0x404] ss:$8 sps:$4 sm:$0xff]  }
  0x2c   :  { %1037 = vmatprep.subr.bf16.mxu0 %v1941_v38  ;;  %v1992_v38 = vld [vmem:[%s2907_s1 + $0x294] ss:$8 sps:$4 sm:$0xff]  }
  0x2e   :  { %993 = vmatpush1.bf16.msra.mxu1 %v2037_v9 }
  0x2f   :  { %1038 = vmatpush1.bf16.msra.mxu0 %v1943_v41  ;;  %994 = vmatprep.subr.bf16.mxu1 %v2041_v10  ;;  %v1990_v41 = vld [vmem:[%s2907_s1 + $0x290] ss:$8 sps:$4 sm:$0xff]  }
  0x30   :  { %1039 = vmatprep.subr.bf16.mxu0 %v1944_v42  ;;  %v1998_v42 = vld [vmem:[%s2907_s1 + $0x2a4] ss:$8 sps:$4 sm:$0xff]  }
  0x32   :  { %995 = vmatpush1.bf16.msra.mxu1 %v2043_v14 }
  0x33   :  { %1040 = vmatpush1.bf16.msra.mxu0 %v1946_v45  ;;  %996 = vmatprep.subr.bf16.mxu1 %v2047_v15  ;;  %v1996_v45 = vld [vmem:[%s2907_s1 + $0x2a0] ss:$8 sps:$4 sm:$0xff]  }
  0x34   :  { %1041 = vmatprep.subr.bf16.mxu0 %v1947_v46  ;;  %v2214_v46 = vmov 0  }
  0x36   :  { %997 = vmatpush1.bf16.msra.mxu1 %v2049_v19 }
  0x37   :  { %1042 = vmatpush1.bf16.msra.mxu0 %v1949_v49  ;;  %998 = vmatprep.subr.bf16.mxu1 %v2053_v20  ;;  %v2097_v49 = vld [vmem:[%s2907_s1 + $0x434] ss:$8 sps:$4 sm:$0xff]  }
  0x38   :  { %1043 = vmatprep.subr.bf16.mxu0 %v1950_v50  ;;  %v2002_v50 = vld [vmem:[%s2907_s1 + $0x2b0] ss:$8 sps:$4 sm:$0xff]  }
  0x3a   :  { %999 = vmatpush1.bf16.msra.mxu1 %v2055_v23 }
  0x3b   :  { %1044 = vmatpush1.bf16.msra.mxu0 %v1952_v54  ;;  %1000 = vmatprep.subr.bf16.mxu1 %v2059_v24  ;;  %v2008_v54 = vld [vmem:[%s2907_s1 + $0x2c0] ss:$8 sps:$4 sm:$0xff]  }
  0x3c   :  { %1045 = vmatprep.subr.bf16.mxu0 %v1953_v55  ;;  %v2016_v55 = vld [vmem:[%s2907_s1 + $0x2d4] ss:$8 sps:$4 sm:$0xff]  }
  0x3e   :  { %1001 = vmatpush1.bf16.msra.mxu1 %v2061_v27 }
  0x3f   :  { %1046 = vmatpush1.bf16.msra.mxu0 %v1955_v59  ;;  %1002 = vmatprep.subr.bf16.mxu1 %v2065_v28  ;;  %v2014_v59 = vld [vmem:[%s2907_s1 + $0x2d0] ss:$8 sps:$4 sm:$0xff]  }
  0x40   :  { %1056 = vmatprep.subr.bf16.mxu0 %v1959_v61  ;;  %v2107_v61 = vld [vmem:[%s2907_s1 + $0x450] ss:$8 sps:$4 sm:$0xff]  }
  0x42   :  { %1048 = vmatmul.mubr.bf16.vlgmr.msra.gmra.mrb[0].mxu0 %v227_v2  ;;  %1003 = vmatpush1.bf16.msra.mxu1 %v2067_v31 }
  0x43   :  { %1057 = vmatpush1.bf16.msra.mxu0 %v1957_v1  ;;  %1088 = vmatprep.mubr.bf16.mxu0 %v2445_v4 }
  0x44   :  { %1058 = vmatprep.subr.bf16.mxu0 %v1962_v3  ;;  %1004 = vmatprep.subr.bf16.mxu1 %v2071_v32 }
  0x46   :  { %1005 = vmatpush1.bf16.msra.mxu1 %v2073_v35 }
  0x47   :  { %1059 = vmatpush1.bf16.msra.mxu0 %v1960_v7  ;;  %1138 = vmatprep.subr.bf16.mxu1 %v2079_v36 }
  0x48   :  { %1060 = vmatprep.subr.bf16.mxu0 %v1965_v8 }
  0x49   :  { %1007 = vmatmul.mubr.bf16.vlgmr.msra.gmra.mrb[0].mxu1 %v2423_v60  ;;  %v2022_v60 = vld [vmem:[%s2907_s1 + $0x2e4] ss:$8 sps:$4 sm:$0xff]  }
  0x4a   :  { %1139 = vmatpush1.bf16.msra.mxu1 %v2077_v39  ;;  %1170 = vmatprep.mubr.bf16.mxu1 %v2214_v46 }
  0x4b   :  { %1061 = vmatpush1.bf16.msra.mxu0 %v1963_v11  ;;  %1140 = vmatprep.subr.bf16.mxu1 %v2085_v40 }
  0x4c   :  { %1062 = vmatprep.subr.bf16.mxu0 %v1968_v12 }
  0x4e   :  { %1141 = vmatpush1.bf16.msra.mxu1 %v2083_v43 }
  0x4f   :  { %1063 = vmatpush1.bf16.msra.mxu0 %v1966_v17  ;;  %1142 = vmatprep.subr.bf16.mxu1 %v2091_v44 }
  0x50   :  { %1064 = vmatprep.subr.bf16.mxu0 %v1971_v18 }
  0x52   :  { %1143 = vmatpush1.bf16.msra.mxu1 %v2089_v48 }
  0x53   :  { %1065 = vmatpush1.bf16.msra.mxu0 %v1969_v21  ;;  %1144 = vmatprep.subr.bf16.mxu1 %v2097_v49 }
  0x54   :  { %1066 = vmatprep.subr.bf16.mxu0 %v1974_v22 }
  0x56   :  { %1145 = vmatpush1.bf16.msra.mxu1 %v2095_v52 }
  0x57   :  { %1067 = vmatpush1.bf16.msra.mxu0 %v1972_v25  ;;  %1146 = vmatprep.subr.bf16.mxu1 %v2103_v53 }
  0x58   :  { %1068 = vmatprep.subr.bf16.mxu0 %v1977_v26 }
  0x5a   :  { %1147 = vmatpush1.bf16.msra.mxu1 %v2101_v57 }
  0x5b   :  { %1069 = vmatpush1.bf16.msra.mxu0 %v1975_v29  ;;  %1148 = vmatprep.subr.bf16.mxu1 %v2109_v58 }
  0x5c   :  { %1070 = vmatprep.subr.bf16.mxu0 %v1980_v30 }
  0x5f   :  { %1071 = vmatpush1.bf16.msra.mxu0 %v1978_v33 }
  0x60   :  { %1072 = vmatprep.subr.bf16.mxu0 %v1986_v34 }
  0x63   :  { %1073 = vmatpush1.bf16.msra.mxu0 %v1984_v37 }
  0x64   :  { %1074 = vmatprep.subr.bf16.mxu0 %v1992_v38 }
  0x67   :  { %1075 = vmatpush1.bf16.msra.mxu0 %v1990_v41 }
  0x68   :  { %1076 = vmatprep.subr.bf16.mxu0 %v1998_v42 }
  0x6b   :  { %1077 = vmatpush1.bf16.msra.mxu0 %v1996_v45 }
  0x6c   :  { %1078 = vmatprep.subr.bf16.mxu0 %v2004_v47 }
  0x6f   :  { %1079 = vmatpush1.bf16.msra.mxu0 %v2002_v50 }
  0x70   :  { %1080 = vmatprep.subr.bf16.mxu0 %v2010_v51 }
  0x73   :  { %1081 = vmatpush1.bf16.msra.mxu0 %v2008_v54 }
  0x74   :  { %1082 = vmatprep.subr.bf16.mxu0 %v2016_v55 }
  0x75   :  { %12 = vsyncpa [#allocation4], 0  ;;  %v2020_v63 = vld [vmem:[%s2907_s1 + $0x2e0] ss:$8 sps:$4 sm:$0xff]   ;;  %v2028_v0 = vld [vmem:[%s2907_s1 + $0x2f4] ss:$8 sps:$4 sm:$0xff]   ;;  %1149 = vmatpush1.bf16.msra.mxu1 %v2107_v61  ;;  %v2637_v8 = vrot.slane %v2410_v56, %v2294_v16  ;;  %v230_v10 = vcombine.high %v2445_v4, %v2445_v4 }
  0x76   :  { %v2113_v1 = vld [vmem:[%s2907_s1 + $0x460] ss:$8 sps:$4 sm:$0xff]   ;;  %1150 = vmatprep.subr.bf16.mxu1 %v2115_v62  ;;  %v2121_v2 = vld [vmem:[%s2907_s1 + $0x474] ss:$8 sps:$4 sm:$0xff]   ;;  %v2026_v3 = vld [vmem:[%s2907_s1 + $0x2f0] ss:$8 sps:$4 sm:$0xff]  }
  0x77   :  { %1083 = vmatpush1.bf16.msra.mxu0 %v2014_v59  ;;  %v2034_v5 = vld [vmem:[%s2907_s1 + $0x304] ss:$8 sps:$4 sm:$0xff]   ;;  %v2119_v6 = vld [vmem:[%s2907_s1 + $0x470] ss:$8 sps:$4 sm:$0xff]   ;;  %v2032_v9 = vld [vmem:[%s2907_s1 + $0x300] ss:$8 sps:$4 sm:$0xff]   ;;  %v228_v47 = vcombine.high %v2637_v8, %v2637_v8 }
  0x78   :  { %1084 = vmatprep.subr.bf16.mxu0 %v2022_v60  ;;  %v1675_v7 = vld.sshfl [vmem:[%s2906_s0 + $0x8] sm:$0x1 pattern:$0x75316420]  ;;  %v2040_v11 = vld [vmem:[%s2907_s1 + $0x314] ss:$8 sps:$4 sm:$0xff]  }
  0x79   :  { %1151 = vmatpush1.bf16.msra.mxu1 %v2113_v1  ;;  %v244_v12 = vrot.slane %v1675_v7, %v2294_v16  ;;  %v2038_v56 = vld [vmem:[%s2907_s1 + $0x310] ss:$8 sps:$4 sm:$0xff]   ;;  %v2046_v4 = vld [vmem:[%s2907_s1 + $0x324] ss:$8 sps:$4 sm:$0xff]   ;;  %v2044_v14 = vld [vmem:[%s2907_s1 + $0x320] ss:$8 sps:$4 sm:$0xff]  }
  0x7a   :  { %1152 = vmatprep.subr.bf16.mxu1 %v2121_v2  ;;  %v2052_v16 = vld [vmem:[%s2907_s1 + $0x334] ss:$8 sps:$4 sm:$0xff]   ;;  %v2050_v15 = vld [vmem:[%s2907_s1 + $0x330] ss:$8 sps:$4 sm:$0xff]   ;;  %v2058_v17 = vld [vmem:[%s2907_s1 + $0x344] ss:$8 sps:$4 sm:$0xff]  }
  0x7b   :  { %1085 = vmatpush1.bf16.msra.mxu0 %v2020_v63  ;;  %v2056_v18 = vld [vmem:[%s2907_s1 + $0x340] ss:$8 sps:$4 sm:$0xff]   ;;  %v2064_v19 = vld [vmem:[%s2907_s1 + $0x354] ss:$8 sps:$4 sm:$0xff]   ;;  %v2062_v20 = vld [vmem:[%s2907_s1 + $0x350] ss:$8 sps:$4 sm:$0xff]  }
  0x7c   :  { %1086 = vmatprep.subr.bf16.mxu0 %v2028_v0  ;;  %v2070_v21 = vld [vmem:[%s2907_s1 + $0x364] ss:$8 sps:$4 sm:$0xff]   ;;  %v2068_v22 = vld [vmem:[%s2907_s1 + $0x360] ss:$8 sps:$4 sm:$0xff]   ;;  %v2076_v23 = vld [vmem:[%s2907_s1 + $0x374] ss:$8 sps:$4 sm:$0xff]  }
  0x7d   :  { %1153 = vmatpush1.bf16.msra.mxu1 %v2119_v6  ;;  %v2074_v24 = vld [vmem:[%s2907_s1 + $0x370] ss:$8 sps:$4 sm:$0xff]   ;;  %v2082_v25 = vld [vmem:[%s2907_s1 + $0x384] ss:$8 sps:$4 sm:$0xff]   ;;  %v2080_v26 = vld [vmem:[%s2907_s1 + $0x380] ss:$8 sps:$4 sm:$0xff]  }
  0x7e   :  { %v2088_v27 = vld [vmem:[%s2907_s1 + $0x394] ss:$8 sps:$4 sm:$0xff]   ;;  %v2086_v28 = vld [vmem:[%s2907_s1 + $0x390] ss:$8 sps:$4 sm:$0xff]   ;;  %v2094_v29 = vld [vmem:[%s2907_s1 + $0x3a4] ss:$8 sps:$4 sm:$0xff]  }
  0x7f   :  { %1087 = vmatpush1.bf16.msra.mxu0 %v2026_v3  ;;  %v2092_v30 = vld [vmem:[%s2907_s1 + $0x3a0] ss:$8 sps:$4 sm:$0xff]   ;;  %v2100_v31 = vld [vmem:[%s2907_s1 + $0x3b4] ss:$8 sps:$4 sm:$0xff]   ;;  %v2098_v32 = vld [vmem:[%s2907_s1 + $0x3b0] ss:$8 sps:$4 sm:$0xff]  }
  0x80   :  { %1097 = vmatprep.subr.bf16.mxu0 %v2034_v5  ;;  %1171 = vmatmul.mubr.bf16.vlgmr.msra.gmra.mrb[4].mxu1 %v244_v12  ;;  %v2106_v33 = vld [vmem:[%s2907_s1 + $0x3c4] ss:$8 sps:$4 sm:$0xff]   ;;  %v2104_v34 = vld [vmem:[%s2907_s1 + $0x3c0] ss:$8 sps:$4 sm:$0xff]   ;;  %v2112_v35 = vld [vmem:[%s2907_s1 + $0x3d4] ss:$8 sps:$4 sm:$0xff]  }
  0x81   :  { %v2110_v36 = vld [vmem:[%s2907_s1 + $0x3d0] ss:$8 sps:$4 sm:$0xff]   ;;  %v2118_v37 = vld [vmem:[%s2907_s1 + $0x3e4] ss:$8 sps:$4 sm:$0xff]   ;;  %v2125_v38 = vld [vmem:[%s2909_s3] ss:$8 sps:$4 sm:$0xff]  }
  0x82   :  { %1089 = vmatmul.mubr.bf16.vlgmr.msra.gmra.mrb[0].mxu0 %v2637_v8  ;;  %v2127_v39 = vld [vmem:[%s2909_s3 + $0x4] ss:$8 sps:$4 sm:$0xff]   ;;  %v2116_v40 = vld [vmem:[%s2907_s1 + $0x3e0] ss:$8 sps:$4 sm:$0xff]   ;;  %v2124_v41 = vld [vmem:[%s2907_s1 + $0x3f4] ss:$8 sps:$4 sm:$0xff]  }
  0x83   :  { %1098 = vmatpush1.bf16.msra.mxu0 %v2032_v9  ;;  %1129 = vmatprep.mubr.bf16.mxu0 %v230_v10  ;;  %v2128_v42 = vld [vmem:[%s2909_s3 + $0x10] ss:$8 sps:$4 sm:$0xff]   ;;  %v2130_v43 = vld [vmem:[%s2909_s3 + $0x14] ss:$8 sps:$4 sm:$0xff]   ;;  %v2133_v44 = vld [vmem:[%s2909_s3 + $0x24] ss:$8 sps:$4 sm:$0xff]  }
  0x84   :  { %1099 = vmatprep.subr.bf16.mxu0 %v2040_v11  ;;  %1436 = vmatprep.subr.bf16.mxu1 %v2127_v39  ;;  %v2122_v45 = vld [vmem:[%s2907_s1 + $0x3f0] ss:$8 sps:$4 sm:$0xff]   ;;  %v2131_v46 = vld [vmem:[%s2909_s3 + $0x20] ss:$8 sps:$4 sm:$0xff]   ;;  %v2136_v48 = vld [vmem:[%s2909_s3 + $0x34] ss:$8 sps:$4 sm:$0xff]  }
  0x85   :  { %1437 = vmatpush1.bf16.msra.mxu1 %v2125_v38  ;;  %v2134_v49 = vld [vmem:[%s2909_s3 + $0x30] ss:$8 sps:$4 sm:$0xff]   ;;  %v2139_v50 = vld [vmem:[%s2909_s3 + $0x44] ss:$8 sps:$4 sm:$0xff]   ;;  %v2137_v51 = vld [vmem:[%s2909_s3 + $0x40] ss:$8 sps:$4 sm:$0xff]  }
  0x86   :  { %1438 = vmatprep.subr.bf16.mxu1 %v2130_v43  ;;  %v2142_v52 = vld [vmem:[%s2909_s3 + $0x54] ss:$8 sps:$4 sm:$0xff]   ;;  %v2140_v53 = vld [vmem:[%s2909_s3 + $0x50] ss:$8 sps:$4 sm:$0xff]   ;;  %v2145_v54 = vld [vmem:[%s2909_s3 + $0x64] ss:$8 sps:$4 sm:$0xff]  }
  0x87   :  { %1100 = vmatpush1.bf16.msra.mxu0 %v2038_v56  ;;  %v2143_v55 = vld [vmem:[%s2909_s3 + $0x60] ss:$8 sps:$4 sm:$0xff]   ;;  %v2148_v57 = vld [vmem:[%s2909_s3 + $0x74] ss:$8 sps:$4 sm:$0xff]   ;;  %v2146_v58 = vld [vmem:[%s2909_s3 + $0x70] ss:$8 sps:$4 sm:$0xff]  }
  0x88   :  { %1101 = vmatprep.subr.bf16.mxu0 %v2046_v4  ;;  %v2151_v59 = vld [vmem:[%s2909_s3 + $0x84] ss:$8 sps:$4 sm:$0xff]   ;;  %v2149_v60 = vld [vmem:[%s2909_s3 + $0x80] ss:$8 sps:$4 sm:$0xff]   ;;  %v2215_v61 = vmov 0.0   ;;  %s2217_s10 = smov [#allocation3]  }
  0x89   :  { %1439 = vmatpush1.bf16.msra.mxu1 %v2128_v42  ;;  %32 = vst [vmem:[#allocation2] sm:$0xf] %v2215_v61  ;;  %v2154_v62 = vld [vmem:[%s2909_s3 + $0x94] ss:$8 sps:$4 sm:$0xff]   ;;  %v2152_v63 = vld [vmem:[%s2909_s3 + $0x90] ss:$8 sps:$4 sm:$0xff]  }
  0x8a   :  { %1440 = vmatprep.subr.bf16.mxu1 %v2133_v44  ;;  %v2157_v0 = vld [vmem:[%s2909_s3 + $0xa4] ss:$8 sps:$4 sm:$0xff]   ;;  %v2155_v1 = vld [vmem:[%s2909_s3 + $0xa0] ss:$8 sps:$4 sm:$0xff]   ;;  %v2160_v2 = vld [vmem:[%s2909_s3 + $0xb4] ss:$8 sps:$4 sm:$0xff]  }
  0x8b   :  { %1102 = vmatpush1.bf16.msra.mxu0 %v2044_v14  ;;  %v2158_v3 = vld [vmem:[%s2909_s3 + $0xb0] ss:$8 sps:$4 sm:$0xff]   ;;  %v2163_v5 = vld [vmem:[%s2909_s3 + $0xc4] ss:$8 sps:$4 sm:$0xff]   ;;  %v2161_v6 = vld [vmem:[%s2909_s3 + $0xc0] ss:$8 sps:$4 sm:$0xff]  }
  0x8c   :  { %1103 = vmatprep.subr.bf16.mxu0 %v2052_v16  ;;  %v2166_v7 = vld [vmem:[%s2909_s3 + $0xd4] ss:$8 sps:$4 sm:$0xff]   ;;  %v2164_v8 = vld [vmem:[%s2909_s3 + $0xd0] ss:$8 sps:$4 sm:$0xff]   ;;  %v2169_v9 = vld [vmem:[%s2909_s3 + $0xe4] ss:$8 sps:$4 sm:$0xff]  }
  0x8d   :  { %1441 = vmatpush1.bf16.msra.mxu1 %v2131_v46  ;;  %v2167_v10 = vld [vmem:[%s2909_s3 + $0xe0] ss:$8 sps:$4 sm:$0xff]   ;;  %v2172_v11 = vld [vmem:[%s2909_s3 + $0xf4] ss:$8 sps:$4 sm:$0xff]   ;;  %v2170_v12 = vld [vmem:[%s2909_s3 + $0xf0] ss:$8 sps:$4 sm:$0xff]  }
  0x8e   :  { %1442 = vmatprep.subr.bf16.mxu1 %v2136_v48  ;;  %v2173_v56 = vld [vmem:[%s2911_s5 + $0x40] sm:$0xff]   ;;  %v2183_v61 = vld [vmem:[%s2911_s5 + $0x68] sm:$0xff]   ;;  %s1667_s11 = sshll.u32 %s2217_s10, 4  ;;  %s1668_s11 = int_to_ptr.vmem [resolvable:$true] %s1667_s11 }
  0x8f   :  { %1104 = vmatpush1.bf16.msra.mxu0 %v2050_v15  ;;  %s2189_s12 = scalar_lea.vmem %s1668_s11, 32  ;;  %p2194_p1 = scmp.lt.s32.totalorder %s1668_s11, %s1668_s11 }
  0x90   :  { %1105 = vmatprep.subr.bf16.mxu0 %v2058_v17  ;;  %p2190_p0 = scmp.ne.s32.totalorder %s1668_s11, %s2189_s12  ;;  %p2195_p2 = scmp.lt.s32.totalorder %s2189_s12, %s2189_s12 }
  0x91   :  { %1443 = vmatpush1.bf16.msra.mxu1 %v2134_v49 }
  0x92   :  { %1444 = vmatprep.subr.bf16.mxu1 %v2139_v50  ;;  %v2174_v50 = vld [vmem:[%s2911_s5] sm:$0xff]   ;;  %p2196_p3 = por %p2195_p2, %p2194_p1 }
  0x93   :  { %1106 = vmatpush1.bf16.msra.mxu0 %v2056_v18 }
  0x94   :  { %1107 = vmatprep.subr.bf16.mxu0 %v2064_v19  ;;  %p2197_p4 = pnand %p2196_p3, %p2190_p0 }
  0x95   :  { %1445 = vmatpush1.bf16.msra.mxu1 %v2137_v51 }
  0x96   :  { %1446 = vmatprep.subr.bf16.mxu1 %v2142_v52  ;;  %v2175_v52 = vld [vmem:[%s2911_s5 + $0x48] sm:$0xff]  }
  0x97   :  { %1108 = vmatpush1.bf16.msra.mxu0 %v2062_v20 }
  0x98   :  { %1109 = vmatprep.subr.bf16.mxu0 %v2070_v21  ;;  %v2216_v21 = vmov 1983009808  }
  0x99   :  { %1447 = vmatpush1.bf16.msra.mxu1 %v2140_v53  ;;  %v2176_v53 = vld [vmem:[%s2911_s5 + $0x8] sm:$0xff]  }
  0x9a   :  { %1448 = vmatprep.subr.bf16.mxu1 %v2145_v54  ;;  %v2177_v54 = vld [vmem:[%s2911_s5 + $0x50] sm:$0xff]  }
  0x9b   :  { %1110 = vmatpush1.bf16.msra.mxu0 %v2068_v22  ;;  %v1183_v22 = vunpack.c.l.s4 %v2216_v21 }
  0x9c   :  { %1111 = vmatprep.subr.bf16.mxu0 %v2076_v23 }
  0x9d   :  { %1449 = vmatpush1.bf16.msra.mxu1 %v2143_v55  ;;  %v2178_v55 = vld [vmem:[%s2911_s5 + $0x10] sm:$0xff]  }
  0x9e   :  { %1450 = vmatprep.subr.bf16.mxu1 %v2148_v57  ;;  %v2179_v57 = vld [vmem:[%s2911_s5 + $0x58] sm:$0xff]  }
  0x9f   :  { %1112 = vmatpush1.bf16.msra.mxu0 %v2074_v24  ;;  %v1184_v24 = vunpack.c.0.s8 %v1183_v22 }
  0xa0   :  { %1113 = vmatprep.subr.bf16.mxu0 %v2082_v25 }
  0xa1   :  { %1451 = vmatpush1.bf16.msra.mxu1 %v2146_v58  ;;  %v2180_v58 = vld [vmem:[%s2911_s5 + $0x18] sm:$0xff]  }
  0xa2   :  { %1452 = vmatprep.subr.bf16.mxu1 %v2151_v59  ;;  %v2181_v59 = vld [vmem:[%s2911_s5 + $0x60] sm:$0xff]  }
  0xa3   :  { %1114 = vmatpush1.bf16.msra.mxu0 %v2080_v26 }
  0xa4   :  { %1115 = vmatprep.subr.bf16.mxu0 %v2088_v27 }
  0xa5   :  { %1453 = vmatpush1.bf16.msra.mxu1 %v2149_v60  ;;  %v2182_v60 = vld [vmem:[%s2911_s5 + $0x20] sm:$0xff]  }
  0xa6   :  { %1454 = vmatprep.subr.bf16.mxu1 %v2154_v62  ;;  %v2184_v62 = vld [vmem:[%s2911_s5 + $0x28] sm:$0xff]  }
  0xa7   :  { %1116 = vmatpush1.bf16.msra.mxu0 %v2086_v28 }
  0xa8   :  { %1117 = vmatprep.subr.bf16.mxu0 %v2094_v29 }
  0xa9   :  { %1455 = vmatpush1.bf16.msra.mxu1 %v2152_v63  ;;  %v2185_v63 = vld [vmem:[%s2911_s5 + $0x70] sm:$0xff]  }
  0xaa   :  { %1456 = vmatprep.subr.bf16.mxu1 %v2157_v0  ;;  %v2186_v0 = vld [vmem:[%s2911_s5 + $0x30] sm:$0xff]  }
  0xab   :  { %1118 = vmatpush1.bf16.msra.mxu0 %v2092_v30 }
  0xac   :  { %1119 = vmatprep.subr.bf16.mxu0 %v2100_v31 }
  0xad   :  { %1457 = vmatpush1.bf16.msra.mxu1 %v2155_v1  ;;  %v2187_v1 = vld [vmem:[%s2911_s5 + $0x78] sm:$0xff]  }
  0xae   :  { %1458 = vmatprep.subr.bf16.mxu1 %v2160_v2  ;;  %v2188_v2 = vld [vmem:[%s2911_s5 + $0x38] sm:$0xff]  }
  0xaf   :  { %1120 = vmatpush1.bf16.msra.mxu0 %v2098_v32  ;;  %v1187_v32 = vsub.s32 %v1184_v24, %v2285_v13 }
  0xb0   :  { %1121 = vmatprep.subr.bf16.mxu0 %v2106_v33  ;;  %v1200_v33 = vsub.s32 0, %v2285_v13 }
  0xb1   :  { %1459 = vmatpush1.bf16.msra.mxu1 %v2158_v3  ;;  %v1264_v3 = vld [vmem:[%s2910_s4] sm:$0x3] }
  0xb2   :  { %1460 = vmatprep.subr.bf16.mxu1 %v2163_v5  ;;  %v1269_v5 = vrot.slane %v1264_v3, %v1200_v33 }
  0xb3   :  { %1122 = vmatpush1.bf16.msra.mxu0 %v2104_v34  ;;  %v1204_v34 = vsub.s32 1, %v2285_v13 }
  0xb4   :  { %1123 = vmatprep.subr.bf16.mxu0 %v2112_v35  ;;  %v1196_v35 = vld [vmem:[%s2908_s2] sm:$0x3] }
  0xb5   :  { %1461 = vmatpush1.bf16.msra.mxu1 %v2161_v6  ;;  %v1201_v39 = vrot.slane %v1196_v35, %v1200_v33  ;;  %v1273_v6 = vrot.slane %v1264_v3, %v1204_v34 }
  0xb6   :  { %1462 = vmatprep.subr.bf16.mxu1 %v2166_v7 }
  0xb7   :  { %1124 = vmatpush1.bf16.msra.mxu0 %v2110_v36 }
  0xb8   :  { %1125 = vmatprep.subr.bf16.mxu0 %v2118_v37  ;;  %v33_v37 = vld [vmem:[#allocation2] sm:$0xf] }
  0xb9   :  { %1463 = vmatpush1.bf16.msra.mxu1 %v2164_v8 }
  0xba   :  { %1464 = vmatprep.subr.bf16.mxu1 %v2169_v9 }
  0xbb   :  { %1126 = vmatpush1.bf16.msra.mxu0 %v2116_v40  ;;  %v1205_v40 = vrot.slane %v1196_v35, %v1204_v34 }
  0xbc   :  { %1127 = vmatprep.subr.bf16.mxu0 %v2124_v41 }
  0xbd   :  { %1465 = vmatpush1.bf16.msra.mxu1 %v2167_v10  ;;  %v1206_v42 = vcombine.low %v1201_v39, %v1205_v40 }
  0xbe   :  { %1466 = vmatprep.subr.bf16.mxu1 %v2172_v11 }
  0xbf   :  { %1128 = vmatpush1.bf16.msra.mxu0 %v2122_v45  ;;  %v1213_v43 = vrot.slane %v1206_v42, %v1187_v32 }
  0xc1   :  { %1467 = vmatpush1.bf16.msra.mxu1 %v2170_v12 }
  0xc2   :  { %1130 = vmatmul.mubr.bf16.vlgmr.msra.gmra.mrb[0].mxu0 %v228_v47  ;;  %1869 = vmatprep.subr.bf16.mxu1 %v2173_v56 }
 0x11c   :  { %v1008_v4 = vpop.f32.mrb[0].mxu1 }
 0x11d   :  { %v1010_v14 = vpop.f32.mrb[1].mxu1 }
 0x11e   :  { %v1012_v16 = vpop.f32.mrb[2].mxu1 }
 0x11f   :  { %v1013_v15 = vpop.f32.mrb[3].mxu1 }
 0x153   :  { %v1172_v17 = vpop.f32.mrb[4].mxu1 }
 0x154   :  { %v1174_v18 = vpop.f32.mrb[5].mxu1 }
 0x155   :  { %v1176_v19 = vpop.f32.mrb[6].mxu1 }
 0x156   :  { %v1177_v20 = vpop.f32.mrb[7].mxu1 }
 0x157   :  { %v1852_v20 = vld [vmem:[%s2912_s6] ss:$0 sm:$0xff] }
 0x195   :  { %v1131_v23 = vpop.f32.mrb[0].mxu0 }
 0x196   :  { %v1891_v25 = vadd.f32 %v1131_v23, %v1008_v4  ;;  %v1133_v26 = vpop.f32.mrb[1].mxu0 }
 0x197   :  { %v1893_v27 = vadd.f32 %v1133_v26, %v1010_v14  ;;  %v1135_v28 = vpop.f32.mrb[2].mxu0 }
 0x198   :  { %v1892_v29 = vadd.f32 %v1891_v25, %v1172_v17  ;;  %v1136_v30 = vpop.f32.mrb[3].mxu0 }
 0x199   :  { %v1894_v31 = vadd.f32 %v1893_v27, %v1174_v18 }
 0x19b   :  { %v1181_v36 = vcombine.low %v1892_v29, %v1894_v31 }
 0x19d   :  { %v1188_v38 = vrot.slane %v1181_v36, %v1187_v32 }
 0x19f   :  { %v1190_v41 = vadd.f32 %v1188_v38, %v33_v37 }
 0x1a1   :  { %1191 = vst [vmem:[#allocation2] sm:$0xf] %v1190_v41 }
 0x1a8   :  { %v1195_v44 = vld [vmem:[#allocation2] sm:$0xf] }
 0x1a9   :  { %v1215_v45 = vadd.f32 %v1213_v43, %v1195_v44 }
 0x1ab   :  { %vm1216_vm0 = vcmp.ge.f32.partialorder %v1215_v45, 0.0  ;;  %v1217_v46 = vmul.f32 0.01, %v1215_v45 }
 0x1ad   :  { %v1218_v47 = vsel %vm1216_vm0, %v1215_v45, %v1217_v46 }
 0x1ae   :  { %v1226_v48 = vrot.slane %v1218_v47, %v1187_v32 }
 0x1b0   :  { %v1227_v13 = vcombine.high %v1226_v48, %v1226_v48  ;;  %v1230_v51 = vpack.c.bf16 %v1226_v48, %v1226_v48 }
 0x1b2   :  { %v1231_v49 = vpack.c.bf16 %v1227_v13, %v1227_v13 }
 0x1b4   :  { %1468 = vmatprep.mubr.bf16.mxu1 %v1231_v49 }
 0x1b5   :  { %1469 = vmatmul.mubr.bf16.vlgmr.msra.gmra.mrb[8].mxu1 %v1230_v51 }
 0x1b6   :  { %1870 = vmatpush3.bf16.msra.mxu1 %v2174_v50 }
 0x1b7   :  { %1871 = vmatprep.subr.bf16.mxu1 %v2175_v52 }
 0x1ba   :  { %1872 = vmatpush3.bf16.msra.mxu1 %v2176_v53 }
 0x1bb   :  { %1873 = vmatprep.subr.bf16.mxu1 %v2177_v54 }
 0x1be   :  { %1874 = vmatpush3.bf16.msra.mxu1 %v2178_v55 }
 0x1bf   :  { %1875 = vmatprep.subr.bf16.mxu1 %v2179_v57 }
 0x1c2   :  { %1876 = vmatpush3.bf16.msra.mxu1 %v2180_v58 }
 0x1c3   :  { %1877 = vmatprep.subr.bf16.mxu1 %v2181_v59 }
 0x1c6   :  { %1878 = vmatpush3.bf16.msra.mxu1 %v2182_v60 }
 0x1c7   :  { %1879 = vmatprep.subr.bf16.mxu1 %v2183_v61 }
 0x1ca   :  { %1880 = vmatpush3.bf16.msra.mxu1 %v2184_v62 }
 0x1cb   :  { %1881 = vmatprep.subr.bf16.mxu1 %v2185_v63 }
 0x1ce   :  { %1882 = vmatpush3.bf16.msra.mxu1 %v2186_v0 }
 0x1cf   :  { %1883 = vmatprep.subr.bf16.mxu1 %v2187_v1 }
 0x1d2   :  { %1884 = vmatpush3.bf16.msra.mxu1 %v2188_v2 }
 0x288   :  { %v1470_v7 = vpop.f32.mrb[8].mxu1 }
 0x289   :  { %v1471_v8 = vadd.f32 %v1470_v7, %v1269_v5  ;;  %v1472_v9 = vpop.f32.mrb[9].mxu1 }
 0x28a   :  { %v1473_v10 = vadd.f32 %v1472_v9, %v1273_v6  ;;  %v1474_v11 = vpop.f32.mrb[10].mxu1 }
 0x28b   :  { %vm1477_vm1 = vcmp.ge.f32.partialorder %v1471_v8, 0.0  ;;  %v1479_v12 = vmul.f32 0.01, %v1471_v8  ;;  %v1475_v56 = vpop.f32.mrb[11].mxu1 }
 0x28c   :  { %vm1478_vm2 = vcmp.ge.f32.partialorder %v1473_v10, 0.0  ;;  %v1480_v4 = vmul.f32 0.01, %v1473_v10 }
 0x28d   :  { %v1481_v14 = vsel %vm1477_vm1, %v1471_v8, %v1479_v12 }
 0x28e   :  { %v1482_v16 = vsel %vm1478_vm2, %v1473_v10, %v1480_v4  ;;  %v1483_v17 = vpack.c.bf16 %v1481_v14, %v1481_v14 }
 0x28f   :  { %v1484_v15 = vpack.c.bf16 %v1482_v16, %v1482_v16 }
 0x291   :  { %1652 = vmatprep.mubr.bf16.mxu1 %v1484_v15 }
 0x292   :  { %1653 = vmatmul.mubr.bf16.vlgmr.msra.gmra.mrb[12].mxu1 %v1483_v17 }
 0x365   :  { %v1885_v18 = vpop.f32.mrb[12].mxu1 }
 0x366   :  { %v1886_v19 = vpop.f32.mrb[13].mxu1 }
 0x367   :  { %v1887_v21 = vadd.f32 %v1886_v19, %v1885_v18  ;;  %v1888_v22 = vpop.f32.mrb[14].mxu1 }
 0x368   :  { %v1889_v23 = vpop.f32.mrb[15].mxu1 }
 0x369   :  { %v1655_v24 = vadd.f32 %v1887_v21, %v1852_v20 }
 0x36b   :  { %1660 = vst [vmem:[#allocation3] sm:$0x3] %v1655_v24 }
 0x36c   :  { %2200 = shalt.err (!%p2197_p4)
}
 0x36d   :  { %s2201_s15 = scalar_lea.hbm %s2913_s7, 32 }
 0x36e   :  { %p2202_p5 = scmp.ne.s32.totalorder %s2913_s7, %s2201_s15  ;;  %p2205_p6 = scmp.lt.u32.totalorder %s2201_s15, %s2913_s7 }
 0x370   :  { %p2207_p7 = pnand %p2205_p6, %p2202_p5 }
 0x372   :  { %2210 = shalt.err (!%p2207_p7)
}
 0x373   :  { %1670 = dma.vmem_to_hbm [thread:$0]  %s1668_s11, 32, %s2913_s7, [#allocation4]  }
 0x374   :  { %2211 = dma.done.wait [#allocation4], 32  }
 0x375   :  { %2212 = vsyncadd [#allocation4], 4294967264 }
 0x376   :  { %1674 = vsyncpa [#allocation4], 1 }

</bundles_post_ra>
